<compile_context>
chip_gen: v5e
topology: v5e:2x2
jax: 0.10.0
libtpu: 0.0.40
codegen_flags: <defaults>
</compile_context>

<pallas_src>
import functools

import jax
import jax.numpy as jnp
from jax.experimental import pallas as pl
from jax.experimental.pallas import tpu as pltpu


def _round_up(x, m):
    return (x + m - 1) // m * m


# ----------------------------------------------------------------------------
# Kernel 1: fused (bi)directional masked LSTM layer.
#   grid = (batch_blocks, time_blocks); time is sequential ("arbitrary"),
#   batch is "parallel". State (h, c) per direction lives in VMEM scratch and
#   is re-initialised whenever the time index wraps to 0 (new batch block).
# ----------------------------------------------------------------------------
def _make_bilstm_kernel(tb, Bb, H, bidirectional):
    def gate_update(xg, h_prev, c_prev, whh, m):
        g = xg + jnp.dot(h_prev, whh, preferred_element_type=jnp.float32)
        i_g = jax.nn.sigmoid(g[:, 0 * H:1 * H])
        f_g = jax.nn.sigmoid(g[:, 1 * H:2 * H])
        g_g = jnp.tanh(g[:, 2 * H:3 * H])
        o_g = jax.nn.sigmoid(g[:, 3 * H:4 * H])
        c_new = f_g * c_prev + i_g * g_g
        h_new = o_g * jnp.tanh(c_new)
        keep = m > 0.0                       # packed-sequence semantics: freeze
        c_out = jnp.where(keep, c_new, c_prev)
        h_out = jnp.where(keep, h_new, h_prev)
        return h_out, c_out

    if bidirectional:
        def kernel(x_f_ref, x_b_ref, m_f_ref, m_b_ref,
                   wih_f_ref, whh_f_ref, b_f_ref,
                   wih_b_ref, whh_b_ref, b_b_ref,
                   out_f_ref, out_b_ref,
                   xg_f_sc, xg_b_sc, h_f, c_f, h_b, c_b):
            @pl.when(pl.program_id(1) == 0)
            def _():
                h_f[...] = jnp.zeros_like(h_f)
                c_f[...] = jnp.zeros_like(c_f)
                h_b[...] = jnp.zeros_like(h_b)
                c_b[...] = jnp.zeros_like(c_b)

            E = x_f_ref.shape[-1]
            # Hoisted input projection: one GEMM per direction per time-block.
            xg_f_sc[...] = (jnp.dot(x_f_ref[...].reshape(tb * Bb, E),
                                    wih_f_ref[...],
                                    preferred_element_type=jnp.float32)
                            + b_f_ref[...]).reshape(tb, Bb, 4 * H)
            xg_b_sc[...] = (jnp.dot(x_b_ref[...].reshape(tb * Bb, E),
                                    wih_b_ref[...],
                                    preferred_element_type=jnp.float32)
                            + b_b_ref[...]).reshape(tb, Bb, 4 * H)

            whh_f = whh_f_ref[...]
            whh_b = whh_b_ref[...]

            def step(s, carry):
                # forward direction, local time s (global t = blk*tb + s)
                m = m_f_ref[s]
                h_new, c_new = gate_update(xg_f_sc[s], h_f[...], c_f[...],
                                           whh_f, m)
                h_f[...] = h_new
                c_f[...] = c_new
                out_f_ref[pl.ds(s, 1)] = (h_new * m)[None]   # zero at pads
                # backward direction, local time tb-1-s of the reversed block
                r = tb - 1 - s
                mb = m_b_ref[r]
                hb_new, cb_new = gate_update(xg_b_sc[r], h_b[...], c_b[...],
                                             whh_b, mb)
                h_b[...] = hb_new
                c_b[...] = cb_new
                out_b_ref[pl.ds(r, 1)] = (hb_new * mb)[None]
                return carry

            jax.lax.fori_loop(0, tb, step, 0, unroll=True)
        return kernel

    def kernel(x_f_ref, m_f_ref, wih_f_ref, whh_f_ref, b_f_ref,
               out_f_ref, xg_f_sc, h_f, c_f):
        @pl.when(pl.program_id(1) == 0)
        def _():
            h_f[...] = jnp.zeros_like(h_f)
            c_f[...] = jnp.zeros_like(c_f)

        E = x_f_ref.shape[-1]
        xg_f_sc[...] = (jnp.dot(x_f_ref[...].reshape(tb * Bb, E),
                                wih_f_ref[...],
                                preferred_element_type=jnp.float32)
                        + b_f_ref[...]).reshape(tb, Bb, 4 * H)
        whh_f = whh_f_ref[...]

        def step(s, carry):
            m = m_f_ref[s]
            h_new, c_new = gate_update(xg_f_sc[s], h_f[...], c_f[...], whh_f, m)
            h_f[...] = h_new
            c_f[...] = c_new
            out_f_ref[pl.ds(s, 1)] = (h_new * m)[None]
            return carry

        jax.lax.fori_loop(0, tb, step, 0, unroll=True)
    return kernel


def run_bilstm_layer(x, m, dir_params, bidirectional, t_blk, b_blk):
    """x: (T_pad, B_pad, E) f32, m: (T_pad, B_pad, 1) f32.
    Returns (out_fwd, out_bwd) each (T_pad, B_pad, H); out_bwd is None if uni."""
    T, B, E = x.shape
    H = dir_params[0]["w_hh"].shape[0]
    tb, Bb = t_blk, b_blk
    nb_t = T // tb
    nb_b = B // Bb

    x_fwd_spec = pl.BlockSpec((tb, Bb, E), lambda b, t: (t, b, 0))
    x_bwd_spec = pl.BlockSpec((tb, Bb, E), lambda b, t: (nb_t - 1 - t, b, 0))
    m_fwd_spec = pl.BlockSpec((tb, Bb, 1), lambda b, t: (t, b, 0))
    m_bwd_spec = pl.BlockSpec((tb, Bb, 1), lambda b, t: (nb_t - 1 - t, b, 0))
    w_ih_spec = pl.BlockSpec((E, 4 * H), lambda b, t: (0, 0))
    w_hh_spec = pl.BlockSpec((H, 4 * H), lambda b, t: (0, 0))
    bias_spec = pl.BlockSpec((1, 4 * H), lambda b, t: (0, 0))
    out_f_spec = pl.BlockSpec((tb, Bb, H), lambda b, t: (t, b, 0))
    out_b_spec = pl.BlockSpec((tb, Bb, H), lambda b, t: (nb_t - 1 - t, b, 0))

    kernel = _make_bilstm_kernel(tb, Bb, H, bidirectional)
    n_dirs = 2 if bidirectional else 1
    scratch = ([pltpu.VMEM((tb, Bb, 4 * H), jnp.float32) for _ in range(n_dirs)]
               + [pltpu.VMEM((Bb, H), jnp.float32) for _ in range(2 * n_dirs)])
    cparams = pltpu.CompilerParams(dimension_semantics=("parallel", "arbitrary"))

    if bidirectional:
        out_f, out_b = pl.pallas_call(
            kernel,
            out_shape=(jax.ShapeDtypeStruct((T, B, H), jnp.float32),
                       jax.ShapeDtypeStruct((T, B, H), jnp.float32)),
            grid=(nb_b, nb_t),
            in_specs=[x_fwd_spec, x_bwd_spec, m_fwd_spec, m_bwd_spec,
                      w_ih_spec, w_hh_spec, bias_spec,
                      w_ih_spec, w_hh_spec, bias_spec],
            out_specs=(out_f_spec, out_b_spec),
            scratch_shapes=scratch,
            compiler_params=cparams,
        )(x, x, m, m,
          dir_params[0]["w_ih"], dir_params[0]["w_hh"], dir_params[0]["b"],
          dir_params[1]["w_ih"], dir_params[1]["w_hh"], dir_params[1]["b"])
        return out_f, out_b

    out_f = pl.pallas_call(
        kernel,
        out_shape=jax.ShapeDtypeStruct((T, B, H), jnp.float32),
        grid=(nb_b, nb_t),
        in_specs=[x_fwd_spec, m_fwd_spec, w_ih_spec, w_hh_spec, bias_spec],
        out_specs=out_f_spec,
        scratch_shapes=scratch,
        compiler_params=cparams,
    )(x, m, dir_params[0]["w_ih"], dir_params[0]["w_hh"], dir_params[0]["b"])
    return out_f, None


# ----------------------------------------------------------------------------
# Kernel 2: fused Linear projection + CRF Viterbi forward recursion.
#   emit_t = h_fwd_t @ Wfc_f + h_bwd_t @ Wfc_b + b_fc computed in-kernel
#   (feats never materialised in HBM). Emits backpointers (T,B,K) and the
#   final masked delta (B,K).
# ----------------------------------------------------------------------------
def _make_crf_kernel(tb, Bb, K, bidirectional):
    def viterbi_block(emit_sc, m_ref, bp_ref, delta_sc, trans_v, start_v, t_idx):
        iota_k = jax.lax.broadcasted_iota(jnp.int32, (Bb, K), 1)
        zeros_i = jnp.zeros((Bb, K), jnp.int32)

        def step(s, carry):
            t_glob = t_idx * tb + s
            emit = emit_sc[s]                 # (Bb, K)
            m = m_ref[s]                      # (Bb, 1)
            delta_prev = delta_sc[...]
            # fused running max/argmax over the previous tag: one pass,
            # no (B, K, K) intermediate, no equality-based tie-break.
            best = delta_prev[:, 0:1] + trans_v[0:1, :]
            arg = zeros_i
            for p in range(1, K):
                cand = delta_prev[:, p:p + 1] + trans_v[p:p + 1, :]
                better = cand > best
                best = jnp.where(better, cand, best)
                arg = jnp.where(better, jnp.int32(p), arg)
            keep = m > 0.0
            is_first = t_glob == 0
            new_rec = best + emit
            new_init = start_v + emit
            delta_new = jnp.where(is_first, new_init,
                                  jnp.where(keep, new_rec, delta_prev))
            bp_val = jnp.where(jnp.logical_and(jnp.logical_not(is_first), keep),
                               arg, iota_k)
            delta_sc[...] = delta_new
            bp_ref[pl.ds(s, 1)] = bp_val[None]
            return carry

        jax.lax.fori_loop(0, tb, step, 0, unroll=True)

    if bidirectional:
        def kernel(hf_ref, hb_ref, m_ref, fcw_f_ref, fcw_b_ref, fcb_ref,
                   trans_ref, start_ref, end_ref,
                   bp_ref, dfin_ref, delta_sc, emit_sc):
            t_idx = pl.program_id(1)

            @pl.when(t_idx == 0)
            def _():
                delta_sc[...] = jnp.zeros_like(delta_sc)

            H = hf_ref.shape[-1]
            emit2d = (jnp.dot(hf_ref[...].reshape(tb * Bb, H), fcw_f_ref[...],
                              preferred_element_type=jnp.float32)
                      + jnp.dot(hb_ref[...].reshape(tb * Bb, H), fcw_b_ref[...],
                                preferred_element_type=jnp.float32)
                      + fcb_ref[...])
            emit_sc[...] = emit2d.reshape(tb, Bb, K)
            viterbi_block(emit_sc, m_ref, bp_ref, delta_sc,
                          trans_ref[...], start_ref[...], t_idx)

            @pl.when(t_idx == pl.num_programs(1) - 1)
            def _():
                dfin_ref[...] = delta_sc[...] + end_ref[...]
        return kernel

    def kernel(hf_ref, m_ref, fcw_ref, fcb_ref, trans_ref, start_ref, end_ref,
               bp_ref, dfin_ref, delta_sc, emit_sc):
        t_idx = pl.program_id(1)

        @pl.when(t_idx == 0)
        def _():
            delta_sc[...] = jnp.zeros_like(delta_sc)

        H = hf_ref.shape[-1]
        emit2d = (jnp.dot(hf_ref[...].reshape(tb * Bb, H), fcw_ref[...],
                          preferred_element_type=jnp.float32) + fcb_ref[...])
        emit_sc[...] = emit2d.reshape(tb, Bb, K)
        viterbi_block(emit_sc, m_ref, bp_ref, delta_sc,
                      trans_ref[...], start_ref[...], t_idx)

        @pl.when(t_idx == pl.num_programs(1) - 1)
        def _():
            dfin_ref[...] = delta_sc[...] + end_ref[...]
    return kernel


def crf_decode(h_f, h_b, mask, fc_w, fc_b, trans, start, end, t_blk, b_blk):
    """h_f/h_b: (T_pad, B_pad, H) (h_b None for uni), mask: (T_pad, B_pad, 1).
    Returns scores (B_pad,), tags (B_pad, T_pad)."""
    T, B, H = h_f.shape
    K = fc_w.shape[1]
    tb, Bb = t_blk, b_blk
    nb_t = T // tb
    nb_b = B // Bb
    bidirectional = h_b is not None

    h_spec = pl.BlockSpec((tb, Bb, H), lambda b, t: (t, b, 0))
    m_spec = pl.BlockSpec((tb, Bb, 1), lambda b, t: (t, b, 0))
    fcw_spec = pl.BlockSpec((H, K), lambda b, t: (0, 0))
    fcb_spec = pl.BlockSpec((1, K), lambda b, t: (0, 0))
    kk_spec = pl.BlockSpec((K, K), lambda b, t: (0, 0))
    k_spec = pl.BlockSpec((1, K), lambda b, t: (0, 0))
    bp_spec = pl.BlockSpec((tb, Bb, K), lambda b, t: (t, b, 0))
    dfin_spec = pl.BlockSpec((Bb, K), lambda b, t: (b, 0))

    kernel = _make_crf_kernel(tb, Bb, K, bidirectional)
    scratch = [pltpu.VMEM((Bb, K), jnp.float32),
               pltpu.VMEM((tb, Bb, K), jnp.float32)]

    if bidirectional:
        inputs = (h_f, h_b, mask, fc_w[:H], fc_w[H:], fc_b, trans, start, end)
        in_specs = [h_spec, h_spec, m_spec, fcw_spec, fcw_spec, fcb_spec,
                    kk_spec, k_spec, k_spec]
    else:
        inputs = (h_f, mask, fc_w, fc_b, trans, start, end)
        in_specs = [h_spec, m_spec, fcw_spec, fcb_spec, kk_spec, k_spec, k_spec]

    bp, delta_final = pl.pallas_call(
        kernel,
        out_shape=(jax.ShapeDtypeStruct((T, B, K), jnp.int32),
                   jax.ShapeDtypeStruct((B, K), jnp.float32)),
        grid=(nb_b, nb_t),
        in_specs=in_specs,
        out_specs=(bp_spec, dfin_spec),
        scratch_shapes=scratch,
        compiler_params=pltpu.CompilerParams(
            dimension_semantics=("parallel", "arbitrary")),
    )(*inputs)

    scores = jnp.max(delta_final, axis=-1)
    best_last = jnp.argmax(delta_final, axis=-1).astype(jnp.int32)

    # TODO(synk): backtrack stays in plain JAX (tiny at small T); move it into
    # a single-step Pallas kernel only if it shows up at production T.
    mask_tb = mask[:, :, 0]
    bp_rev = bp[1:][::-1]
    m_rev = mask_tb[1:][::-1]

    def step(cur, xs):
        bp_t, m_t = xs
        prev = jnp.take_along_axis(bp_t, cur[:, None], axis=1)[:, 0]
        new = jnp.where(m_t > 0.0, prev, cur).astype(jnp.int32)
        return new, new

    _, prevs = jax.lax.scan(step, best_last, (bp_rev, m_rev))
    tags_tb = jnp.concatenate([prevs[::-1], best_last[None]], axis=0)
    return scores, tags_tb.T


# ----------------------------------------------------------------------------
# Parameters (deterministic) and the full forward pass.
# ----------------------------------------------------------------------------
def make_params(words_num, embed_dim, hidden_dim, num_layers, out_class,
                bi_direction=True, seed=42):
    key = jax.random.PRNGKey(seed)
    Hh = hidden_dim // 2 if bi_direction else hidden_dim
    num_dirs = 2 if bi_direction else 1

    def nrm(k, shape, scale=0.1):
        return (scale * jax.random.normal(k, shape)).astype(jnp.float32)

    keys = jax.random.split(key, 4 + 3 * num_layers * num_dirs)
    ki = iter(keys)
    params = {
        "embed": nrm(next(ki), (words_num, embed_dim)),
        "fc_w": nrm(next(ki), (hidden_dim, out_class)),
        "fc_b": nrm(next(ki), (1, out_class)),
    }
    k1, k2, k3 = jax.random.split(next(ki), 3)
    params["crf_trans"] = nrm(k1, (out_class, out_class))
    params["crf_start"] = nrm(k2, (1, out_class))
    params["crf_end"] = nrm(k3, (1, out_class))

    layers = []
    for layer in range(num_layers):
        in_dim = embed_dim if layer == 0 else hidden_dim
        dirs = []
        for _d in range(num_dirs):
            dirs.append({
                "w_ih": nrm(next(ki), (in_dim, 4 * Hh)),
                "w_hh": nrm(next(ki), (Hh, 4 * Hh)),
                "b": nrm(next(ki), (1, 4 * Hh)),
            })
        layers.append(dirs)
    params["lstm"] = layers
    return params


@functools.partial(jax.jit, static_argnames=("bi_direction",))
def lstm_crf_forward(params, sentences, *, bi_direction=True):
    """sentences: (B, T) int32, pad index 0 at the sequence tail
    (same convention as the PyTorch module + pack_padded_sequence)."""
    B, T = sentences.shape

    # Pad batch to a sublane multiple (8) and time to a multiple of the time
    # block; padded rows/steps carry mask==0 and are sliced off at the end.
    B_blk = 8
    B_pad = _round_up(B, B_blk)
    T_blk = T if T <= 32 else 32
    T_pad = _round_up(T, T_blk)
    sent = jnp.zeros((B_pad, T_pad), jnp.int32).at[:B, :T].set(sentences)

    masks = sent > 0
    # Gather directly in time-major order (avoids a (B,T,E) activation transpose).
    # TODO(synk): could be fused into the first LSTM kernel via scalar-prefetch
    # row-gather of the embedding table; kept as a plain-JAX gather here.
    x = params["embed"][sent.T].astype(jnp.float32)              # (T_pad, B_pad, E)
    m = masks.T[:, :, None].astype(jnp.float32)                  # (T_pad, B_pad, 1)

    h_f, h_b = x, None
    for li, dirs in enumerate(params["lstm"]):
        if li == 0:
            layer_in = x
        else:
            layer_in = (jnp.concatenate([h_f, h_b], axis=-1)
                        if bi_direction else h_f)
        # TODO(synk): inter-layer dropout (training-mode nn.LSTM) not applied.
        h_f, h_b = run_bilstm_layer(layer_in, m, dirs, bi_direction, T_blk, B_blk)

    scores, tags = crf_decode(h_f, h_b, m, params["fc_w"], params["fc_b"],
                              params["crf_trans"], params["crf_start"],
                              params["crf_end"], T_blk, B_blk)
    # NOTE: tag positions past a sentence's length repeat its last valid tag
    # (PyTorch CRF returns variable-length lists; callers should mask).
    return scores[:B], tags[:B, :T]


# ----------------------------------------------------------------------------
if __name__ == "__main__":
    words_num, embed_dim, hidden_dim = 50, 16, 32
    num_layers, out_class = 1, 5
    B, T = 2, 8

    params = make_params(words_num, embed_dim, hidden_dim, num_layers,
                         out_class, bi_direction=True, seed=42)

    key = jax.random.PRNGKey(0)
    sentences = jax.random.randint(key, (B, T), 1, words_num, dtype=jnp.int32)
    # second sentence has length 5 (pad index 0 at the end, as the module expects)
    sentences = sentences.at[1, 5:].set(0)

    scores, tag_seq = lstm_crf_forward(params, sentences, bi_direction=True)
    scores = jax.block_until_ready(scores)
    tag_seq = jax.block_until_ready(tag_seq)

    assert scores.shape == (B,) and tag_seq.shape == (B, T)
    print("KERNEL_OK")
</pallas_src>

<mosaic_0001>
module attributes {stable_mosaic.version = 11 : i64} {
  func.func @kernel(%arg0: i32, %arg1: i32, %arg2: memref<8x8x16xf32, #tpu.memory_space<vmem>>, %arg3: memref<8x8x16xf32, #tpu.memory_space<vmem>>, %arg4: memref<8x8x1xf32, #tpu.memory_space<vmem>>, %arg5: memref<8x8x1xf32, #tpu.memory_space<vmem>>, %arg6: memref<16x64xf32, #tpu.memory_space<vmem>>, %arg7: memref<16x64xf32, #tpu.memory_space<vmem>>, %arg8: memref<1x64xf32, #tpu.memory_space<vmem>>, %arg9: memref<16x64xf32, #tpu.memory_space<vmem>>, %arg10: memref<16x64xf32, #tpu.memory_space<vmem>>, %arg11: memref<1x64xf32, #tpu.memory_space<vmem>>, %arg12: memref<8x8x16xf32, #tpu.memory_space<vmem>>, %arg13: memref<8x8x16xf32, #tpu.memory_space<vmem>>, %arg14: memref<8x8x64xf32, #tpu.memory_space<vmem>>, %arg15: memref<8x8x64xf32, #tpu.memory_space<vmem>>, %arg16: memref<8x16xf32, #tpu.memory_space<vmem>>, %arg17: memref<8x16xf32, #tpu.memory_space<vmem>>, %arg18: memref<8x16xf32, #tpu.memory_space<vmem>>, %arg19: memref<8x16xf32, #tpu.memory_space<vmem>>) attributes {dimension_semantics = [#tpu.dimension_semantics<parallel>, #tpu.dimension_semantics<arbitrary>], iteration_bounds = array<i64: 1, 1>, scalar_prefetch = 0 : i64, scratch_operands = 6 : i64, tpu.core_type = #tpu.core_type<tc>, window_params = [{transform_indices = @transform_0, window_bounds = array<i64: 8, 8, 16>}, {transform_indices = @transform_1, window_bounds = array<i64: 8, 8, 16>}, {transform_indices = @transform_2, window_bounds = array<i64: 8, 8, 1>}, {transform_indices = @transform_3, window_bounds = array<i64: 8, 8, 1>}, {pipeline_mode = #tpu.pipeline_mode<synchronous>, transform_indices = @transform_4, window_bounds = array<i64: 16, 64>}, {pipeline_mode = #tpu.pipeline_mode<synchronous>, transform_indices = @transform_5, window_bounds = array<i64: 16, 64>}, {pipeline_mode = #tpu.pipeline_mode<synchronous>, transform_indices = @transform_6, window_bounds = array<i64: 1, 64>}, {pipeline_mode = #tpu.pipeline_mode<synchronous>, transform_indices = @transform_7, window_bounds = array<i64: 16, 64>}, {pipeline_mode = #tpu.pipeline_mode<synchronous>, transform_indices = @transform_8, window_bounds = array<i64: 16, 64>}, {pipeline_mode = #tpu.pipeline_mode<synchronous>, transform_indices = @transform_9, window_bounds = array<i64: 1, 64>}, {transform_indices = @transform_10, window_bounds = array<i64: 8, 8, 16>}, {transform_indices = @transform_11, window_bounds = array<i64: 8, 8, 16>}]} {
    %c0_i32 = arith.constant 0 : i32
    %0 = arith.cmpi eq, %arg1, %c0_i32 : i32
    %1 = arith.extui %0 : i1 to i32
    %c0_i32_0 = arith.constant 0 : i32
    %2 = arith.cmpi ne, %1, %c0_i32_0 : i32
    scf.if %2 {
      %cst_338 = arith.constant 0.000000e+00 : f32
      %831 = vector.broadcast %cst_338 : f32 to vector<8x16xf32>
      %c0_339 = arith.constant 0 : index
      %c0_340 = arith.constant 0 : index
      %832 = vector.load %arg16[%c0_339, %c0_340] : memref<8x16xf32, #tpu.memory_space<vmem>>, vector<8x16xf32>
      tpu.vector_store %arg16[%c0_339, %c0_340], %831 {strides = array<i32>} : memref<8x16xf32, #tpu.memory_space<vmem>>, vector<8x16xf32>,
      %cst_341 = arith.constant 0.000000e+00 : f32
      %833 = vector.broadcast %cst_341 : f32 to vector<8x16xf32>
      %c0_342 = arith.constant 0 : index
      %c0_343 = arith.constant 0 : index
      %834 = vector.load %arg17[%c0_342, %c0_343] : memref<8x16xf32, #tpu.memory_space<vmem>>, vector<8x16xf32>
      tpu.vector_store %arg17[%c0_342, %c0_343], %833 {strides = array<i32>} : memref<8x16xf32, #tpu.memory_space<vmem>>, vector<8x16xf32>,
      %cst_344 = arith.constant 0.000000e+00 : f32
      %835 = vector.broadcast %cst_344 : f32 to vector<8x16xf32>
      %c0_345 = arith.constant 0 : index
      %c0_346 = arith.constant 0 : index
      %836 = vector.load %arg18[%c0_345, %c0_346] : memref<8x16xf32, #tpu.memory_space<vmem>>, vector<8x16xf32>
      tpu.vector_store %arg18[%c0_345, %c0_346], %835 {strides = array<i32>} : memref<8x16xf32, #tpu.memory_space<vmem>>, vector<8x16xf32>,
      %cst_347 = arith.constant 0.000000e+00 : f32
      %837 = vector.broadcast %cst_347 : f32 to vector<8x16xf32>
      %c0_348 = arith.constant 0 : index
      %c0_349 = arith.constant 0 : index
      %838 = vector.load %arg19[%c0_348, %c0_349] : memref<8x16xf32, #tpu.memory_space<vmem>>, vector<8x16xf32>
      tpu.vector_store %arg19[%c0_348, %c0_349], %837 {strides = array<i32>} : memref<8x16xf32, #tpu.memory_space<vmem>>, vector<8x16xf32>,
    } else {
    }
    %c0 = arith.constant 0 : index
    %c0_1 = arith.constant 0 : index
    %c0_2 = arith.constant 0 : index
    %3 = vector.load %arg2[%c0, %c0_1, %c0_2] : memref<8x8x16xf32, #tpu.memory_space<vmem>>, vector<8x8x16xf32>
    %4 = vector.shape_cast %3 : vector<8x8x16xf32> to vector<64x16xf32>
    %c0_3 = arith.constant 0 : index
    %c0_4 = arith.constant 0 : index
    %5 = vector.load %arg6[%c0_3, %c0_4] : memref<16x64xf32, #tpu.memory_space<vmem>>, vector<16x64xf32>
    %cst = arith.constant dense<0.000000e+00> : vector<64x64xf32>
    %6 = tpu.matmul %4, %5, %cst {dimension_numbers = #tpu.dot_dimension_numbers<[1], [0], [0], [1], [0, 0, 1, 1], [], []>} : vector<64x16xf32>, vector<16x64xf32>, vector<64x64xf32> -> vector<64x64xf32>
    %c0_5 = arith.constant 0 : index
    %c0_6 = arith.constant 0 : index
    %7 = vector.load %arg8[%c0_5, %c0_6] : memref<1x64xf32, #tpu.memory_space<vmem>>, vector<1x64xf32>
    %8 = vector.broadcast %7 : vector<1x64xf32> to vector<64x64xf32>
    %9 = arith.addf %6, %8 : vector<64x64xf32>
    %10 = vector.shape_cast %9 : vector<64x64xf32> to vector<8x8x64xf32>
    %c0_7 = arith.constant 0 : index
    %c0_8 = arith.constant 0 : index
    %c0_9 = arith.constant 0 : index
    %11 = vector.load %arg14[%c0_7, %c0_8, %c0_9] : memref<8x8x64xf32, #tpu.memory_space<vmem>>, vector<8x8x64xf32>
    tpu.vector_store %arg14[%c0_7, %c0_8, %c0_9], %10 {strides = array<i32>} : memref<8x8x64xf32, #tpu.memory_space<vmem>>, vector<8x8x64xf32>,
    %c0_10 = arith.constant 0 : index
    %c0_11 = arith.constant 0 : index
    %c0_12 = arith.constant 0 : index
    %12 = vector.load %arg3[%c0_10, %c0_11, %c0_12] : memref<8x8x16xf32, #tpu.memory_space<vmem>>, vector<8x8x16xf32>
    %13 = vector.shape_cast %12 : vector<8x8x16xf32> to vector<64x16xf32>
    %c0_13 = arith.constant 0 : index
    %c0_14 = arith.constant 0 : index
    %14 = vector.load %arg9[%c0_13, %c0_14] : memref<16x64xf32, #tpu.memory_space<vmem>>, vector<16x64xf32>
    %cst_15 = arith.constant dense<0.000000e+00> : vector<64x64xf32>
    %15 = tpu.matmul %13, %14, %cst_15 {dimension_numbers = #tpu.dot_dimension_numbers<[1], [0], [0], [1], [0, 0, 1, 1], [], []>} : vector<64x16xf32>, vector<16x64xf32>, vector<64x64xf32> -> vector<64x64xf32>
    %c0_16 = arith.constant 0 : index
    %c0_17 = arith.constant 0 : index
    %16 = vector.load %arg11[%c0_16, %c0_17] : memref<1x64xf32, #tpu.memory_space<vmem>>, vector<1x64xf32>
    %17 = vector.broadcast %16 : vector<1x64xf32> to vector<64x64xf32>
    %18 = arith.addf %15, %17 : vector<64x64xf32>
    %19 = vector.shape_cast %18 : vector<64x64xf32> to vector<8x8x64xf32>
    %c0_18 = arith.constant 0 : index
    %c0_19 = arith.constant 0 : index
    %c0_20 = arith.constant 0 : index
    %20 = vector.load %arg15[%c0_18, %c0_19, %c0_20] : memref<8x8x64xf32, #tpu.memory_space<vmem>>, vector<8x8x64xf32>
    tpu.vector_store %arg15[%c0_18, %c0_19, %c0_20], %19 {strides = array<i32>} : memref<8x8x64xf32, #tpu.memory_space<vmem>>, vector<8x8x64xf32>,
    %c0_21 = arith.constant 0 : index
    %c0_22 = arith.constant 0 : index
    %21 = vector.load %arg7[%c0_21, %c0_22] : memref<16x64xf32, #tpu.memory_space<vmem>>, vector<16x64xf32>
    %c0_23 = arith.constant 0 : index
    %c0_24 = arith.constant 0 : index
    %22 = vector.load %arg10[%c0_23, %c0_24] : memref<16x64xf32, #tpu.memory_space<vmem>>, vector<16x64xf32>
    %c0_i32_25 = arith.constant 0 : i32
    %23 = arith.index_cast %c0_i32_25 : i32 to index
    %c0_26 = arith.constant 0 : index
    %c0_27 = arith.constant 0 : index
    %24 = vector.load %arg4[%23, %c0_26, %c0_27] : memref<8x8x1xf32, #tpu.memory_space<vmem>>, vector<1x8x1xf32>
    %25 = vector.shape_cast %24 : vector<1x8x1xf32> to vector<8x1xf32>
    %26 = arith.index_cast %c0_i32_25 : i32 to index
    %c0_28 = arith.constant 0 : index
    %c0_29 = arith.constant 0 : index
    %27 = vector.load %arg14[%26, %c0_28, %c0_29] : memref<8x8x64xf32, #tpu.memory_space<vmem>>, vector<1x8x64xf32>
    %28 = vector.shape_cast %27 : vector<1x8x64xf32> to vector<8x64xf32>
    %c0_30 = arith.constant 0 : index
    %c0_31 = arith.constant 0 : index
    %29 = vector.load %arg16[%c0_30, %c0_31] : memref<8x16xf32, #tpu.memory_space<vmem>>, vector<8x16xf32>
    %c0_32 = arith.constant 0 : index
    %c0_33 = arith.constant 0 : index
    %30 = vector.load %arg17[%c0_32, %c0_33] : memref<8x16xf32, #tpu.memory_space<vmem>>, vector<8x16xf32>
    %cst_34 = arith.constant dense<0.000000e+00> : vector<8x64xf32>
    %31 = tpu.matmul %29, %21, %cst_34 {dimension_numbers = #tpu.dot_dimension_numbers<[1], [0], [0], [1], [0, 0, 1, 1], [], []>} : vector<8x16xf32>, vector<16x64xf32>, vector<8x64xf32> -> vector<8x64xf32>
    %32 = arith.addf %28, %31 : vector<8x64xf32>
    %33 = vector.extract_strided_slice %32 {offsets = [0, 0], sizes = [8, 16], strides = [1, 1]} : vector<8x64xf32> to vector<8x16xf32>
    %34 = arith.negf %33 : vector<8x16xf32>
    %35 = math.exp %34 : vector<8x16xf32>
    %cst_35 = arith.constant 1.000000e+00 : f32
    %36 = vector.broadcast %cst_35 : f32 to vector<8x16xf32>
    %37 = arith.addf %36, %35 : vector<8x16xf32>
    %38 = arith.divf %36, %37 : vector<8x16xf32>
    %39 = vector.extract_strided_slice %32 {offsets = [0, 16], sizes = [8, 16], strides = [1, 1]} : vector<8x64xf32> to vector<8x16xf32>
    %40 = arith.negf %39 : vector<8x16xf32>
    %41 = math.exp %40 : vector<8x16xf32>
    %cst_36 = arith.constant 1.000000e+00 : f32
    %42 = vector.broadcast %cst_36 : f32 to vector<8x16xf32>
    %43 = arith.addf %42, %41 : vector<8x16xf32>
    %44 = arith.divf %42, %43 : vector<8x16xf32>
    %45 = vector.extract_strided_slice %32 {offsets = [0, 32], sizes = [8, 16], strides = [1, 1]} : vector<8x64xf32> to vector<8x16xf32>
    %46 = math.tanh %45 : vector<8x16xf32>
    %47 = vector.extract_strided_slice %32 {offsets = [0, 48], sizes = [8, 16], strides = [1, 1]} : vector<8x64xf32> to vector<8x16xf32>
    %48 = arith.negf %47 : vector<8x16xf32>
    %49 = math.exp %48 : vector<8x16xf32>
    %cst_37 = arith.constant 1.000000e+00 : f32
    %50 = vector.broadcast %cst_37 : f32 to vector<8x16xf32>
    %51 = arith.addf %50, %49 : vector<8x16xf32>
    %52 = arith.divf %50, %51 : vector<8x16xf32>
    %53 = arith.mulf %44, %30 : vector<8x16xf32>
    %54 = arith.mulf %38, %46 : vector<8x16xf32>
    %55 = arith.addf %53, %54 : vector<8x16xf32>
    %56 = math.tanh %55 : vector<8x16xf32>
    %57 = arith.mulf %52, %56 : vector<8x16xf32>
    %cst_38 = arith.constant 0.000000e+00 : f32
    %58 = vector.broadcast %cst_38 : f32 to vector<8x1xf32>
    %59 = arith.cmpf ogt, %25, %58 : vector<8x1xf32>
    %60 = vector.shape_cast %59 : vector<8x1xi1> to vector<8x1xi1>
    %61 = vector.broadcast %60 : vector<8x1xi1> to vector<8x16xi1>
    %62 = arith.select %61, %55, %30 : vector<8x16xi1>, vector<8x16xf32>
    %63 = vector.shape_cast %59 : vector<8x1xi1> to vector<8x1xi1>
    %64 = vector.broadcast %63 : vector<8x1xi1> to vector<8x16xi1>
    %65 = arith.select %64, %57, %29 : vector<8x16xi1>, vector<8x16xf32>
    %c0_39 = arith.constant 0 : index
    %c0_40 = arith.constant 0 : index
    %66 = vector.load %arg16[%c0_39, %c0_40] : memref<8x16xf32, #tpu.memory_space<vmem>>, vector<8x16xf32>
    tpu.vector_store %arg16[%c0_39, %c0_40], %65 {strides = array<i32>} : memref<8x16xf32, #tpu.memory_space<vmem>>, vector<8x16xf32>,
    %c0_41 = arith.constant 0 : index
    %c0_42 = arith.constant 0 : index
    %67 = vector.load %arg17[%c0_41, %c0_42] : memref<8x16xf32, #tpu.memory_space<vmem>>, vector<8x16xf32>
    tpu.vector_store %arg17[%c0_41, %c0_42], %62 {strides = array<i32>} : memref<8x16xf32, #tpu.memory_space<vmem>>, vector<8x16xf32>,
    %68 = vector.broadcast %25 : vector<8x1xf32> to vector<8x16xf32>
    %69 = arith.mulf %65, %68 : vector<8x16xf32>
    %70 = vector.shape_cast %69 : vector<8x16xf32> to vector<1x8x16xf32>
    %71 = arith.index_cast %c0_i32_25 : i32 to index
    %c0_43 = arith.constant 0 : index
    %c0_44 = arith.constant 0 : index
    %72 = vector.load %arg12[%71, %c0_43, %c0_44] : memref<8x8x16xf32, #tpu.memory_space<vmem>>, vector<1x8x16xf32>
    tpu.vector_store %arg12[%71, %c0_43, %c0_44], %70 {strides = array<i32>} : memref<8x8x16xf32, #tpu.memory_space<vmem>>, vector<1x8x16xf32>,
    %c7_i32 = arith.constant 7 : i32
    %73 = arith.subi %c7_i32, %c0_i32_25 : i32
    %74 = arith.index_cast %73 : i32 to index
    %c0_45 = arith.constant 0 : index
    %c0_46 = arith.constant 0 : index
    %75 = vector.load %arg5[%74, %c0_45, %c0_46] : memref<8x8x1xf32, #tpu.memory_space<vmem>>, vector<1x8x1xf32>
    %76 = vector.shape_cast %75 : vector<1x8x1xf32> to vector<8x1xf32>
    %77 = arith.index_cast %73 : i32 to index
    %c0_47 = arith.constant 0 : index
    %c0_48 = arith.constant 0 : index
    %78 = vector.load %arg15[%77, %c0_47, %c0_48] : memref<8x8x64xf32, #tpu.memory_space<vmem>>, vector<1x8x64xf32>
    %79 = vector.shape_cast %78 : vector<1x8x64xf32> to vector<8x64xf32>
    %c0_49 = arith.constant 0 : index
    %c0_50 = arith.constant 0 : index
    %80 = vector.load %arg18[%c0_49, %c0_50] : memref<8x16xf32, #tpu.memory_space<vmem>>, vector<8x16xf32>
    %c0_51 = arith.constant 0 : index
    %c0_52 = arith.constant 0 : index
    %81 = vector.load %arg19[%c0_51, %c0_52] : memref<8x16xf32, #tpu.memory_space<vmem>>, vector<8x16xf32>
    %cst_53 = arith.constant dense<0.000000e+00> : vector<8x64xf32>
    %82 = tpu.matmul %80, %22, %cst_53 {dimension_numbers = #tpu.dot_dimension_numbers<[1], [0], [0], [1], [0, 0, 1, 1], [], []>} : vector<8x16xf32>, vector<16x64xf32>, vector<8x64xf32> -> vector<8x64xf32>
    %83 = arith.addf %79, %82 : vector<8x64xf32>
    %84 = vector.extract_strided_slice %83 {offsets = [0, 0], sizes = [8, 16], strides = [1, 1]} : vector<8x64xf32> to vector<8x16xf32>
    %85 = arith.negf %84 : vector<8x16xf32>
    %86 = math.exp %85 : vector<8x16xf32>
    %cst_54 = arith.constant 1.000000e+00 : f32
    %87 = vector.broadcast %cst_54 : f32 to vector<8x16xf32>
    %88 = arith.addf %87, %86 : vector<8x16xf32>
    %89 = arith.divf %87, %88 : vector<8x16xf32>
    %90 = vector.extract_strided_slice %83 {offsets = [0, 16], sizes = [8, 16], strides = [1, 1]} : vector<8x64xf32> to vector<8x16xf32>
    %91 = arith.negf %90 : vector<8x16xf32>
    %92 = math.exp %91 : vector<8x16xf32>
    %cst_55 = arith.constant 1.000000e+00 : f32
    %93 = vector.broadcast %cst_55 : f32 to vector<8x16xf32>
    %94 = arith.addf %93, %92 : vector<8x16xf32>
    %95 = arith.divf %93, %94 : vector<8x16xf32>
    %96 = vector.extract_strided_slice %83 {offsets = [0, 32], sizes = [8, 16], strides = [1, 1]} : vector<8x64xf32> to vector<8x16xf32>
    %97 = math.tanh %96 : vector<8x16xf32>
    %98 = vector.extract_strided_slice %83 {offsets = [0, 48], sizes = [8, 16], strides = [1, 1]} : vector<8x64xf32> to vector<8x16xf32>
    %99 = arith.negf %98 : vector<8x16xf32>
    %100 = math.exp %99 : vector<8x16xf32>
    %cst_56 = arith.constant 1.000000e+00 : f32
    %101 = vector.broadcast %cst_56 : f32 to vector<8x16xf32>
    %102 = arith.addf %101, %100 : vector<8x16xf32>
    %103 = arith.divf %101, %102 : vector<8x16xf32>
    %104 = arith.mulf %95, %81 : vector<8x16xf32>
    %105 = arith.mulf %89, %97 : vector<8x16xf32>
    %106 = arith.addf %104, %105 : vector<8x16xf32>
    %107 = math.tanh %106 : vector<8x16xf32>
    %108 = arith.mulf %103, %107 : vector<8x16xf32>
    %cst_57 = arith.constant 0.000000e+00 : f32
    %109 = vector.broadcast %cst_57 : f32 to vector<8x1xf32>
    %110 = arith.cmpf ogt, %76, %109 : vector<8x1xf32>
    %111 = vector.shape_cast %110 : vector<8x1xi1> to vector<8x1xi1>
    %112 = vector.broadcast %111 : vector<8x1xi1> to vector<8x16xi1>
    %113 = arith.select %112, %106, %81 : vector<8x16xi1>, vector<8x16xf32>
    %114 = vector.shape_cast %110 : vector<8x1xi1> to vector<8x1xi1>
    %115 = vector.broadcast %114 : vector<8x1xi1> to vector<8x16xi1>
    %116 = arith.select %115, %108, %80 : vector<8x16xi1>, vector<8x16xf32>
    %c0_58 = arith.constant 0 : index
    %c0_59 = arith.constant 0 : index
    %117 = vector.load %arg18[%c0_58, %c0_59] : memref<8x16xf32, #tpu.memory_space<vmem>>, vector<8x16xf32>
    tpu.vector_store %arg18[%c0_58, %c0_59], %116 {strides = array<i32>} : memref<8x16xf32, #tpu.memory_space<vmem>>, vector<8x16xf32>,
    %c0_60 = arith.constant 0 : index
    %c0_61 = arith.constant 0 : index
    %118 = vector.load %arg19[%c0_60, %c0_61] : memref<8x16xf32, #tpu.memory_space<vmem>>, vector<8x16xf32>
    tpu.vector_store %arg19[%c0_60, %c0_61], %113 {strides = array<i32>} : memref<8x16xf32, #tpu.memory_space<vmem>>, vector<8x16xf32>,
    %119 = vector.broadcast %76 : vector<8x1xf32> to vector<8x16xf32>
    %120 = arith.mulf %116, %119 : vector<8x16xf32>
    %121 = vector.shape_cast %120 : vector<8x16xf32> to vector<1x8x16xf32>
    %122 = arith.index_cast %73 : i32 to index
    %c0_62 = arith.constant 0 : index
    %c0_63 = arith.constant 0 : index
    %123 = vector.load %arg13[%122, %c0_62, %c0_63] : memref<8x8x16xf32, #tpu.memory_space<vmem>>, vector<1x8x16xf32>
    tpu.vector_store %arg13[%122, %c0_62, %c0_63], %121 {strides = array<i32>} : memref<8x8x16xf32, #tpu.memory_space<vmem>>, vector<1x8x16xf32>,
    %c1_i32 = arith.constant 1 : i32
    %124 = arith.index_cast %c1_i32 : i32 to index
    %c0_64 = arith.constant 0 : index
    %c0_65 = arith.constant 0 : index
    %125 = vector.load %arg4[%124, %c0_64, %c0_65] : memref<8x8x1xf32, #tpu.memory_space<vmem>>, vector<1x8x1xf32>
    %126 = vector.shape_cast %125 : vector<1x8x1xf32> to vector<8x1xf32>
    %127 = arith.index_cast %c1_i32 : i32 to index
    %c0_66 = arith.constant 0 : index
    %c0_67 = arith.constant 0 : index
    %128 = vector.load %arg14[%127, %c0_66, %c0_67] : memref<8x8x64xf32, #tpu.memory_space<vmem>>, vector<1x8x64xf32>
    %129 = vector.shape_cast %128 : vector<1x8x64xf32> to vector<8x64xf32>
    %c0_68 = arith.constant 0 : index
    %c0_69 = arith.constant 0 : index
    %130 = vector.load %arg16[%c0_68, %c0_69] : memref<8x16xf32, #tpu.memory_space<vmem>>, vector<8x16xf32>
    %c0_70 = arith.constant 0 : index
    %c0_71 = arith.constant 0 : index
    %131 = vector.load %arg17[%c0_70, %c0_71] : memref<8x16xf32, #tpu.memory_space<vmem>>, vector<8x16xf32>
    %cst_72 = arith.constant dense<0.000000e+00> : vector<8x64xf32>
    %132 = tpu.matmul %130, %21, %cst_72 {dimension_numbers = #tpu.dot_dimension_numbers<[1], [0], [0], [1], [0, 0, 1, 1], [], []>} : vector<8x16xf32>, vector<16x64xf32>, vector<8x64xf32> -> vector<8x64xf32>
    %133 = arith.addf %129, %132 : vector<8x64xf32>
    %134 = vector.extract_strided_slice %133 {offsets = [0, 0], sizes = [8, 16], strides = [1, 1]} : vector<8x64xf32> to vector<8x16xf32>
    %135 = arith.negf %134 : vector<8x16xf32>
    %136 = math.exp %135 : vector<8x16xf32>
    %cst_73 = arith.constant 1.000000e+00 : f32
    %137 = vector.broadcast %cst_73 : f32 to vector<8x16xf32>
    %138 = arith.addf %137, %136 : vector<8x16xf32>
    %139 = arith.divf %137, %138 : vector<8x16xf32>
    %140 = vector.extract_strided_slice %133 {offsets = [0, 16], sizes = [8, 16], strides = [1, 1]} : vector<8x64xf32> to vector<8x16xf32>
    %141 = arith.negf %140 : vector<8x16xf32>
    %142 = math.exp %141 : vector<8x16xf32>
    %cst_74 = arith.constant 1.000000e+00 : f32
    %143 = vector.broadcast %cst_74 : f32 to vector<8x16xf32>
    %144 = arith.addf %143, %142 : vector<8x16xf32>
    %145 = arith.divf %143, %144 : vector<8x16xf32>
    %146 = vector.extract_strided_slice %133 {offsets = [0, 32], sizes = [8, 16], strides = [1, 1]} : vector<8x64xf32> to vector<8x16xf32>
    %147 = math.tanh %146 : vector<8x16xf32>
    %148 = vector.extract_strided_slice %133 {offsets = [0, 48], sizes = [8, 16], strides = [1, 1]} : vector<8x64xf32> to vector<8x16xf32>
    %149 = arith.negf %148 : vector<8x16xf32>
    %150 = math.exp %149 : vector<8x16xf32>
    %cst_75 = arith.constant 1.000000e+00 : f32
    %151 = vector.broadcast %cst_75 : f32 to vector<8x16xf32>
    %152 = arith.addf %151, %150 : vector<8x16xf32>
    %153 = arith.divf %151, %152 : vector<8x16xf32>
    %154 = arith.mulf %145, %131 : vector<8x16xf32>
    %155 = arith.mulf %139, %147 : vector<8x16xf32>
    %156 = arith.addf %154, %155 : vector<8x16xf32>
    %157 = math.tanh %156 : vector<8x16xf32>
    %158 = arith.mulf %153, %157 : vector<8x16xf32>
    %cst_76 = arith.constant 0.000000e+00 : f32
    %159 = vector.broadcast %cst_76 : f32 to vector<8x1xf32>
    %160 = arith.cmpf ogt, %126, %159 : vector<8x1xf32>
    %161 = vector.shape_cast %160 : vector<8x1xi1> to vector<8x1xi1>
    %162 = vector.broadcast %161 : vector<8x1xi1> to vector<8x16xi1>
    %163 = arith.select %162, %156, %131 : vector<8x16xi1>, vector<8x16xf32>
    %164 = vector.shape_cast %160 : vector<8x1xi1> to vector<8x1xi1>
    %165 = vector.broadcast %164 : vector<8x1xi1> to vector<8x16xi1>
    %166 = arith.select %165, %158, %130 : vector<8x16xi1>, vector<8x16xf32>
    %c0_77 = arith.constant 0 : index
    %c0_78 = arith.constant 0 : index
    %167 = vector.load %arg16[%c0_77, %c0_78] : memref<8x16xf32, #tpu.memory_space<vmem>>, vector<8x16xf32>
    tpu.vector_store %arg16[%c0_77, %c0_78], %166 {strides = array<i32>} : memref<8x16xf32, #tpu.memory_space<vmem>>, vector<8x16xf32>,
    %c0_79 = arith.constant 0 : index
    %c0_80 = arith.constant 0 : index
    %168 = vector.load %arg17[%c0_79, %c0_80] : memref<8x16xf32, #tpu.memory_space<vmem>>, vector<8x16xf32>
    tpu.vector_store %arg17[%c0_79, %c0_80], %163 {strides = array<i32>} : memref<8x16xf32, #tpu.memory_space<vmem>>, vector<8x16xf32>,
    %169 = vector.broadcast %126 : vector<8x1xf32> to vector<8x16xf32>
    %170 = arith.mulf %166, %169 : vector<8x16xf32>
    %171 = vector.shape_cast %170 : vector<8x16xf32> to vector<1x8x16xf32>
    %172 = arith.index_cast %c1_i32 : i32 to index
    %c0_81 = arith.constant 0 : index
    %c0_82 = arith.constant 0 : index
    %173 = vector.load %arg12[%172, %c0_81, %c0_82] : memref<8x8x16xf32, #tpu.memory_space<vmem>>, vector<1x8x16xf32>
    tpu.vector_store %arg12[%172, %c0_81, %c0_82], %171 {strides = array<i32>} : memref<8x8x16xf32, #tpu.memory_space<vmem>>, vector<1x8x16xf32>,
    %c7_i32_83 = arith.constant 7 : i32
    %174 = arith.subi %c7_i32_83, %c1_i32 : i32
    %175 = arith.index_cast %174 : i32 to index
    %c0_84 = arith.constant 0 : index
    %c0_85 = arith.constant 0 : index
    %176 = vector.load %arg5[%175, %c0_84, %c0_85] : memref<8x8x1xf32, #tpu.memory_space<vmem>>, vector<1x8x1xf32>
    %177 = vector.shape_cast %176 : vector<1x8x1xf32> to vector<8x1xf32>
    %178 = arith.index_cast %174 : i32 to index
    %c0_86 = arith.constant 0 : index
    %c0_87 = arith.constant 0 : index
    %179 = vector.load %arg15[%178, %c0_86, %c0_87] : memref<8x8x64xf32, #tpu.memory_space<vmem>>, vector<1x8x64xf32>
    %180 = vector.shape_cast %179 : vector<1x8x64xf32> to vector<8x64xf32>
    %c0_88 = arith.constant 0 : index
    %c0_89 = arith.constant 0 : index
    %181 = vector.load %arg18[%c0_88, %c0_89] : memref<8x16xf32, #tpu.memory_space<vmem>>, vector<8x16xf32>
    %c0_90 = arith.constant 0 : index
    %c0_91 = arith.constant 0 : index
    %182 = vector.load %arg19[%c0_90, %c0_91] : memref<8x16xf32, #tpu.memory_space<vmem>>, vector<8x16xf32>
    %cst_92 = arith.constant dense<0.000000e+00> : vector<8x64xf32>
    %183 = tpu.matmul %181, %22, %cst_92 {dimension_numbers = #tpu.dot_dimension_numbers<[1], [0], [0], [1], [0, 0, 1, 1], [], []>} : vector<8x16xf32>, vector<16x64xf32>, vector<8x64xf32> -> vector<8x64xf32>
    %184 = arith.addf %180, %183 : vector<8x64xf32>
    %185 = vector.extract_strided_slice %184 {offsets = [0, 0], sizes = [8, 16], strides = [1, 1]} : vector<8x64xf32> to vector<8x16xf32>
    %186 = arith.negf %185 : vector<8x16xf32>
    %187 = math.exp %186 : vector<8x16xf32>
    %cst_93 = arith.constant 1.000000e+00 : f32
    %188 = vector.broadcast %cst_93 : f32 to vector<8x16xf32>
    %189 = arith.addf %188, %187 : vector<8x16xf32>
    %190 = arith.divf %188, %189 : vector<8x16xf32>
    %191 = vector.extract_strided_slice %184 {offsets = [0, 16], sizes = [8, 16], strides = [1, 1]} : vector<8x64xf32> to vector<8x16xf32>
    %192 = arith.negf %191 : vector<8x16xf32>
    %193 = math.exp %192 : vector<8x16xf32>
    %cst_94 = arith.constant 1.000000e+00 : f32
    %194 = vector.broadcast %cst_94 : f32 to vector<8x16xf32>
    %195 = arith.addf %194, %193 : vector<8x16xf32>
    %196 = arith.divf %194, %195 : vector<8x16xf32>
    %197 = vector.extract_strided_slice %184 {offsets = [0, 32], sizes = [8, 16], strides = [1, 1]} : vector<8x64xf32> to vector<8x16xf32>
    %198 = math.tanh %197 : vector<8x16xf32>
    %199 = vector.extract_strided_slice %184 {offsets = [0, 48], sizes = [8, 16], strides = [1, 1]} : vector<8x64xf32> to vector<8x16xf32>
    %200 = arith.negf %199 : vector<8x16xf32>
    %201 = math.exp %200 : vector<8x16xf32>
    %cst_95 = arith.constant 1.000000e+00 : f32
    %202 = vector.broadcast %cst_95 : f32 to vector<8x16xf32>
    %203 = arith.addf %202, %201 : vector<8x16xf32>
    %204 = arith.divf %202, %203 : vector<8x16xf32>
    %205 = arith.mulf %196, %182 : vector<8x16xf32>
    %206 = arith.mulf %190, %198 : vector<8x16xf32>
    %207 = arith.addf %205, %206 : vector<8x16xf32>
    %208 = math.tanh %207 : vector<8x16xf32>
    %209 = arith.mulf %204, %208 : vector<8x16xf32>
    %cst_96 = arith.constant 0.000000e+00 : f32
    %210 = vector.broadcast %cst_96 : f32 to vector<8x1xf32>
    %211 = arith.cmpf ogt, %177, %210 : vector<8x1xf32>
    %212 = vector.shape_cast %211 : vector<8x1xi1> to vector<8x1xi1>
    %213 = vector.broadcast %212 : vector<8x1xi1> to vector<8x16xi1>
    %214 = arith.select %213, %207, %182 : vector<8x16xi1>, vector<8x16xf32>
    %215 = vector.shape_cast %211 : vector<8x1xi1> to vector<8x1xi1>
    %216 = vector.broadcast %215 : vector<8x1xi1> to vector<8x16xi1>
    %217 = arith.select %216, %209, %181 : vector<8x16xi1>, vector<8x16xf32>
    %c0_97 = arith.constant 0 : index
    %c0_98 = arith.constant 0 : index
    %218 = vector.load %arg18[%c0_97, %c0_98] : memref<8x16xf32, #tpu.memory_space<vmem>>, vector<8x16xf32>
    tpu.vector_store %arg18[%c0_97, %c0_98], %217 {strides = array<i32>} : memref<8x16xf32, #tpu.memory_space<vmem>>, vector<8x16xf32>,
    %c0_99 = arith.constant 0 : index
    %c0_100 = arith.constant 0 : index
    %219 = vector.load %arg19[%c0_99, %c0_100] : memref<8x16xf32, #tpu.memory_space<vmem>>, vector<8x16xf32>
    tpu.vector_store %arg19[%c0_99, %c0_100], %214 {strides = array<i32>} : memref<8x16xf32, #tpu.memory_space<vmem>>, vector<8x16xf32>,
    %220 = vector.broadcast %177 : vector<8x1xf32> to vector<8x16xf32>
    %221 = arith.mulf %217, %220 : vector<8x16xf32>
    %222 = vector.shape_cast %221 : vector<8x16xf32> to vector<1x8x16xf32>
    %223 = arith.index_cast %174 : i32 to index
    %c0_101 = arith.constant 0 : index
    %c0_102 = arith.constant 0 : index
    %224 = vector.load %arg13[%223, %c0_101, %c0_102] : memref<8x8x16xf32, #tpu.memory_space<vmem>>, vector<1x8x16xf32>
    tpu.vector_store %arg13[%223, %c0_101, %c0_102], %222 {strides = array<i32>} : memref<8x8x16xf32, #tpu.memory_space<vmem>>, vector<1x8x16xf32>,
    %c2_i32 = arith.constant 2 : i32
    %225 = arith.index_cast %c2_i32 : i32 to index
    %c0_103 = arith.constant 0 : index
    %c0_104 = arith.constant 0 : index
    %226 = vector.load %arg4[%225, %c0_103, %c0_104] : memref<8x8x1xf32, #tpu.memory_space<vmem>>, vector<1x8x1xf32>
    %227 = vector.shape_cast %226 : vector<1x8x1xf32> to vector<8x1xf32>
    %228 = arith.index_cast %c2_i32 : i32 to index
    %c0_105 = arith.constant 0 : index
    %c0_106 = arith.constant 0 : index
    %229 = vector.load %arg14[%228, %c0_105, %c0_106] : memref<8x8x64xf32, #tpu.memory_space<vmem>>, vector<1x8x64xf32>
    %230 = vector.shape_cast %229 : vector<1x8x64xf32> to vector<8x64xf32>
    %c0_107 = arith.constant 0 : index
    %c0_108 = arith.constant 0 : index
    %231 = vector.load %arg16[%c0_107, %c0_108] : memref<8x16xf32, #tpu.memory_space<vmem>>, vector<8x16xf32>
    %c0_109 = arith.constant 0 : index
    %c0_110 = arith.constant 0 : index
    %232 = vector.load %arg17[%c0_109, %c0_110] : memref<8x16xf32, #tpu.memory_space<vmem>>, vector<8x16xf32>
    %cst_111 = arith.constant dense<0.000000e+00> : vector<8x64xf32>
    %233 = tpu.matmul %231, %21, %cst_111 {dimension_numbers = #tpu.dot_dimension_numbers<[1], [0], [0], [1], [0, 0, 1, 1], [], []>} : vector<8x16xf32>, vector<16x64xf32>, vector<8x64xf32> -> vector<8x64xf32>
    %234 = arith.addf %230, %233 : vector<8x64xf32>
    %235 = vector.extract_strided_slice %234 {offsets = [0, 0], sizes = [8, 16], strides = [1, 1]} : vector<8x64xf32> to vector<8x16xf32>
    %236 = arith.negf %235 : vector<8x16xf32>
    %237 = math.exp %236 : vector<8x16xf32>
    %cst_112 = arith.constant 1.000000e+00 : f32
    %238 = vector.broadcast %cst_112 : f32 to vector<8x16xf32>
    %239 = arith.addf %238, %237 : vector<8x16xf32>
    %240 = arith.divf %238, %239 : vector<8x16xf32>
    %241 = vector.extract_strided_slice %234 {offsets = [0, 16], sizes = [8, 16], strides = [1, 1]} : vector<8x64xf32> to vector<8x16xf32>
    %242 = arith.negf %241 : vector<8x16xf32>
    %243 = math.exp %242 : vector<8x16xf32>
    %cst_113 = arith.constant 1.000000e+00 : f32
    %244 = vector.broadcast %cst_113 : f32 to vector<8x16xf32>
    %245 = arith.addf %244, %243 : vector<8x16xf32>
    %246 = arith.divf %244, %245 : vector<8x16xf32>
    %247 = vector.extract_strided_slice %234 {offsets = [0, 32], sizes = [8, 16], strides = [1, 1]} : vector<8x64xf32> to vector<8x16xf32>
    %248 = math.tanh %247 : vector<8x16xf32>
    %249 = vector.extract_strided_slice %234 {offsets = [0, 48], sizes = [8, 16], strides = [1, 1]} : vector<8x64xf32> to vector<8x16xf32>
    %250 = arith.negf %249 : vector<8x16xf32>
    %251 = math.exp %250 : vector<8x16xf32>
    %cst_114 = arith.constant 1.000000e+00 : f32
    %252 = vector.broadcast %cst_114 : f32 to vector<8x16xf32>
    %253 = arith.addf %252, %251 : vector<8x16xf32>
    %254 = arith.divf %252, %253 : vector<8x16xf32>
    %255 = arith.mulf %246, %232 : vector<8x16xf32>
    %256 = arith.mulf %240, %248 : vector<8x16xf32>
    %257 = arith.addf %255, %256 : vector<8x16xf32>
    %258 = math.tanh %257 : vector<8x16xf32>
    %259 = arith.mulf %254, %258 : vector<8x16xf32>
    %cst_115 = arith.constant 0.000000e+00 : f32
    %260 = vector.broadcast %cst_115 : f32 to vector<8x1xf32>
    %261 = arith.cmpf ogt, %227, %260 : vector<8x1xf32>
    %262 = vector.shape_cast %261 : vector<8x1xi1> to vector<8x1xi1>
    %263 = vector.broadcast %262 : vector<8x1xi1> to vector<8x16xi1>
    %264 = arith.select %263, %257, %232 : vector<8x16xi1>, vector<8x16xf32>
    %265 = vector.shape_cast %261 : vector<8x1xi1> to vector<8x1xi1>
    %266 = vector.broadcast %265 : vector<8x1xi1> to vector<8x16xi1>
    %267 = arith.select %266, %259, %231 : vector<8x16xi1>, vector<8x16xf32>
    %c0_116 = arith.constant 0 : index
    %c0_117 = arith.constant 0 : index
    %268 = vector.load %arg16[%c0_116, %c0_117] : memref<8x16xf32, #tpu.memory_space<vmem>>, vector<8x16xf32>
    tpu.vector_store %arg16[%c0_116, %c0_117], %267 {strides = array<i32>} : memref<8x16xf32, #tpu.memory_space<vmem>>, vector<8x16xf32>,
    %c0_118 = arith.constant 0 : index
    %c0_119 = arith.constant 0 : index
    %269 = vector.load %arg17[%c0_118, %c0_119] : memref<8x16xf32, #tpu.memory_space<vmem>>, vector<8x16xf32>
    tpu.vector_store %arg17[%c0_118, %c0_119], %264 {strides = array<i32>} : memref<8x16xf32, #tpu.memory_space<vmem>>, vector<8x16xf32>,
    %270 = vector.broadcast %227 : vector<8x1xf32> to vector<8x16xf32>
    %271 = arith.mulf %267, %270 : vector<8x16xf32>
    %272 = vector.shape_cast %271 : vector<8x16xf32> to vector<1x8x16xf32>
    %273 = arith.index_cast %c2_i32 : i32 to index
    %c0_120 = arith.constant 0 : index
    %c0_121 = arith.constant 0 : index
    %274 = vector.load %arg12[%273, %c0_120, %c0_121] : memref<8x8x16xf32, #tpu.memory_space<vmem>>, vector<1x8x16xf32>
    tpu.vector_store %arg12[%273, %c0_120, %c0_121], %272 {strides = array<i32>} : memref<8x8x16xf32, #tpu.memory_space<vmem>>, vector<1x8x16xf32>,
    %c7_i32_122 = arith.constant 7 : i32
    %275 = arith.subi %c7_i32_122, %c2_i32 : i32
    %276 = arith.index_cast %275 : i32 to index
    %c0_123 = arith.constant 0 : index
    %c0_124 = arith.constant 0 : index
    %277 = vector.load %arg5[%276, %c0_123, %c0_124] : memref<8x8x1xf32, #tpu.memory_space<vmem>>, vector<1x8x1xf32>
    %278 = vector.shape_cast %277 : vector<1x8x1xf32> to vector<8x1xf32>
    %279 = arith.index_cast %275 : i32 to index
    %c0_125 = arith.constant 0 : index
    %c0_126 = arith.constant 0 : index
    %280 = vector.load %arg15[%279, %c0_125, %c0_126] : memref<8x8x64xf32, #tpu.memory_space<vmem>>, vector<1x8x64xf32>
    %281 = vector.shape_cast %280 : vector<1x8x64xf32> to vector<8x64xf32>
    %c0_127 = arith.constant 0 : index
    %c0_128 = arith.constant 0 : index
    %282 = vector.load %arg18[%c0_127, %c0_128] : memref<8x16xf32, #tpu.memory_space<vmem>>, vector<8x16xf32>
    %c0_129 = arith.constant 0 : index
    %c0_130 = arith.constant 0 : index
    %283 = vector.load %arg19[%c0_129, %c0_130] : memref<8x16xf32, #tpu.memory_space<vmem>>, vector<8x16xf32>
    %cst_131 = arith.constant dense<0.000000e+00> : vector<8x64xf32>
    %284 = tpu.matmul %282, %22, %cst_131 {dimension_numbers = #tpu.dot_dimension_numbers<[1], [0], [0], [1], [0, 0, 1, 1], [], []>} : vector<8x16xf32>, vector<16x64xf32>, vector<8x64xf32> -> vector<8x64xf32>
    %285 = arith.addf %281, %284 : vector<8x64xf32>
    %286 = vector.extract_strided_slice %285 {offsets = [0, 0], sizes = [8, 16], strides = [1, 1]} : vector<8x64xf32> to vector<8x16xf32>
    %287 = arith.negf %286 : vector<8x16xf32>
    %288 = math.exp %287 : vector<8x16xf32>
    %cst_132 = arith.constant 1.000000e+00 : f32
    %289 = vector.broadcast %cst_132 : f32 to vector<8x16xf32>
    %290 = arith.addf %289, %288 : vector<8x16xf32>
    %291 = arith.divf %289, %290 : vector<8x16xf32>
    %292 = vector.extract_strided_slice %285 {offsets = [0, 16], sizes = [8, 16], strides = [1, 1]} : vector<8x64xf32> to vector<8x16xf32>
    %293 = arith.negf %292 : vector<8x16xf32>
    %294 = math.exp %293 : vector<8x16xf32>
    %cst_133 = arith.constant 1.000000e+00 : f32
    %295 = vector.broadcast %cst_133 : f32 to vector<8x16xf32>
    %296 = arith.addf %295, %294 : vector<8x16xf32>
    %297 = arith.divf %295, %296 : vector<8x16xf32>
    %298 = vector.extract_strided_slice %285 {offsets = [0, 32], sizes = [8, 16], strides = [1, 1]} : vector<8x64xf32> to vector<8x16xf32>
    %299 = math.tanh %298 : vector<8x16xf32>
    %300 = vector.extract_strided_slice %285 {offsets = [0, 48], sizes = [8, 16], strides = [1, 1]} : vector<8x64xf32> to vector<8x16xf32>
    %301 = arith.negf %300 : vector<8x16xf32>
    %302 = math.exp %301 : vector<8x16xf32>
    %cst_134 = arith.constant 1.000000e+00 : f32
    %303 = vector.broadcast %cst_134 : f32 to vector<8x16xf32>
    %304 = arith.addf %303, %302 : vector<8x16xf32>
    %305 = arith.divf %303, %304 : vector<8x16xf32>
    %306 = arith.mulf %297, %283 : vector<8x16xf32>
    %307 = arith.mulf %291, %299 : vector<8x16xf32>
    %308 = arith.addf %306, %307 : vector<8x16xf32>
    %309 = math.tanh %308 : vector<8x16xf32>
    %310 = arith.mulf %305, %309 : vector<8x16xf32>
    %cst_135 = arith.constant 0.000000e+00 : f32
    %311 = vector.broadcast %cst_135 : f32 to vector<8x1xf32>
    %312 = arith.cmpf ogt, %278, %311 : vector<8x1xf32>
    %313 = vector.shape_cast %312 : vector<8x1xi1> to vector<8x1xi1>
    %314 = vector.broadcast %313 : vector<8x1xi1> to vector<8x16xi1>
    %315 = arith.select %314, %308, %283 : vector<8x16xi1>, vector<8x16xf32>
    %316 = vector.shape_cast %312 : vector<8x1xi1> to vector<8x1xi1>
    %317 = vector.broadcast %316 : vector<8x1xi1> to vector<8x16xi1>
    %318 = arith.select %317, %310, %282 : vector<8x16xi1>, vector<8x16xf32>
    %c0_136 = arith.constant 0 : index
    %c0_137 = arith.constant 0 : index
    %319 = vector.load %arg18[%c0_136, %c0_137] : memref<8x16xf32, #tpu.memory_space<vmem>>, vector<8x16xf32>
    tpu.vector_store %arg18[%c0_136, %c0_137], %318 {strides = array<i32>} : memref<8x16xf32, #tpu.memory_space<vmem>>, vector<8x16xf32>,
    %c0_138 = arith.constant 0 : index
    %c0_139 = arith.constant 0 : index
    %320 = vector.load %arg19[%c0_138, %c0_139] : memref<8x16xf32, #tpu.memory_space<vmem>>, vector<8x16xf32>
    tpu.vector_store %arg19[%c0_138, %c0_139], %315 {strides = array<i32>} : memref<8x16xf32, #tpu.memory_space<vmem>>, vector<8x16xf32>,
    %321 = vector.broadcast %278 : vector<8x1xf32> to vector<8x16xf32>
    %322 = arith.mulf %318, %321 : vector<8x16xf32>
    %323 = vector.shape_cast %322 : vector<8x16xf32> to vector<1x8x16xf32>
    %324 = arith.index_cast %275 : i32 to index
    %c0_140 = arith.constant 0 : index
    %c0_141 = arith.constant 0 : index
    %325 = vector.load %arg13[%324, %c0_140, %c0_141] : memref<8x8x16xf32, #tpu.memory_space<vmem>>, vector<1x8x16xf32>
    tpu.vector_store %arg13[%324, %c0_140, %c0_141], %323 {strides = array<i32>} : memref<8x8x16xf32, #tpu.memory_space<vmem>>, vector<1x8x16xf32>,
    %c3_i32 = arith.constant 3 : i32
    %326 = arith.index_cast %c3_i32 : i32 to index
    %c0_142 = arith.constant 0 : index
    %c0_143 = arith.constant 0 : index
    %327 = vector.load %arg4[%326, %c0_142, %c0_143] : memref<8x8x1xf32, #tpu.memory_space<vmem>>, vector<1x8x1xf32>
    %328 = vector.shape_cast %327 : vector<1x8x1xf32> to vector<8x1xf32>
    %329 = arith.index_cast %c3_i32 : i32 to index
    %c0_144 = arith.constant 0 : index
    %c0_145 = arith.constant 0 : index
    %330 = vector.load %arg14[%329, %c0_144, %c0_145] : memref<8x8x64xf32, #tpu.memory_space<vmem>>, vector<1x8x64xf32>
    %331 = vector.shape_cast %330 : vector<1x8x64xf32> to vector<8x64xf32>
    %c0_146 = arith.constant 0 : index
    %c0_147 = arith.constant 0 : index
    %332 = vector.load %arg16[%c0_146, %c0_147] : memref<8x16xf32, #tpu.memory_space<vmem>>, vector<8x16xf32>
    %c0_148 = arith.constant 0 : index
    %c0_149 = arith.constant 0 : index
    %333 = vector.load %arg17[%c0_148, %c0_149] : memref<8x16xf32, #tpu.memory_space<vmem>>, vector<8x16xf32>
    %cst_150 = arith.constant dense<0.000000e+00> : vector<8x64xf32>
    %334 = tpu.matmul %332, %21, %cst_150 {dimension_numbers = #tpu.dot_dimension_numbers<[1], [0], [0], [1], [0, 0, 1, 1], [], []>} : vector<8x16xf32>, vector<16x64xf32>, vector<8x64xf32> -> vector<8x64xf32>
    %335 = arith.addf %331, %334 : vector<8x64xf32>
    %336 = vector.extract_strided_slice %335 {offsets = [0, 0], sizes = [8, 16], strides = [1, 1]} : vector<8x64xf32> to vector<8x16xf32>
    %337 = arith.negf %336 : vector<8x16xf32>
    %338 = math.exp %337 : vector<8x16xf32>
    %cst_151 = arith.constant 1.000000e+00 : f32
    %339 = vector.broadcast %cst_151 : f32 to vector<8x16xf32>
    %340 = arith.addf %339, %338 : vector<8x16xf32>
    %341 = arith.divf %339, %340 : vector<8x16xf32>
    %342 = vector.extract_strided_slice %335 {offsets = [0, 16], sizes = [8, 16], strides = [1, 1]} : vector<8x64xf32> to vector<8x16xf32>
    %343 = arith.negf %342 : vector<8x16xf32>
    %344 = math.exp %343 : vector<8x16xf32>
    %cst_152 = arith.constant 1.000000e+00 : f32
    %345 = vector.broadcast %cst_152 : f32 to vector<8x16xf32>
    %346 = arith.addf %345, %344 : vector<8x16xf32>
    %347 = arith.divf %345, %346 : vector<8x16xf32>
    %348 = vector.extract_strided_slice %335 {offsets = [0, 32], sizes = [8, 16], strides = [1, 1]} : vector<8x64xf32> to vector<8x16xf32>
    %349 = math.tanh %348 : vector<8x16xf32>
    %350 = vector.extract_strided_slice %335 {offsets = [0, 48], sizes = [8, 16], strides = [1, 1]} : vector<8x64xf32> to vector<8x16xf32>
    %351 = arith.negf %350 : vector<8x16xf32>
    %352 = math.exp %351 : vector<8x16xf32>
    %cst_153 = arith.constant 1.000000e+00 : f32
    %353 = vector.broadcast %cst_153 : f32 to vector<8x16xf32>
    %354 = arith.addf %353, %352 : vector<8x16xf32>
    %355 = arith.divf %353, %354 : vector<8x16xf32>
    %356 = arith.mulf %347, %333 : vector<8x16xf32>
    %357 = arith.mulf %341, %349 : vector<8x16xf32>
    %358 = arith.addf %356, %357 : vector<8x16xf32>
    %359 = math.tanh %358 : vector<8x16xf32>
    %360 = arith.mulf %355, %359 : vector<8x16xf32>
    %cst_154 = arith.constant 0.000000e+00 : f32
    %361 = vector.broadcast %cst_154 : f32 to vector<8x1xf32>
    %362 = arith.cmpf ogt, %328, %361 : vector<8x1xf32>
    %363 = vector.shape_cast %362 : vector<8x1xi1> to vector<8x1xi1>
    %364 = vector.broadcast %363 : vector<8x1xi1> to vector<8x16xi1>
    %365 = arith.select %364, %358, %333 : vector<8x16xi1>, vector<8x16xf32>
    %366 = vector.shape_cast %362 : vector<8x1xi1> to vector<8x1xi1>
    %367 = vector.broadcast %366 : vector<8x1xi1> to vector<8x16xi1>
    %368 = arith.select %367, %360, %332 : vector<8x16xi1>, vector<8x16xf32>
    %c0_155 = arith.constant 0 : index
    %c0_156 = arith.constant 0 : index
    %369 = vector.load %arg16[%c0_155, %c0_156] : memref<8x16xf32, #tpu.memory_space<vmem>>, vector<8x16xf32>
    tpu.vector_store %arg16[%c0_155, %c0_156], %368 {strides = array<i32>} : memref<8x16xf32, #tpu.memory_space<vmem>>, vector<8x16xf32>,
    %c0_157 = arith.constant 0 : index
    %c0_158 = arith.constant 0 : index
    %370 = vector.load %arg17[%c0_157, %c0_158] : memref<8x16xf32, #tpu.memory_space<vmem>>, vector<8x16xf32>
    tpu.vector_store %arg17[%c0_157, %c0_158], %365 {strides = array<i32>} : memref<8x16xf32, #tpu.memory_space<vmem>>, vector<8x16xf32>,
    %371 = vector.broadcast %328 : vector<8x1xf32> to vector<8x16xf32>
    %372 = arith.mulf %368, %371 : vector<8x16xf32>
    %373 = vector.shape_cast %372 : vector<8x16xf32> to vector<1x8x16xf32>
    %374 = arith.index_cast %c3_i32 : i32 to index
    %c0_159 = arith.constant 0 : index
    %c0_160 = arith.constant 0 : index
    %375 = vector.load %arg12[%374, %c0_159, %c0_160] : memref<8x8x16xf32, #tpu.memory_space<vmem>>, vector<1x8x16xf32>
    tpu.vector_store %arg12[%374, %c0_159, %c0_160], %373 {strides = array<i32>} : memref<8x8x16xf32, #tpu.memory_space<vmem>>, vector<1x8x16xf32>,
    %c7_i32_161 = arith.constant 7 : i32
    %376 = arith.subi %c7_i32_161, %c3_i32 : i32
    %377 = arith.index_cast %376 : i32 to index
    %c0_162 = arith.constant 0 : index
    %c0_163 = arith.constant 0 : index
    %378 = vector.load %arg5[%377, %c0_162, %c0_163] : memref<8x8x1xf32, #tpu.memory_space<vmem>>, vector<1x8x1xf32>
    %379 = vector.shape_cast %378 : vector<1x8x1xf32> to vector<8x1xf32>
    %380 = arith.index_cast %376 : i32 to index
    %c0_164 = arith.constant 0 : index
    %c0_165 = arith.constant 0 : index
    %381 = vector.load %arg15[%380, %c0_164, %c0_165] : memref<8x8x64xf32, #tpu.memory_space<vmem>>, vector<1x8x64xf32>
    %382 = vector.shape_cast %381 : vector<1x8x64xf32> to vector<8x64xf32>
    %c0_166 = arith.constant 0 : index
    %c0_167 = arith.constant 0 : index
    %383 = vector.load %arg18[%c0_166, %c0_167] : memref<8x16xf32, #tpu.memory_space<vmem>>, vector<8x16xf32>
    %c0_168 = arith.constant 0 : index
    %c0_169 = arith.constant 0 : index
    %384 = vector.load %arg19[%c0_168, %c0_169] : memref<8x16xf32, #tpu.memory_space<vmem>>, vector<8x16xf32>
    %cst_170 = arith.constant dense<0.000000e+00> : vector<8x64xf32>
    %385 = tpu.matmul %383, %22, %cst_170 {dimension_numbers = #tpu.dot_dimension_numbers<[1], [0], [0], [1], [0, 0, 1, 1], [], []>} : vector<8x16xf32>, vector<16x64xf32>, vector<8x64xf32> -> vector<8x64xf32>
    %386 = arith.addf %382, %385 : vector<8x64xf32>
    %387 = vector.extract_strided_slice %386 {offsets = [0, 0], sizes = [8, 16], strides = [1, 1]} : vector<8x64xf32> to vector<8x16xf32>
    %388 = arith.negf %387 : vector<8x16xf32>
    %389 = math.exp %388 : vector<8x16xf32>
    %cst_171 = arith.constant 1.000000e+00 : f32
    %390 = vector.broadcast %cst_171 : f32 to vector<8x16xf32>
    %391 = arith.addf %390, %389 : vector<8x16xf32>
    %392 = arith.divf %390, %391 : vector<8x16xf32>
    %393 = vector.extract_strided_slice %386 {offsets = [0, 16], sizes = [8, 16], strides = [1, 1]} : vector<8x64xf32> to vector<8x16xf32>
    %394 = arith.negf %393 : vector<8x16xf32>
    %395 = math.exp %394 : vector<8x16xf32>
    %cst_172 = arith.constant 1.000000e+00 : f32
    %396 = vector.broadcast %cst_172 : f32 to vector<8x16xf32>
    %397 = arith.addf %396, %395 : vector<8x16xf32>
    %398 = arith.divf %396, %397 : vector<8x16xf32>
    %399 = vector.extract_strided_slice %386 {offsets = [0, 32], sizes = [8, 16], strides = [1, 1]} : vector<8x64xf32> to vector<8x16xf32>
    %400 = math.tanh %399 : vector<8x16xf32>
    %401 = vector.extract_strided_slice %386 {offsets = [0, 48], sizes = [8, 16], strides = [1, 1]} : vector<8x64xf32> to vector<8x16xf32>
    %402 = arith.negf %401 : vector<8x16xf32>
    %403 = math.exp %402 : vector<8x16xf32>
    %cst_173 = arith.constant 1.000000e+00 : f32
    %404 = vector.broadcast %cst_173 : f32 to vector<8x16xf32>
    %405 = arith.addf %404, %403 : vector<8x16xf32>
    %406 = arith.divf %404, %405 : vector<8x16xf32>
    %407 = arith.mulf %398, %384 : vector<8x16xf32>
    %408 = arith.mulf %392, %400 : vector<8x16xf32>
    %409 = arith.addf %407, %408 : vector<8x16xf32>
    %410 = math.tanh %409 : vector<8x16xf32>
    %411 = arith.mulf %406, %410 : vector<8x16xf32>
    %cst_174 = arith.constant 0.000000e+00 : f32
    %412 = vector.broadcast %cst_174 : f32 to vector<8x1xf32>
    %413 = arith.cmpf ogt, %379, %412 : vector<8x1xf32>
    %414 = vector.shape_cast %413 : vector<8x1xi1> to vector<8x1xi1>
    %415 = vector.broadcast %414 : vector<8x1xi1> to vector<8x16xi1>
    %416 = arith.select %415, %409, %384 : vector<8x16xi1>, vector<8x16xf32>
    %417 = vector.shape_cast %413 : vector<8x1xi1> to vector<8x1xi1>
    %418 = vector.broadcast %417 : vector<8x1xi1> to vector<8x16xi1>
    %419 = arith.select %418, %411, %383 : vector<8x16xi1>, vector<8x16xf32>
    %c0_175 = arith.constant 0 : index
    %c0_176 = arith.constant 0 : index
    %420 = vector.load %arg18[%c0_175, %c0_176] : memref<8x16xf32, #tpu.memory_space<vmem>>, vector<8x16xf32>
    tpu.vector_store %arg18[%c0_175, %c0_176], %419 {strides = array<i32>} : memref<8x16xf32, #tpu.memory_space<vmem>>, vector<8x16xf32>,
    %c0_177 = arith.constant 0 : index
    %c0_178 = arith.constant 0 : index
    %421 = vector.load %arg19[%c0_177, %c0_178] : memref<8x16xf32, #tpu.memory_space<vmem>>, vector<8x16xf32>
    tpu.vector_store %arg19[%c0_177, %c0_178], %416 {strides = array<i32>} : memref<8x16xf32, #tpu.memory_space<vmem>>, vector<8x16xf32>,
    %422 = vector.broadcast %379 : vector<8x1xf32> to vector<8x16xf32>
    %423 = arith.mulf %419, %422 : vector<8x16xf32>
    %424 = vector.shape_cast %423 : vector<8x16xf32> to vector<1x8x16xf32>
    %425 = arith.index_cast %376 : i32 to index
    %c0_179 = arith.constant 0 : index
    %c0_180 = arith.constant 0 : index
    %426 = vector.load %arg13[%425, %c0_179, %c0_180] : memref<8x8x16xf32, #tpu.memory_space<vmem>>, vector<1x8x16xf32>
    tpu.vector_store %arg13[%425, %c0_179, %c0_180], %424 {strides = array<i32>} : memref<8x8x16xf32, #tpu.memory_space<vmem>>, vector<1x8x16xf32>,
    %c4_i32 = arith.constant 4 : i32
    %427 = arith.index_cast %c4_i32 : i32 to index
    %c0_181 = arith.constant 0 : index
    %c0_182 = arith.constant 0 : index
    %428 = vector.load %arg4[%427, %c0_181, %c0_182] : memref<8x8x1xf32, #tpu.memory_space<vmem>>, vector<1x8x1xf32>
    %429 = vector.shape_cast %428 : vector<1x8x1xf32> to vector<8x1xf32>
    %430 = arith.index_cast %c4_i32 : i32 to index
    %c0_183 = arith.constant 0 : index
    %c0_184 = arith.constant 0 : index
    %431 = vector.load %arg14[%430, %c0_183, %c0_184] : memref<8x8x64xf32, #tpu.memory_space<vmem>>, vector<1x8x64xf32>
    %432 = vector.shape_cast %431 : vector<1x8x64xf32> to vector<8x64xf32>
    %c0_185 = arith.constant 0 : index
    %c0_186 = arith.constant 0 : index
    %433 = vector.load %arg16[%c0_185, %c0_186] : memref<8x16xf32, #tpu.memory_space<vmem>>, vector<8x16xf32>
    %c0_187 = arith.constant 0 : index
    %c0_188 = arith.constant 0 : index
    %434 = vector.load %arg17[%c0_187, %c0_188] : memref<8x16xf32, #tpu.memory_space<vmem>>, vector<8x16xf32>
    %cst_189 = arith.constant dense<0.000000e+00> : vector<8x64xf32>
    %435 = tpu.matmul %433, %21, %cst_189 {dimension_numbers = #tpu.dot_dimension_numbers<[1], [0], [0], [1], [0, 0, 1, 1], [], []>} : vector<8x16xf32>, vector<16x64xf32>, vector<8x64xf32> -> vector<8x64xf32>
    %436 = arith.addf %432, %435 : vector<8x64xf32>
    %437 = vector.extract_strided_slice %436 {offsets = [0, 0], sizes = [8, 16], strides = [1, 1]} : vector<8x64xf32> to vector<8x16xf32>
    %438 = arith.negf %437 : vector<8x16xf32>
    %439 = math.exp %438 : vector<8x16xf32>
    %cst_190 = arith.constant 1.000000e+00 : f32
    %440 = vector.broadcast %cst_190 : f32 to vector<8x16xf32>
    %441 = arith.addf %440, %439 : vector<8x16xf32>
    %442 = arith.divf %440, %441 : vector<8x16xf32>
    %443 = vector.extract_strided_slice %436 {offsets = [0, 16], sizes = [8, 16], strides = [1, 1]} : vector<8x64xf32> to vector<8x16xf32>
    %444 = arith.negf %443 : vector<8x16xf32>
    %445 = math.exp %444 : vector<8x16xf32>
    %cst_191 = arith.constant 1.000000e+00 : f32
    %446 = vector.broadcast %cst_191 : f32 to vector<8x16xf32>
    %447 = arith.addf %446, %445 : vector<8x16xf32>
    %448 = arith.divf %446, %447 : vector<8x16xf32>
    %449 = vector.extract_strided_slice %436 {offsets = [0, 32], sizes = [8, 16], strides = [1, 1]} : vector<8x64xf32> to vector<8x16xf32>
    %450 = math.tanh %449 : vector<8x16xf32>
    %451 = vector.extract_strided_slice %436 {offsets = [0, 48], sizes = [8, 16], strides = [1, 1]} : vector<8x64xf32> to vector<8x16xf32>
    %452 = arith.negf %451 : vector<8x16xf32>
    %453 = math.exp %452 : vector<8x16xf32>
    %cst_192 = arith.constant 1.000000e+00 : f32
    %454 = vector.broadcast %cst_192 : f32 to vector<8x16xf32>
    %455 = arith.addf %454, %453 : vector<8x16xf32>
    %456 = arith.divf %454, %455 : vector<8x16xf32>
    %457 = arith.mulf %448, %434 : vector<8x16xf32>
    %458 = arith.mulf %442, %450 : vector<8x16xf32>
    %459 = arith.addf %457, %458 : vector<8x16xf32>
    %460 = math.tanh %459 : vector<8x16xf32>
    %461 = arith.mulf %456, %460 : vector<8x16xf32>
    %cst_193 = arith.constant 0.000000e+00 : f32
    %462 = vector.broadcast %cst_193 : f32 to vector<8x1xf32>
    %463 = arith.cmpf ogt, %429, %462 : vector<8x1xf32>
    %464 = vector.shape_cast %463 : vector<8x1xi1> to vector<8x1xi1>
    %465 = vector.broadcast %464 : vector<8x1xi1> to vector<8x16xi1>
    %466 = arith.select %465, %459, %434 : vector<8x16xi1>, vector<8x16xf32>
    %467 = vector.shape_cast %463 : vector<8x1xi1> to vector<8x1xi1>
    %468 = vector.broadcast %467 : vector<8x1xi1> to vector<8x16xi1>
    %469 = arith.select %468, %461, %433 : vector<8x16xi1>, vector<8x16xf32>
    %c0_194 = arith.constant 0 : index
    %c0_195 = arith.constant 0 : index
    %470 = vector.load %arg16[%c0_194, %c0_195] : memref<8x16xf32, #tpu.memory_space<vmem>>, vector<8x16xf32>
    tpu.vector_store %arg16[%c0_194, %c0_195], %469 {strides = array<i32>} : memref<8x16xf32, #tpu.memory_space<vmem>>, vector<8x16xf32>,
    %c0_196 = arith.constant 0 : index
    %c0_197 = arith.constant 0 : index
    %471 = vector.load %arg17[%c0_196, %c0_197] : memref<8x16xf32, #tpu.memory_space<vmem>>, vector<8x16xf32>
    tpu.vector_store %arg17[%c0_196, %c0_197], %466 {strides = array<i32>} : memref<8x16xf32, #tpu.memory_space<vmem>>, vector<8x16xf32>,
    %472 = vector.broadcast %429 : vector<8x1xf32> to vector<8x16xf32>
    %473 = arith.mulf %469, %472 : vector<8x16xf32>
    %474 = vector.shape_cast %473 : vector<8x16xf32> to vector<1x8x16xf32>
    %475 = arith.index_cast %c4_i32 : i32 to index
    %c0_198 = arith.constant 0 : index
    %c0_199 = arith.constant 0 : index
    %476 = vector.load %arg12[%475, %c0_198, %c0_199] : memref<8x8x16xf32, #tpu.memory_space<vmem>>, vector<1x8x16xf32>
    tpu.vector_store %arg12[%475, %c0_198, %c0_199], %474 {strides = array<i32>} : memref<8x8x16xf32, #tpu.memory_space<vmem>>, vector<1x8x16xf32>,
    %c7_i32_200 = arith.constant 7 : i32
    %477 = arith.subi %c7_i32_200, %c4_i32 : i32
    %478 = arith.index_cast %477 : i32 to index
    %c0_201 = arith.constant 0 : index
    %c0_202 = arith.constant 0 : index
    %479 = vector.load %arg5[%478, %c0_201, %c0_202] : memref<8x8x1xf32, #tpu.memory_space<vmem>>, vector<1x8x1xf32>
    %480 = vector.shape_cast %479 : vector<1x8x1xf32> to vector<8x1xf32>
    %481 = arith.index_cast %477 : i32 to index
    %c0_203 = arith.constant 0 : index
    %c0_204 = arith.constant 0 : index
    %482 = vector.load %arg15[%481, %c0_203, %c0_204] : memref<8x8x64xf32, #tpu.memory_space<vmem>>, vector<1x8x64xf32>
    %483 = vector.shape_cast %482 : vector<1x8x64xf32> to vector<8x64xf32>
    %c0_205 = arith.constant 0 : index
    %c0_206 = arith.constant 0 : index
    %484 = vector.load %arg18[%c0_205, %c0_206] : memref<8x16xf32, #tpu.memory_space<vmem>>, vector<8x16xf32>
    %c0_207 = arith.constant 0 : index
    %c0_208 = arith.constant 0 : index
    %485 = vector.load %arg19[%c0_207, %c0_208] : memref<8x16xf32, #tpu.memory_space<vmem>>, vector<8x16xf32>
    %cst_209 = arith.constant dense<0.000000e+00> : vector<8x64xf32>
    %486 = tpu.matmul %484, %22, %cst_209 {dimension_numbers = #tpu.dot_dimension_numbers<[1], [0], [0], [1], [0, 0, 1, 1], [], []>} : vector<8x16xf32>, vector<16x64xf32>, vector<8x64xf32> -> vector<8x64xf32>
    %487 = arith.addf %483, %486 : vector<8x64xf32>
    %488 = vector.extract_strided_slice %487 {offsets = [0, 0], sizes = [8, 16], strides = [1, 1]} : vector<8x64xf32> to vector<8x16xf32>
    %489 = arith.negf %488 : vector<8x16xf32>
    %490 = math.exp %489 : vector<8x16xf32>
    %cst_210 = arith.constant 1.000000e+00 : f32
    %491 = vector.broadcast %cst_210 : f32 to vector<8x16xf32>
    %492 = arith.addf %491, %490 : vector<8x16xf32>
    %493 = arith.divf %491, %492 : vector<8x16xf32>
    %494 = vector.extract_strided_slice %487 {offsets = [0, 16], sizes = [8, 16], strides = [1, 1]} : vector<8x64xf32> to vector<8x16xf32>
    %495 = arith.negf %494 : vector<8x16xf32>
    %496 = math.exp %495 : vector<8x16xf32>
    %cst_211 = arith.constant 1.000000e+00 : f32
    %497 = vector.broadcast %cst_211 : f32 to vector<8x16xf32>
    %498 = arith.addf %497, %496 : vector<8x16xf32>
    %499 = arith.divf %497, %498 : vector<8x16xf32>
    %500 = vector.extract_strided_slice %487 {offsets = [0, 32], sizes = [8, 16], strides = [1, 1]} : vector<8x64xf32> to vector<8x16xf32>
    %501 = math.tanh %500 : vector<8x16xf32>
    %502 = vector.extract_strided_slice %487 {offsets = [0, 48], sizes = [8, 16], strides = [1, 1]} : vector<8x64xf32> to vector<8x16xf32>
    %503 = arith.negf %502 : vector<8x16xf32>
    %504 = math.exp %503 : vector<8x16xf32>
    %cst_212 = arith.constant 1.000000e+00 : f32
    %505 = vector.broadcast %cst_212 : f32 to vector<8x16xf32>
    %506 = arith.addf %505, %504 : vector<8x16xf32>
    %507 = arith.divf %505, %506 : vector<8x16xf32>
    %508 = arith.mulf %499, %485 : vector<8x16xf32>
    %509 = arith.mulf %493, %501 : vector<8x16xf32>
    %510 = arith.addf %508, %509 : vector<8x16xf32>
    %511 = math.tanh %510 : vector<8x16xf32>
    %512 = arith.mulf %507, %511 : vector<8x16xf32>
    %cst_213 = arith.constant 0.000000e+00 : f32
    %513 = vector.broadcast %cst_213 : f32 to vector<8x1xf32>
    %514 = arith.cmpf ogt, %480, %513 : vector<8x1xf32>
    %515 = vector.shape_cast %514 : vector<8x1xi1> to vector<8x1xi1>
    %516 = vector.broadcast %515 : vector<8x1xi1> to vector<8x16xi1>
    %517 = arith.select %516, %510, %485 : vector<8x16xi1>, vector<8x16xf32>
    %518 = vector.shape_cast %514 : vector<8x1xi1> to vector<8x1xi1>
    %519 = vector.broadcast %518 : vector<8x1xi1> to vector<8x16xi1>
    %520 = arith.select %519, %512, %484 : vector<8x16xi1>, vector<8x16xf32>
    %c0_214 = arith.constant 0 : index
    %c0_215 = arith.constant 0 : index
    %521 = vector.load %arg18[%c0_214, %c0_215] : memref<8x16xf32, #tpu.memory_space<vmem>>, vector<8x16xf32>
    tpu.vector_store %arg18[%c0_214, %c0_215], %520 {strides = array<i32>} : memref<8x16xf32, #tpu.memory_space<vmem>>, vector<8x16xf32>,
    %c0_216 = arith.constant 0 : index
    %c0_217 = arith.constant 0 : index
    %522 = vector.load %arg19[%c0_216, %c0_217] : memref<8x16xf32, #tpu.memory_space<vmem>>, vector<8x16xf32>
    tpu.vector_store %arg19[%c0_216, %c0_217], %517 {strides = array<i32>} : memref<8x16xf32, #tpu.memory_space<vmem>>, vector<8x16xf32>,
    %523 = vector.broadcast %480 : vector<8x1xf32> to vector<8x16xf32>
    %524 = arith.mulf %520, %523 : vector<8x16xf32>
    %525 = vector.shape_cast %524 : vector<8x16xf32> to vector<1x8x16xf32>
    %526 = arith.index_cast %477 : i32 to index
    %c0_218 = arith.constant 0 : index
    %c0_219 = arith.constant 0 : index
    %527 = vector.load %arg13[%526, %c0_218, %c0_219] : memref<8x8x16xf32, #tpu.memory_space<vmem>>, vector<1x8x16xf32>
    tpu.vector_store %arg13[%526, %c0_218, %c0_219], %525 {strides = array<i32>} : memref<8x8x16xf32, #tpu.memory_space<vmem>>, vector<1x8x16xf32>,
    %c5_i32 = arith.constant 5 : i32
    %528 = arith.index_cast %c5_i32 : i32 to index
    %c0_220 = arith.constant 0 : index
    %c0_221 = arith.constant 0 : index
    %529 = vector.load %arg4[%528, %c0_220, %c0_221] : memref<8x8x1xf32, #tpu.memory_space<vmem>>, vector<1x8x1xf32>
    %530 = vector.shape_cast %529 : vector<1x8x1xf32> to vector<8x1xf32>
    %531 = arith.index_cast %c5_i32 : i32 to index
    %c0_222 = arith.constant 0 : index
    %c0_223 = arith.constant 0 : index
    %532 = vector.load %arg14[%531, %c0_222, %c0_223] : memref<8x8x64xf32, #tpu.memory_space<vmem>>, vector<1x8x64xf32>
    %533 = vector.shape_cast %532 : vector<1x8x64xf32> to vector<8x64xf32>
    %c0_224 = arith.constant 0 : index
    %c0_225 = arith.constant 0 : index
    %534 = vector.load %arg16[%c0_224, %c0_225] : memref<8x16xf32, #tpu.memory_space<vmem>>, vector<8x16xf32>
    %c0_226 = arith.constant 0 : index
    %c0_227 = arith.constant 0 : index
    %535 = vector.load %arg17[%c0_226, %c0_227] : memref<8x16xf32, #tpu.memory_space<vmem>>, vector<8x16xf32>
    %cst_228 = arith.constant dense<0.000000e+00> : vector<8x64xf32>
    %536 = tpu.matmul %534, %21, %cst_228 {dimension_numbers = #tpu.dot_dimension_numbers<[1], [0], [0], [1], [0, 0, 1, 1], [], []>} : vector<8x16xf32>, vector<16x64xf32>, vector<8x64xf32> -> vector<8x64xf32>
    %537 = arith.addf %533, %536 : vector<8x64xf32>
    %538 = vector.extract_strided_slice %537 {offsets = [0, 0], sizes = [8, 16], strides = [1, 1]} : vector<8x64xf32> to vector<8x16xf32>
    %539 = arith.negf %538 : vector<8x16xf32>
    %540 = math.exp %539 : vector<8x16xf32>
    %cst_229 = arith.constant 1.000000e+00 : f32
    %541 = vector.broadcast %cst_229 : f32 to vector<8x16xf32>
    %542 = arith.addf %541, %540 : vector<8x16xf32>
    %543 = arith.divf %541, %542 : vector<8x16xf32>
    %544 = vector.extract_strided_slice %537 {offsets = [0, 16], sizes = [8, 16], strides = [1, 1]} : vector<8x64xf32> to vector<8x16xf32>
    %545 = arith.negf %544 : vector<8x16xf32>
    %546 = math.exp %545 : vector<8x16xf32>
    %cst_230 = arith.constant 1.000000e+00 : f32
    %547 = vector.broadcast %cst_230 : f32 to vector<8x16xf32>
    %548 = arith.addf %547, %546 : vector<8x16xf32>
    %549 = arith.divf %547, %548 : vector<8x16xf32>
    %550 = vector.extract_strided_slice %537 {offsets = [0, 32], sizes = [8, 16], strides = [1, 1]} : vector<8x64xf32> to vector<8x16xf32>
    %551 = math.tanh %550 : vector<8x16xf32>
    %552 = vector.extract_strided_slice %537 {offsets = [0, 48], sizes = [8, 16], strides = [1, 1]} : vector<8x64xf32> to vector<8x16xf32>
    %553 = arith.negf %552 : vector<8x16xf32>
    %554 = math.exp %553 : vector<8x16xf32>
    %cst_231 = arith.constant 1.000000e+00 : f32
    %555 = vector.broadcast %cst_231 : f32 to vector<8x16xf32>
    %556 = arith.addf %555, %554 : vector<8x16xf32>
    %557 = arith.divf %555, %556 : vector<8x16xf32>
    %558 = arith.mulf %549, %535 : vector<8x16xf32>
    %559 = arith.mulf %543, %551 : vector<8x16xf32>
    %560 = arith.addf %558, %559 : vector<8x16xf32>
    %561 = math.tanh %560 : vector<8x16xf32>
    %562 = arith.mulf %557, %561 : vector<8x16xf32>
    %cst_232 = arith.constant 0.000000e+00 : f32
    %563 = vector.broadcast %cst_232 : f32 to vector<8x1xf32>
    %564 = arith.cmpf ogt, %530, %563 : vector<8x1xf32>
    %565 = vector.shape_cast %564 : vector<8x1xi1> to vector<8x1xi1>
    %566 = vector.broadcast %565 : vector<8x1xi1> to vector<8x16xi1>
    %567 = arith.select %566, %560, %535 : vector<8x16xi1>, vector<8x16xf32>
    %568 = vector.shape_cast %564 : vector<8x1xi1> to vector<8x1xi1>
    %569 = vector.broadcast %568 : vector<8x1xi1> to vector<8x16xi1>
    %570 = arith.select %569, %562, %534 : vector<8x16xi1>, vector<8x16xf32>
    %c0_233 = arith.constant 0 : index
    %c0_234 = arith.constant 0 : index
    %571 = vector.load %arg16[%c0_233, %c0_234] : memref<8x16xf32, #tpu.memory_space<vmem>>, vector<8x16xf32>
    tpu.vector_store %arg16[%c0_233, %c0_234], %570 {strides = array<i32>} : memref<8x16xf32, #tpu.memory_space<vmem>>, vector<8x16xf32>,
    %c0_235 = arith.constant 0 : index
    %c0_236 = arith.constant 0 : index
    %572 = vector.load %arg17[%c0_235, %c0_236] : memref<8x16xf32, #tpu.memory_space<vmem>>, vector<8x16xf32>
    tpu.vector_store %arg17[%c0_235, %c0_236], %567 {strides = array<i32>} : memref<8x16xf32, #tpu.memory_space<vmem>>, vector<8x16xf32>,
    %573 = vector.broadcast %530 : vector<8x1xf32> to vector<8x16xf32>
    %574 = arith.mulf %570, %573 : vector<8x16xf32>
    %575 = vector.shape_cast %574 : vector<8x16xf32> to vector<1x8x16xf32>
    %576 = arith.index_cast %c5_i32 : i32 to index
    %c0_237 = arith.constant 0 : index
    %c0_238 = arith.constant 0 : index
    %577 = vector.load %arg12[%576, %c0_237, %c0_238] : memref<8x8x16xf32, #tpu.memory_space<vmem>>, vector<1x8x16xf32>
    tpu.vector_store %arg12[%576, %c0_237, %c0_238], %575 {strides = array<i32>} : memref<8x8x16xf32, #tpu.memory_space<vmem>>, vector<1x8x16xf32>,
    %c7_i32_239 = arith.constant 7 : i32
    %578 = arith.subi %c7_i32_239, %c5_i32 : i32
    %579 = arith.index_cast %578 : i32 to index
    %c0_240 = arith.constant 0 : index
    %c0_241 = arith.constant 0 : index
    %580 = vector.load %arg5[%579, %c0_240, %c0_241] : memref<8x8x1xf32, #tpu.memory_space<vmem>>, vector<1x8x1xf32>
    %581 = vector.shape_cast %580 : vector<1x8x1xf32> to vector<8x1xf32>
    %582 = arith.index_cast %578 : i32 to index
    %c0_242 = arith.constant 0 : index
    %c0_243 = arith.constant 0 : index
    %583 = vector.load %arg15[%582, %c0_242, %c0_243] : memref<8x8x64xf32, #tpu.memory_space<vmem>>, vector<1x8x64xf32>
    %584 = vector.shape_cast %583 : vector<1x8x64xf32> to vector<8x64xf32>
    %c0_244 = arith.constant 0 : index
    %c0_245 = arith.constant 0 : index
    %585 = vector.load %arg18[%c0_244, %c0_245] : memref<8x16xf32, #tpu.memory_space<vmem>>, vector<8x16xf32>
    %c0_246 = arith.constant 0 : index
    %c0_247 = arith.constant 0 : index
    %586 = vector.load %arg19[%c0_246, %c0_247] : memref<8x16xf32, #tpu.memory_space<vmem>>, vector<8x16xf32>
    %cst_248 = arith.constant dense<0.000000e+00> : vector<8x64xf32>
    %587 = tpu.matmul %585, %22, %cst_248 {dimension_numbers = #tpu.dot_dimension_numbers<[1], [0], [0], [1], [0, 0, 1, 1], [], []>} : vector<8x16xf32>, vector<16x64xf32>, vector<8x64xf32> -> vector<8x64xf32>
    %588 = arith.addf %584, %587 : vector<8x64xf32>
    %589 = vector.extract_strided_slice %588 {offsets = [0, 0], sizes = [8, 16], strides = [1, 1]} : vector<8x64xf32> to vector<8x16xf32>
    %590 = arith.negf %589 : vector<8x16xf32>
    %591 = math.exp %590 : vector<8x16xf32>
    %cst_249 = arith.constant 1.000000e+00 : f32
    %592 = vector.broadcast %cst_249 : f32 to vector<8x16xf32>
    %593 = arith.addf %592, %591 : vector<8x16xf32>
    %594 = arith.divf %592, %593 : vector<8x16xf32>
    %595 = vector.extract_strided_slice %588 {offsets = [0, 16], sizes = [8, 16], strides = [1, 1]} : vector<8x64xf32> to vector<8x16xf32>
    %596 = arith.negf %595 : vector<8x16xf32>
    %597 = math.exp %596 : vector<8x16xf32>
    %cst_250 = arith.constant 1.000000e+00 : f32
    %598 = vector.broadcast %cst_250 : f32 to vector<8x16xf32>
    %599 = arith.addf %598, %597 : vector<8x16xf32>
    %600 = arith.divf %598, %599 : vector<8x16xf32>
    %601 = vector.extract_strided_slice %588 {offsets = [0, 32], sizes = [8, 16], strides = [1, 1]} : vector<8x64xf32> to vector<8x16xf32>
    %602 = math.tanh %601 : vector<8x16xf32>
    %603 = vector.extract_strided_slice %588 {offsets = [0, 48], sizes = [8, 16], strides = [1, 1]} : vector<8x64xf32> to vector<8x16xf32>
    %604 = arith.negf %603 : vector<8x16xf32>
    %605 = math.exp %604 : vector<8x16xf32>
    %cst_251 = arith.constant 1.000000e+00 : f32
    %606 = vector.broadcast %cst_251 : f32 to vector<8x16xf32>
    %607 = arith.addf %606, %605 : vector<8x16xf32>
    %608 = arith.divf %606, %607 : vector<8x16xf32>
    %609 = arith.mulf %600, %586 : vector<8x16xf32>
    %610 = arith.mulf %594, %602 : vector<8x16xf32>
    %611 = arith.addf %609, %610 : vector<8x16xf32>
    %612 = math.tanh %611 : vector<8x16xf32>
    %613 = arith.mulf %608, %612 : vector<8x16xf32>
    %cst_252 = arith.constant 0.000000e+00 : f32
    %614 = vector.broadcast %cst_252 : f32 to vector<8x1xf32>
    %615 = arith.cmpf ogt, %581, %614 : vector<8x1xf32>
    %616 = vector.shape_cast %615 : vector<8x1xi1> to vector<8x1xi1>
    %617 = vector.broadcast %616 : vector<8x1xi1> to vector<8x16xi1>
    %618 = arith.select %617, %611, %586 : vector<8x16xi1>, vector<8x16xf32>
    %619 = vector.shape_cast %615 : vector<8x1xi1> to vector<8x1xi1>
    %620 = vector.broadcast %619 : vector<8x1xi1> to vector<8x16xi1>
    %621 = arith.select %620, %613, %585 : vector<8x16xi1>, vector<8x16xf32>
    %c0_253 = arith.constant 0 : index
    %c0_254 = arith.constant 0 : index
    %622 = vector.load %arg18[%c0_253, %c0_254] : memref<8x16xf32, #tpu.memory_space<vmem>>, vector<8x16xf32>
    tpu.vector_store %arg18[%c0_253, %c0_254], %621 {strides = array<i32>} : memref<8x16xf32, #tpu.memory_space<vmem>>, vector<8x16xf32>,
    %c0_255 = arith.constant 0 : index
    %c0_256 = arith.constant 0 : index
    %623 = vector.load %arg19[%c0_255, %c0_256] : memref<8x16xf32, #tpu.memory_space<vmem>>, vector<8x16xf32>
    tpu.vector_store %arg19[%c0_255, %c0_256], %618 {strides = array<i32>} : memref<8x16xf32, #tpu.memory_space<vmem>>, vector<8x16xf32>,
    %624 = vector.broadcast %581 : vector<8x1xf32> to vector<8x16xf32>
    %625 = arith.mulf %621, %624 : vector<8x16xf32>
    %626 = vector.shape_cast %625 : vector<8x16xf32> to vector<1x8x16xf32>
    %627 = arith.index_cast %578 : i32 to index
    %c0_257 = arith.constant 0 : index
    %c0_258 = arith.constant 0 : index
    %628 = vector.load %arg13[%627, %c0_257, %c0_258] : memref<8x8x16xf32, #tpu.memory_space<vmem>>, vector<1x8x16xf32>
    tpu.vector_store %arg13[%627, %c0_257, %c0_258], %626 {strides = array<i32>} : memref<8x8x16xf32, #tpu.memory_space<vmem>>, vector<1x8x16xf32>,
    %c6_i32 = arith.constant 6 : i32
    %629 = arith.index_cast %c6_i32 : i32 to index
    %c0_259 = arith.constant 0 : index
    %c0_260 = arith.constant 0 : index
    %630 = vector.load %arg4[%629, %c0_259, %c0_260] : memref<8x8x1xf32, #tpu.memory_space<vmem>>, vector<1x8x1xf32>
    %631 = vector.shape_cast %630 : vector<1x8x1xf32> to vector<8x1xf32>
    %632 = arith.index_cast %c6_i32 : i32 to index
    %c0_261 = arith.constant 0 : index
    %c0_262 = arith.constant 0 : index
    %633 = vector.load %arg14[%632, %c0_261, %c0_262] : memref<8x8x64xf32, #tpu.memory_space<vmem>>, vector<1x8x64xf32>
    %634 = vector.shape_cast %633 : vector<1x8x64xf32> to vector<8x64xf32>
    %c0_263 = arith.constant 0 : index
    %c0_264 = arith.constant 0 : index
    %635 = vector.load %arg16[%c0_263, %c0_264] : memref<8x16xf32, #tpu.memory_space<vmem>>, vector<8x16xf32>
    %c0_265 = arith.constant 0 : index
    %c0_266 = arith.constant 0 : index
    %636 = vector.load %arg17[%c0_265, %c0_266] : memref<8x16xf32, #tpu.memory_space<vmem>>, vector<8x16xf32>
    %cst_267 = arith.constant dense<0.000000e+00> : vector<8x64xf32>
    %637 = tpu.matmul %635, %21, %cst_267 {dimension_numbers = #tpu.dot_dimension_numbers<[1], [0], [0], [1], [0, 0, 1, 1], [], []>} : vector<8x16xf32>, vector<16x64xf32>, vector<8x64xf32> -> vector<8x64xf32>
    %638 = arith.addf %634, %637 : vector<8x64xf32>
    %639 = vector.extract_strided_slice %638 {offsets = [0, 0], sizes = [8, 16], strides = [1, 1]} : vector<8x64xf32> to vector<8x16xf32>
    %640 = arith.negf %639 : vector<8x16xf32>
    %641 = math.exp %640 : vector<8x16xf32>
    %cst_268 = arith.constant 1.000000e+00 : f32
    %642 = vector.broadcast %cst_268 : f32 to vector<8x16xf32>
    %643 = arith.addf %642, %641 : vector<8x16xf32>
    %644 = arith.divf %642, %643 : vector<8x16xf32>
    %645 = vector.extract_strided_slice %638 {offsets = [0, 16], sizes = [8, 16], strides = [1, 1]} : vector<8x64xf32> to vector<8x16xf32>
    %646 = arith.negf %645 : vector<8x16xf32>
    %647 = math.exp %646 : vector<8x16xf32>
    %cst_269 = arith.constant 1.000000e+00 : f32
    %648 = vector.broadcast %cst_269 : f32 to vector<8x16xf32>
    %649 = arith.addf %648, %647 : vector<8x16xf32>
    %650 = arith.divf %648, %649 : vector<8x16xf32>
    %651 = vector.extract_strided_slice %638 {offsets = [0, 32], sizes = [8, 16], strides = [1, 1]} : vector<8x64xf32> to vector<8x16xf32>
    %652 = math.tanh %651 : vector<8x16xf32>
    %653 = vector.extract_strided_slice %638 {offsets = [0, 48], sizes = [8, 16], strides = [1, 1]} : vector<8x64xf32> to vector<8x16xf32>
    %654 = arith.negf %653 : vector<8x16xf32>
    %655 = math.exp %654 : vector<8x16xf32>
    %cst_270 = arith.constant 1.000000e+00 : f32
    %656 = vector.broadcast %cst_270 : f32 to vector<8x16xf32>
    %657 = arith.addf %656, %655 : vector<8x16xf32>
    %658 = arith.divf %656, %657 : vector<8x16xf32>
    %659 = arith.mulf %650, %636 : vector<8x16xf32>
    %660 = arith.mulf %644, %652 : vector<8x16xf32>
    %661 = arith.addf %659, %660 : vector<8x16xf32>
    %662 = math.tanh %661 : vector<8x16xf32>
    %663 = arith.mulf %658, %662 : vector<8x16xf32>
    %cst_271 = arith.constant 0.000000e+00 : f32
    %664 = vector.broadcast %cst_271 : f32 to vector<8x1xf32>
    %665 = arith.cmpf ogt, %631, %664 : vector<8x1xf32>
    %666 = vector.shape_cast %665 : vector<8x1xi1> to vector<8x1xi1>
    %667 = vector.broadcast %666 : vector<8x1xi1> to vector<8x16xi1>
    %668 = arith.select %667, %661, %636 : vector<8x16xi1>, vector<8x16xf32>
    %669 = vector.shape_cast %665 : vector<8x1xi1> to vector<8x1xi1>
    %670 = vector.broadcast %669 : vector<8x1xi1> to vector<8x16xi1>
    %671 = arith.select %670, %663, %635 : vector<8x16xi1>, vector<8x16xf32>
    %c0_272 = arith.constant 0 : index
    %c0_273 = arith.constant 0 : index
    %672 = vector.load %arg16[%c0_272, %c0_273] : memref<8x16xf32, #tpu.memory_space<vmem>>, vector<8x16xf32>
    tpu.vector_store %arg16[%c0_272, %c0_273], %671 {strides = array<i32>} : memref<8x16xf32, #tpu.memory_space<vmem>>, vector<8x16xf32>,
    %c0_274 = arith.constant 0 : index
    %c0_275 = arith.constant 0 : index
    %673 = vector.load %arg17[%c0_274, %c0_275] : memref<8x16xf32, #tpu.memory_space<vmem>>, vector<8x16xf32>
    tpu.vector_store %arg17[%c0_274, %c0_275], %668 {strides = array<i32>} : memref<8x16xf32, #tpu.memory_space<vmem>>, vector<8x16xf32>,
    %674 = vector.broadcast %631 : vector<8x1xf32> to vector<8x16xf32>
    %675 = arith.mulf %671, %674 : vector<8x16xf32>
    %676 = vector.shape_cast %675 : vector<8x16xf32> to vector<1x8x16xf32>
    %677 = arith.index_cast %c6_i32 : i32 to index
    %c0_276 = arith.constant 0 : index
    %c0_277 = arith.constant 0 : index
    %678 = vector.load %arg12[%677, %c0_276, %c0_277] : memref<8x8x16xf32, #tpu.memory_space<vmem>>, vector<1x8x16xf32>
    tpu.vector_store %arg12[%677, %c0_276, %c0_277], %676 {strides = array<i32>} : memref<8x8x16xf32, #tpu.memory_space<vmem>>, vector<1x8x16xf32>,
    %c7_i32_278 = arith.constant 7 : i32
    %679 = arith.subi %c7_i32_278, %c6_i32 : i32
    %680 = arith.index_cast %679 : i32 to index
    %c0_279 = arith.constant 0 : index
    %c0_280 = arith.constant 0 : index
    %681 = vector.load %arg5[%680, %c0_279, %c0_280] : memref<8x8x1xf32, #tpu.memory_space<vmem>>, vector<1x8x1xf32>
    %682 = vector.shape_cast %681 : vector<1x8x1xf32> to vector<8x1xf32>
    %683 = arith.index_cast %679 : i32 to index
    %c0_281 = arith.constant 0 : index
    %c0_282 = arith.constant 0 : index
    %684 = vector.load %arg15[%683, %c0_281, %c0_282] : memref<8x8x64xf32, #tpu.memory_space<vmem>>, vector<1x8x64xf32>
    %685 = vector.shape_cast %684 : vector<1x8x64xf32> to vector<8x64xf32>
    %c0_283 = arith.constant 0 : index
    %c0_284 = arith.constant 0 : index
    %686 = vector.load %arg18[%c0_283, %c0_284] : memref<8x16xf32, #tpu.memory_space<vmem>>, vector<8x16xf32>
    %c0_285 = arith.constant 0 : index
    %c0_286 = arith.constant 0 : index
    %687 = vector.load %arg19[%c0_285, %c0_286] : memref<8x16xf32, #tpu.memory_space<vmem>>, vector<8x16xf32>
    %cst_287 = arith.constant dense<0.000000e+00> : vector<8x64xf32>
    %688 = tpu.matmul %686, %22, %cst_287 {dimension_numbers = #tpu.dot_dimension_numbers<[1], [0], [0], [1], [0, 0, 1, 1], [], []>} : vector<8x16xf32>, vector<16x64xf32>, vector<8x64xf32> -> vector<8x64xf32>
    %689 = arith.addf %685, %688 : vector<8x64xf32>
    %690 = vector.extract_strided_slice %689 {offsets = [0, 0], sizes = [8, 16], strides = [1, 1]} : vector<8x64xf32> to vector<8x16xf32>
    %691 = arith.negf %690 : vector<8x16xf32>
    %692 = math.exp %691 : vector<8x16xf32>
    %cst_288 = arith.constant 1.000000e+00 : f32
    %693 = vector.broadcast %cst_288 : f32 to vector<8x16xf32>
    %694 = arith.addf %693, %692 : vector<8x16xf32>
    %695 = arith.divf %693, %694 : vector<8x16xf32>
    %696 = vector.extract_strided_slice %689 {offsets = [0, 16], sizes = [8, 16], strides = [1, 1]} : vector<8x64xf32> to vector<8x16xf32>
    %697 = arith.negf %696 : vector<8x16xf32>
    %698 = math.exp %697 : vector<8x16xf32>
    %cst_289 = arith.constant 1.000000e+00 : f32
    %699 = vector.broadcast %cst_289 : f32 to vector<8x16xf32>
    %700 = arith.addf %699, %698 : vector<8x16xf32>
    %701 = arith.divf %699, %700 : vector<8x16xf32>
    %702 = vector.extract_strided_slice %689 {offsets = [0, 32], sizes = [8, 16], strides = [1, 1]} : vector<8x64xf32> to vector<8x16xf32>
    %703 = math.tanh %702 : vector<8x16xf32>
    %704 = vector.extract_strided_slice %689 {offsets = [0, 48], sizes = [8, 16], strides = [1, 1]} : vector<8x64xf32> to vector<8x16xf32>
    %705 = arith.negf %704 : vector<8x16xf32>
    %706 = math.exp %705 : vector<8x16xf32>
    %cst_290 = arith.constant 1.000000e+00 : f32
    %707 = vector.broadcast %cst_290 : f32 to vector<8x16xf32>
    %708 = arith.addf %707, %706 : vector<8x16xf32>
    %709 = arith.divf %707, %708 : vector<8x16xf32>
    %710 = arith.mulf %701, %687 : vector<8x16xf32>
    %711 = arith.mulf %695, %703 : vector<8x16xf32>
    %712 = arith.addf %710, %711 : vector<8x16xf32>
    %713 = math.tanh %712 : vector<8x16xf32>
    %714 = arith.mulf %709, %713 : vector<8x16xf32>
    %cst_291 = arith.constant 0.000000e+00 : f32
    %715 = vector.broadcast %cst_291 : f32 to vector<8x1xf32>
    %716 = arith.cmpf ogt, %682, %715 : vector<8x1xf32>
    %717 = vector.shape_cast %716 : vector<8x1xi1> to vector<8x1xi1>
    %718 = vector.broadcast %717 : vector<8x1xi1> to vector<8x16xi1>
    %719 = arith.select %718, %712, %687 : vector<8x16xi1>, vector<8x16xf32>
    %720 = vector.shape_cast %716 : vector<8x1xi1> to vector<8x1xi1>
    %721 = vector.broadcast %720 : vector<8x1xi1> to vector<8x16xi1>
    %722 = arith.select %721, %714, %686 : vector<8x16xi1>, vector<8x16xf32>
    %c0_292 = arith.constant 0 : index
    %c0_293 = arith.constant 0 : index
    %723 = vector.load %arg18[%c0_292, %c0_293] : memref<8x16xf32, #tpu.memory_space<vmem>>, vector<8x16xf32>
    tpu.vector_store %arg18[%c0_292, %c0_293], %722 {strides = array<i32>} : memref<8x16xf32, #tpu.memory_space<vmem>>, vector<8x16xf32>,
    %c0_294 = arith.constant 0 : index
    %c0_295 = arith.constant 0 : index
    %724 = vector.load %arg19[%c0_294, %c0_295] : memref<8x16xf32, #tpu.memory_space<vmem>>, vector<8x16xf32>
    tpu.vector_store %arg19[%c0_294, %c0_295], %719 {strides = array<i32>} : memref<8x16xf32, #tpu.memory_space<vmem>>, vector<8x16xf32>,
    %725 = vector.broadcast %682 : vector<8x1xf32> to vector<8x16xf32>
    %726 = arith.mulf %722, %725 : vector<8x16xf32>
    %727 = vector.shape_cast %726 : vector<8x16xf32> to vector<1x8x16xf32>
    %728 = arith.index_cast %679 : i32 to index
    %c0_296 = arith.constant 0 : index
    %c0_297 = arith.constant 0 : index
    %729 = vector.load %arg13[%728, %c0_296, %c0_297] : memref<8x8x16xf32, #tpu.memory_space<vmem>>, vector<1x8x16xf32>
    tpu.vector_store %arg13[%728, %c0_296, %c0_297], %727 {strides = array<i32>} : memref<8x8x16xf32, #tpu.memory_space<vmem>>, vector<1x8x16xf32>,
    %c7_i32_298 = arith.constant 7 : i32
    %730 = arith.index_cast %c7_i32_298 : i32 to index
    %c0_299 = arith.constant 0 : index
    %c0_300 = arith.constant 0 : index
    %731 = vector.load %arg4[%730, %c0_299, %c0_300] : memref<8x8x1xf32, #tpu.memory_space<vmem>>, vector<1x8x1xf32>
    %732 = vector.shape_cast %731 : vector<1x8x1xf32> to vector<8x1xf32>
    %733 = arith.index_cast %c7_i32_298 : i32 to index
    %c0_301 = arith.constant 0 : index
    %c0_302 = arith.constant 0 : index
    %734 = vector.load %arg14[%733, %c0_301, %c0_302] : memref<8x8x64xf32, #tpu.memory_space<vmem>>, vector<1x8x64xf32>
    %735 = vector.shape_cast %734 : vector<1x8x64xf32> to vector<8x64xf32>
    %c0_303 = arith.constant 0 : index
    %c0_304 = arith.constant 0 : index
    %736 = vector.load %arg16[%c0_303, %c0_304] : memref<8x16xf32, #tpu.memory_space<vmem>>, vector<8x16xf32>
    %c0_305 = arith.constant 0 : index
    %c0_306 = arith.constant 0 : index
    %737 = vector.load %arg17[%c0_305, %c0_306] : memref<8x16xf32, #tpu.memory_space<vmem>>, vector<8x16xf32>
    %cst_307 = arith.constant dense<0.000000e+00> : vector<8x64xf32>
    %738 = tpu.matmul %736, %21, %cst_307 {dimension_numbers = #tpu.dot_dimension_numbers<[1], [0], [0], [1], [0, 0, 1, 1], [], []>} : vector<8x16xf32>, vector<16x64xf32>, vector<8x64xf32> -> vector<8x64xf32>
    %739 = arith.addf %735, %738 : vector<8x64xf32>
    %740 = vector.extract_strided_slice %739 {offsets = [0, 0], sizes = [8, 16], strides = [1, 1]} : vector<8x64xf32> to vector<8x16xf32>
    %741 = arith.negf %740 : vector<8x16xf32>
    %742 = math.exp %741 : vector<8x16xf32>
    %cst_308 = arith.constant 1.000000e+00 : f32
    %743 = vector.broadcast %cst_308 : f32 to vector<8x16xf32>
    %744 = arith.addf %743, %742 : vector<8x16xf32>
    %745 = arith.divf %743, %744 : vector<8x16xf32>
    %746 = vector.extract_strided_slice %739 {offsets = [0, 16], sizes = [8, 16], strides = [1, 1]} : vector<8x64xf32> to vector<8x16xf32>
    %747 = arith.negf %746 : vector<8x16xf32>
    %748 = math.exp %747 : vector<8x16xf32>
    %cst_309 = arith.constant 1.000000e+00 : f32
    %749 = vector.broadcast %cst_309 : f32 to vector<8x16xf32>
    %750 = arith.addf %749, %748 : vector<8x16xf32>
    %751 = arith.divf %749, %750 : vector<8x16xf32>
    %752 = vector.extract_strided_slice %739 {offsets = [0, 32], sizes = [8, 16], strides = [1, 1]} : vector<8x64xf32> to vector<8x16xf32>
    %753 = math.tanh %752 : vector<8x16xf32>
    %754 = vector.extract_strided_slice %739 {offsets = [0, 48], sizes = [8, 16], strides = [1, 1]} : vector<8x64xf32> to vector<8x16xf32>
    %755 = arith.negf %754 : vector<8x16xf32>
    %756 = math.exp %755 : vector<8x16xf32>
    %cst_310 = arith.constant 1.000000e+00 : f32
    %757 = vector.broadcast %cst_310 : f32 to vector<8x16xf32>
    %758 = arith.addf %757, %756 : vector<8x16xf32>
    %759 = arith.divf %757, %758 : vector<8x16xf32>
    %760 = arith.mulf %751, %737 : vector<8x16xf32>
    %761 = arith.mulf %745, %753 : vector<8x16xf32>
    %762 = arith.addf %760, %761 : vector<8x16xf32>
    %763 = math.tanh %762 : vector<8x16xf32>
    %764 = arith.mulf %759, %763 : vector<8x16xf32>
    %cst_311 = arith.constant 0.000000e+00 : f32
    %765 = vector.broadcast %cst_311 : f32 to vector<8x1xf32>
    %766 = arith.cmpf ogt, %732, %765 : vector<8x1xf32>
    %767 = vector.shape_cast %766 : vector<8x1xi1> to vector<8x1xi1>
    %768 = vector.broadcast %767 : vector<8x1xi1> to vector<8x16xi1>
    %769 = arith.select %768, %762, %737 : vector<8x16xi1>, vector<8x16xf32>
    %770 = vector.shape_cast %766 : vector<8x1xi1> to vector<8x1xi1>
    %771 = vector.broadcast %770 : vector<8x1xi1> to vector<8x16xi1>
    %772 = arith.select %771, %764, %736 : vector<8x16xi1>, vector<8x16xf32>
    %c0_312 = arith.constant 0 : index
    %c0_313 = arith.constant 0 : index
    %773 = vector.load %arg16[%c0_312, %c0_313] : memref<8x16xf32, #tpu.memory_space<vmem>>, vector<8x16xf32>
    tpu.vector_store %arg16[%c0_312, %c0_313], %772 {strides = array<i32>} : memref<8x16xf32, #tpu.memory_space<vmem>>, vector<8x16xf32>,
    %c0_314 = arith.constant 0 : index
    %c0_315 = arith.constant 0 : index
    %774 = vector.load %arg17[%c0_314, %c0_315] : memref<8x16xf32, #tpu.memory_space<vmem>>, vector<8x16xf32>
    tpu.vector_store %arg17[%c0_314, %c0_315], %769 {strides = array<i32>} : memref<8x16xf32, #tpu.memory_space<vmem>>, vector<8x16xf32>,
    %775 = vector.broadcast %732 : vector<8x1xf32> to vector<8x16xf32>
    %776 = arith.mulf %772, %775 : vector<8x16xf32>
    %777 = vector.shape_cast %776 : vector<8x16xf32> to vector<1x8x16xf32>
    %778 = arith.index_cast %c7_i32_298 : i32 to index
    %c0_316 = arith.constant 0 : index
    %c0_317 = arith.constant 0 : index
    %779 = vector.load %arg12[%778, %c0_316, %c0_317] : memref<8x8x16xf32, #tpu.memory_space<vmem>>, vector<1x8x16xf32>
    tpu.vector_store %arg12[%778, %c0_316, %c0_317], %777 {strides = array<i32>} : memref<8x8x16xf32, #tpu.memory_space<vmem>>, vector<1x8x16xf32>,
    %c7_i32_318 = arith.constant 7 : i32
    %780 = arith.subi %c7_i32_318, %c7_i32_298 : i32
    %781 = arith.index_cast %780 : i32 to index
    %c0_319 = arith.constant 0 : index
    %c0_320 = arith.constant 0 : index
    %782 = vector.load %arg5[%781, %c0_319, %c0_320] : memref<8x8x1xf32, #tpu.memory_space<vmem>>, vector<1x8x1xf32>
    %783 = vector.shape_cast %782 : vector<1x8x1xf32> to vector<8x1xf32>
    %784 = arith.index_cast %780 : i32 to index
    %c0_321 = arith.constant 0 : index
    %c0_322 = arith.constant 0 : index
    %785 = vector.load %arg15[%784, %c0_321, %c0_322] : memref<8x8x64xf32, #tpu.memory_space<vmem>>, vector<1x8x64xf32>
    %786 = vector.shape_cast %785 : vector<1x8x64xf32> to vector<8x64xf32>
    %c0_323 = arith.constant 0 : index
    %c0_324 = arith.constant 0 : index
    %787 = vector.load %arg18[%c0_323, %c0_324] : memref<8x16xf32, #tpu.memory_space<vmem>>, vector<8x16xf32>
    %c0_325 = arith.constant 0 : index
    %c0_326 = arith.constant 0 : index
    %788 = vector.load %arg19[%c0_325, %c0_326] : memref<8x16xf32, #tpu.memory_space<vmem>>, vector<8x16xf32>
    %cst_327 = arith.constant dense<0.000000e+00> : vector<8x64xf32>
    %789 = tpu.matmul %787, %22, %cst_327 {dimension_numbers = #tpu.dot_dimension_numbers<[1], [0], [0], [1], [0, 0, 1, 1], [], []>} : vector<8x16xf32>, vector<16x64xf32>, vector<8x64xf32> -> vector<8x64xf32>
    %790 = arith.addf %786, %789 : vector<8x64xf32>
    %791 = vector.extract_strided_slice %790 {offsets = [0, 0], sizes = [8, 16], strides = [1, 1]} : vector<8x64xf32> to vector<8x16xf32>
    %792 = arith.negf %791 : vector<8x16xf32>
    %793 = math.exp %792 : vector<8x16xf32>
    %cst_328 = arith.constant 1.000000e+00 : f32
    %794 = vector.broadcast %cst_328 : f32 to vector<8x16xf32>
    %795 = arith.addf %794, %793 : vector<8x16xf32>
    %796 = arith.divf %794, %795 : vector<8x16xf32>
    %797 = vector.extract_strided_slice %790 {offsets = [0, 16], sizes = [8, 16], strides = [1, 1]} : vector<8x64xf32> to vector<8x16xf32>
    %798 = arith.negf %797 : vector<8x16xf32>
    %799 = math.exp %798 : vector<8x16xf32>
    %cst_329 = arith.constant 1.000000e+00 : f32
    %800 = vector.broadcast %cst_329 : f32 to vector<8x16xf32>
    %801 = arith.addf %800, %799 : vector<8x16xf32>
    %802 = arith.divf %800, %801 : vector<8x16xf32>
    %803 = vector.extract_strided_slice %790 {offsets = [0, 32], sizes = [8, 16], strides = [1, 1]} : vector<8x64xf32> to vector<8x16xf32>
    %804 = math.tanh %803 : vector<8x16xf32>
    %805 = vector.extract_strided_slice %790 {offsets = [0, 48], sizes = [8, 16], strides = [1, 1]} : vector<8x64xf32> to vector<8x16xf32>
    %806 = arith.negf %805 : vector<8x16xf32>
    %807 = math.exp %806 : vector<8x16xf32>
    %cst_330 = arith.constant 1.000000e+00 : f32
    %808 = vector.broadcast %cst_330 : f32 to vector<8x16xf32>
    %809 = arith.addf %808, %807 : vector<8x16xf32>
    %810 = arith.divf %808, %809 : vector<8x16xf32>
    %811 = arith.mulf %802, %788 : vector<8x16xf32>
    %812 = arith.mulf %796, %804 : vector<8x16xf32>
    %813 = arith.addf %811, %812 : vector<8x16xf32>
    %814 = math.tanh %813 : vector<8x16xf32>
    %815 = arith.mulf %810, %814 : vector<8x16xf32>
    %cst_331 = arith.constant 0.000000e+00 : f32
    %816 = vector.broadcast %cst_331 : f32 to vector<8x1xf32>
    %817 = arith.cmpf ogt, %783, %816 : vector<8x1xf32>
    %818 = vector.shape_cast %817 : vector<8x1xi1> to vector<8x1xi1>
    %819 = vector.broadcast %818 : vector<8x1xi1> to vector<8x16xi1>
    %820 = arith.select %819, %813, %788 : vector<8x16xi1>, vector<8x16xf32>
    %821 = vector.shape_cast %817 : vector<8x1xi1> to vector<8x1xi1>
    %822 = vector.broadcast %821 : vector<8x1xi1> to vector<8x16xi1>
    %823 = arith.select %822, %815, %787 : vector<8x16xi1>, vector<8x16xf32>
    %c0_332 = arith.constant 0 : index
    %c0_333 = arith.constant 0 : index
    %824 = vector.load %arg18[%c0_332, %c0_333] : memref<8x16xf32, #tpu.memory_space<vmem>>, vector<8x16xf32>
    tpu.vector_store %arg18[%c0_332, %c0_333], %823 {strides = array<i32>} : memref<8x16xf32, #tpu.memory_space<vmem>>, vector<8x16xf32>,
    %c0_334 = arith.constant 0 : index
    %c0_335 = arith.constant 0 : index
    %825 = vector.load %arg19[%c0_334, %c0_335] : memref<8x16xf32, #tpu.memory_space<vmem>>, vector<8x16xf32>
    tpu.vector_store %arg19[%c0_334, %c0_335], %820 {strides = array<i32>} : memref<8x16xf32, #tpu.memory_space<vmem>>, vector<8x16xf32>,
    %826 = vector.broadcast %783 : vector<8x1xf32> to vector<8x16xf32>
    %827 = arith.mulf %823, %826 : vector<8x16xf32>
    %828 = vector.shape_cast %827 : vector<8x16xf32> to vector<1x8x16xf32>
    %829 = arith.index_cast %780 : i32 to index
    %c0_336 = arith.constant 0 : index
    %c0_337 = arith.constant 0 : index
    %830 = vector.load %arg13[%829, %c0_336, %c0_337] : memref<8x8x16xf32, #tpu.memory_space<vmem>>, vector<1x8x16xf32>
    tpu.vector_store %arg13[%829, %c0_336, %c0_337], %828 {strides = array<i32>} : memref<8x8x16xf32, #tpu.memory_space<vmem>>, vector<1x8x16xf32>,
    %c8_i32 = arith.constant 8 : i32
    return
  }
  func.func @transform_0(%arg0: i32, %arg1: i32) -> (i32, i32, i32) {
    %c0_i32 = arith.constant 0 : i32
    %c0_i32_0 = arith.constant 0 : i32
    return %arg1, %arg0, %c0_i32 : i32, i32, i32
  }
  func.func @transform_1(%arg0: i32, %arg1: i32) -> (i32, i32, i32) {
    %c0_i32 = arith.constant 0 : i32
    %0 = arith.subi %c0_i32, %arg1 : i32
    %c0_i32_0 = arith.constant 0 : i32
    %c0_i32_1 = arith.constant 0 : i32
    return %0, %arg0, %c0_i32_0 : i32, i32, i32
  }
  func.func @transform_2(%arg0: i32, %arg1: i32) -> (i32, i32, i32) {
    %c0_i32 = arith.constant 0 : i32
    %c0_i32_0 = arith.constant 0 : i32
    return %arg1, %arg0, %c0_i32 : i32, i32, i32
  }
  func.func @transform_3(%arg0: i32, %arg1: i32) -> (i32, i32, i32) {
    %c0_i32 = arith.constant 0 : i32
    %0 = arith.subi %c0_i32, %arg1 : i32
    %c0_i32_0 = arith.constant 0 : i32
    %c0_i32_1 = arith.constant 0 : i32
    return %0, %arg0, %c0_i32_0 : i32, i32, i32
  }
  func.func @transform_4(%arg0: i32, %arg1: i32) -> (i32, i32) {
    %c0_i32 = arith.constant 0 : i32
    %c0_i32_0 = arith.constant 0 : i32
    %c0_i32_1 = arith.constant 0 : i32
    return %c0_i32, %c0_i32_0 : i32, i32
  }
  func.func @transform_5(%arg0: i32, %arg1: i32) -> (i32, i32) {
    %c0_i32 = arith.constant 0 : i32
    %c0_i32_0 = arith.constant 0 : i32
    %c0_i32_1 = arith.constant 0 : i32
    return %c0_i32, %c0_i32_0 : i32, i32
  }
  func.func @transform_6(%arg0: i32, %arg1: i32) -> (i32, i32) {
    %c0_i32 = arith.constant 0 : i32
    %c0_i32_0 = arith.constant 0 : i32
    %c0_i32_1 = arith.constant 0 : i32
    return %c0_i32, %c0_i32_0 : i32, i32
  }
  func.func @transform_7(%arg0: i32, %arg1: i32) -> (i32, i32) {
    %c0_i32 = arith.constant 0 : i32
    %c0_i32_0 = arith.constant 0 : i32
    %c0_i32_1 = arith.constant 0 : i32
    return %c0_i32, %c0_i32_0 : i32, i32
  }
  func.func @transform_8(%arg0: i32, %arg1: i32) -> (i32, i32) {
    %c0_i32 = arith.constant 0 : i32
    %c0_i32_0 = arith.constant 0 : i32
    %c0_i32_1 = arith.constant 0 : i32
    return %c0_i32, %c0_i32_0 : i32, i32
  }
  func.func @transform_9(%arg0: i32, %arg1: i32) -> (i32, i32) {
    %c0_i32 = arith.constant 0 : i32
    %c0_i32_0 = arith.constant 0 : i32
    %c0_i32_1 = arith.constant 0 : i32
    return %c0_i32, %c0_i32_0 : i32, i32
  }
  func.func @transform_10(%arg0: i32, %arg1: i32) -> (i32, i32, i32) {
    %c0_i32 = arith.constant 0 : i32
    %c0_i32_0 = arith.constant 0 : i32
    return %arg1, %arg0, %c0_i32 : i32, i32, i32
  }
  func.func @transform_11(%arg0: i32, %arg1: i32) -> (i32, i32, i32) {
    %c0_i32 = arith.constant 0 : i32
    %0 = arith.subi %c0_i32, %arg1 : i32
    %c0_i32_0 = arith.constant 0 : i32
    %c0_i32_1 = arith.constant 0 : i32
    return %0, %arg0, %c0_i32_0 : i32, i32, i32
  }
}

module attributes {stable_mosaic.version = 11 : i64} {
  func.func @kernel(%arg0: i32, %arg1: i32, %arg2: memref<8x8x16xf32, #tpu.memory_space<vmem>>, %arg3: memref<8x8x16xf32, #tpu.memory_space<vmem>>, %arg4: memref<8x8x1xf32, #tpu.memory_space<vmem>>, %arg5: memref<16x5xf32, #tpu.memory_space<vmem>>, %arg6: memref<16x5xf32, #tpu.memory_space<vmem>>, %arg7: memref<1x5xf32, #tpu.memory_space<vmem>>, %arg8: memref<5x5xf32, #tpu.memory_space<vmem>>, %arg9: memref<1x5xf32, #tpu.memory_space<vmem>>, %arg10: memref<1x5xf32, #tpu.memory_space<vmem>>, %arg11: memref<8x8x5xi32, #tpu.memory_space<vmem>>, %arg12: memref<8x5xf32, #tpu.memory_space<vmem>>, %arg13: memref<8x5xf32, #tpu.memory_space<vmem>>, %arg14: memref<8x8x5xf32, #tpu.memory_space<vmem>>) attributes {dimension_semantics = [#tpu.dimension_semantics<parallel>, #tpu.dimension_semantics<arbitrary>], iteration_bounds = array<i64: 1, 1>, scalar_prefetch = 0 : i64, scratch_operands = 2 : i64, tpu.core_type = #tpu.core_type<tc>, window_params = [{transform_indices = @transform_0, window_bounds = array<i64: 8, 8, 16>}, {transform_indices = @transform_1, window_bounds = array<i64: 8, 8, 16>}, {transform_indices = @transform_2, window_bounds = array<i64: 8, 8, 1>}, {pipeline_mode = #tpu.pipeline_mode<synchronous>, transform_indices = @transform_3, window_bounds = array<i64: 16, 5>}, {pipeline_mode = #tpu.pipeline_mode<synchronous>, transform_indices = @transform_4, window_bounds = array<i64: 16, 5>}, {pipeline_mode = #tpu.pipeline_mode<synchronous>, transform_indices = @transform_5, window_bounds = array<i64: 1, 5>}, {pipeline_mode = #tpu.pipeline_mode<synchronous>, transform_indices = @transform_6, window_bounds = array<i64: 5, 5>}, {pipeline_mode = #tpu.pipeline_mode<synchronous>, transform_indices = @transform_7, window_bounds = array<i64: 1, 5>}, {pipeline_mode = #tpu.pipeline_mode<synchronous>, transform_indices = @transform_8, window_bounds = array<i64: 1, 5>}, {transform_indices = @transform_9, window_bounds = array<i64: 8, 8, 5>}, {transform_indices = @transform_10, window_bounds = array<i64: 8, 5>}]} {
    %c0_i32 = arith.constant 0 : i32
    %0 = arith.cmpi eq, %arg1, %c0_i32 : i32
    %1 = arith.extui %0 : i1 to i32
    %c0_i32_0 = arith.constant 0 : i32
    %2 = arith.cmpi ne, %1, %c0_i32_0 : i32
    scf.if %2 {
      %cst_167 = arith.constant 0.000000e+00 : f32
      %584 = vector.broadcast %cst_167 : f32 to vector<8x5xf32>
      %c0_168 = arith.constant 0 : index
      %c0_169 = arith.constant 0 : index
      %585 = vector.load %arg13[%c0_168, %c0_169] : memref<8x5xf32, #tpu.memory_space<vmem>>, vector<8x5xf32>
      tpu.vector_store %arg13[%c0_168, %c0_169], %584 {strides = array<i32>} : memref<8x5xf32, #tpu.memory_space<vmem>>, vector<8x5xf32>,
    } else {
    }
    %c0 = arith.constant 0 : index
    %c0_1 = arith.constant 0 : index
    %c0_2 = arith.constant 0 : index
    %3 = vector.load %arg2[%c0, %c0_1, %c0_2] : memref<8x8x16xf32, #tpu.memory_space<vmem>>, vector<8x8x16xf32>
    %4 = vector.shape_cast %3 : vector<8x8x16xf32> to vector<64x16xf32>
    %c0_3 = arith.constant 0 : index
    %c0_4 = arith.constant 0 : index
    %5 = vector.load %arg5[%c0_3, %c0_4] : memref<16x5xf32, #tpu.memory_space<vmem>>, vector<16x5xf32>
    %cst = arith.constant dense<0.000000e+00> : vector<64x5xf32>
    %6 = tpu.matmul %4, %5, %cst {dimension_numbers = #tpu.dot_dimension_numbers<[1], [0], [0], [1], [0, 0, 1, 1], [], []>} : vector<64x16xf32>, vector<16x5xf32>, vector<64x5xf32> -> vector<64x5xf32>
    %c0_5 = arith.constant 0 : index
    %c0_6 = arith.constant 0 : index
    %c0_7 = arith.constant 0 : index
    %7 = vector.load %arg3[%c0_5, %c0_6, %c0_7] : memref<8x8x16xf32, #tpu.memory_space<vmem>>, vector<8x8x16xf32>
    %8 = vector.shape_cast %7 : vector<8x8x16xf32> to vector<64x16xf32>
    %c0_8 = arith.constant 0 : index
    %c0_9 = arith.constant 0 : index
    %9 = vector.load %arg6[%c0_8, %c0_9] : memref<16x5xf32, #tpu.memory_space<vmem>>, vector<16x5xf32>
    %cst_10 = arith.constant dense<0.000000e+00> : vector<64x5xf32>
    %10 = tpu.matmul %8, %9, %cst_10 {dimension_numbers = #tpu.dot_dimension_numbers<[1], [0], [0], [1], [0, 0, 1, 1], [], []>} : vector<64x16xf32>, vector<16x5xf32>, vector<64x5xf32> -> vector<64x5xf32>
    %11 = arith.addf %6, %10 : vector<64x5xf32>
    %c0_11 = arith.constant 0 : index
    %c0_12 = arith.constant 0 : index
    %12 = vector.load %arg7[%c0_11, %c0_12] : memref<1x5xf32, #tpu.memory_space<vmem>>, vector<1x5xf32>
    %13 = vector.broadcast %12 : vector<1x5xf32> to vector<64x5xf32>
    %14 = arith.addf %11, %13 : vector<64x5xf32>
    %15 = vector.shape_cast %14 : vector<64x5xf32> to vector<8x8x5xf32>
    %c0_13 = arith.constant 0 : index
    %c0_14 = arith.constant 0 : index
    %c0_15 = arith.constant 0 : index
    %16 = vector.load %arg14[%c0_13, %c0_14, %c0_15] : memref<8x8x5xf32, #tpu.memory_space<vmem>>, vector<8x8x5xf32>
    tpu.vector_store %arg14[%c0_13, %c0_14, %c0_15], %15 {strides = array<i32>} : memref<8x8x5xf32, #tpu.memory_space<vmem>>, vector<8x8x5xf32>,
    %c0_16 = arith.constant 0 : index
    %c0_17 = arith.constant 0 : index
    %17 = vector.load %arg8[%c0_16, %c0_17] : memref<5x5xf32, #tpu.memory_space<vmem>>, vector<5x5xf32>
    %c0_18 = arith.constant 0 : index
    %c0_19 = arith.constant 0 : index
    %18 = vector.load %arg9[%c0_18, %c0_19] : memref<1x5xf32, #tpu.memory_space<vmem>>, vector<1x5xf32>
    %19 = tpu.iota {dimensions = array<i32: 1>} : vector<8x5xi32>
    %c0_i32_20 = arith.constant 0 : i32
    %20 = vector.broadcast %c0_i32_20 : i32 to vector<8x5xi32>
    %c0_i32_21 = arith.constant 0 : i32
    %c8_i32 = arith.constant 8 : i32
    %21 = arith.muli %arg1, %c8_i32 : i32
    %22 = arith.addi %21, %c0_i32_21 : i32
    %23 = arith.index_cast %c0_i32_21 : i32 to index
    %c0_22 = arith.constant 0 : index
    %c0_23 = arith.constant 0 : index
    %24 = vector.load %arg14[%23, %c0_22, %c0_23] : memref<8x8x5xf32, #tpu.memory_space<vmem>>, vector<1x8x5xf32>
    %25 = vector.shape_cast %24 : vector<1x8x5xf32> to vector<8x5xf32>
    %26 = arith.index_cast %c0_i32_21 : i32 to index
    %c0_24 = arith.constant 0 : index
    %c0_25 = arith.constant 0 : index
    %27 = vector.load %arg4[%26, %c0_24, %c0_25] : memref<8x8x1xf32, #tpu.memory_space<vmem>>, vector<1x8x1xf32>
    %28 = vector.shape_cast %27 : vector<1x8x1xf32> to vector<8x1xf32>
    %c0_26 = arith.constant 0 : index
    %c0_27 = arith.constant 0 : index
    %29 = vector.load %arg13[%c0_26, %c0_27] : memref<8x5xf32, #tpu.memory_space<vmem>>, vector<8x5xf32>
    %30 = vector.extract_strided_slice %29 {offsets = [0, 0], sizes = [8, 1], strides = [1, 1]} : vector<8x5xf32> to vector<8x1xf32>
    %31 = vector.extract_strided_slice %17 {offsets = [0, 0], sizes = [1, 5], strides = [1, 1]} : vector<5x5xf32> to vector<1x5xf32>
    %32 = vector.broadcast %30 : vector<8x1xf32> to vector<8x5xf32>
    %33 = vector.broadcast %31 : vector<1x5xf32> to vector<8x5xf32>
    %34 = arith.addf %32, %33 : vector<8x5xf32>
    %35 = vector.extract_strided_slice %29 {offsets = [0, 1], sizes = [8, 1], strides = [1, 1]} : vector<8x5xf32> to vector<8x1xf32>
    %36 = vector.extract_strided_slice %17 {offsets = [1, 0], sizes = [1, 5], strides = [1, 1]} : vector<5x5xf32> to vector<1x5xf32>
    %37 = vector.broadcast %35 : vector<8x1xf32> to vector<8x5xf32>
    %38 = vector.broadcast %36 : vector<1x5xf32> to vector<8x5xf32>
    %39 = arith.addf %37, %38 : vector<8x5xf32>
    %40 = arith.cmpf ogt, %39, %34 : vector<8x5xf32>
    %41 = arith.select %40, %39, %34 : vector<8x5xi1>, vector<8x5xf32>
    %c1_i32 = arith.constant 1 : i32
    %42 = vector.broadcast %c1_i32 : i32 to vector<8x5xi32>
    %43 = arith.select %40, %42, %20 : vector<8x5xi1>, vector<8x5xi32>
    %44 = vector.extract_strided_slice %29 {offsets = [0, 2], sizes = [8, 1], strides = [1, 1]} : vector<8x5xf32> to vector<8x1xf32>
    %45 = vector.extract_strided_slice %17 {offsets = [2, 0], sizes = [1, 5], strides = [1, 1]} : vector<5x5xf32> to vector<1x5xf32>
    %46 = vector.broadcast %44 : vector<8x1xf32> to vector<8x5xf32>
    %47 = vector.broadcast %45 : vector<1x5xf32> to vector<8x5xf32>
    %48 = arith.addf %46, %47 : vector<8x5xf32>
    %49 = arith.cmpf ogt, %48, %41 : vector<8x5xf32>
    %50 = arith.select %49, %48, %41 : vector<8x5xi1>, vector<8x5xf32>
    %c2_i32 = arith.constant 2 : i32
    %51 = vector.broadcast %c2_i32 : i32 to vector<8x5xi32>
    %52 = arith.select %49, %51, %43 : vector<8x5xi1>, vector<8x5xi32>
    %53 = vector.extract_strided_slice %29 {offsets = [0, 3], sizes = [8, 1], strides = [1, 1]} : vector<8x5xf32> to vector<8x1xf32>
    %54 = vector.extract_strided_slice %17 {offsets = [3, 0], sizes = [1, 5], strides = [1, 1]} : vector<5x5xf32> to vector<1x5xf32>
    %55 = vector.broadcast %53 : vector<8x1xf32> to vector<8x5xf32>
    %56 = vector.broadcast %54 : vector<1x5xf32> to vector<8x5xf32>
    %57 = arith.addf %55, %56 : vector<8x5xf32>
    %58 = arith.cmpf ogt, %57, %50 : vector<8x5xf32>
    %59 = arith.select %58, %57, %50 : vector<8x5xi1>, vector<8x5xf32>
    %c3_i32 = arith.constant 3 : i32
    %60 = vector.broadcast %c3_i32 : i32 to vector<8x5xi32>
    %61 = arith.select %58, %60, %52 : vector<8x5xi1>, vector<8x5xi32>
    %62 = vector.extract_strided_slice %29 {offsets = [0, 4], sizes = [8, 1], strides = [1, 1]} : vector<8x5xf32> to vector<8x1xf32>
    %63 = vector.extract_strided_slice %17 {offsets = [4, 0], sizes = [1, 5], strides = [1, 1]} : vector<5x5xf32> to vector<1x5xf32>
    %64 = vector.broadcast %62 : vector<8x1xf32> to vector<8x5xf32>
    %65 = vector.broadcast %63 : vector<1x5xf32> to vector<8x5xf32>
    %66 = arith.addf %64, %65 : vector<8x5xf32>
    %67 = arith.cmpf ogt, %66, %59 : vector<8x5xf32>
    %68 = arith.select %67, %66, %59 : vector<8x5xi1>, vector<8x5xf32>
    %c4_i32 = arith.constant 4 : i32
    %69 = vector.broadcast %c4_i32 : i32 to vector<8x5xi32>
    %70 = arith.select %67, %69, %61 : vector<8x5xi1>, vector<8x5xi32>
    %cst_28 = arith.constant 0.000000e+00 : f32
    %71 = vector.broadcast %cst_28 : f32 to vector<8x1xf32>
    %72 = arith.cmpf ogt, %28, %71 : vector<8x1xf32>
    %c0_i32_29 = arith.constant 0 : i32
    %73 = arith.cmpi eq, %22, %c0_i32_29 : i32
    %74 = arith.addf %68, %25 : vector<8x5xf32>
    %75 = vector.broadcast %18 : vector<1x5xf32> to vector<8x5xf32>
    %76 = arith.addf %75, %25 : vector<8x5xf32>
    %77 = vector.shape_cast %72 : vector<8x1xi1> to vector<8x1xi1>
    %78 = vector.broadcast %77 : vector<8x1xi1> to vector<8x5xi1>
    %79 = arith.select %78, %74, %29 : vector<8x5xi1>, vector<8x5xf32>
    %80 = arith.select %73, %76, %79 : vector<8x5xf32>
    %true = arith.constant true
    %81 = arith.xori %73, %true : i1
    %82 = vector.broadcast %81 : i1 to vector<8x1xi1>
    %83 = arith.andi %82, %72 : vector<8x1xi1>
    %84 = vector.shape_cast %83 : vector<8x1xi1> to vector<8x1xi1>
    %85 = vector.broadcast %84 : vector<8x1xi1> to vector<8x5xi1>
    %86 = arith.select %85, %70, %19 : vector<8x5xi1>, vector<8x5xi32>
    %c0_30 = arith.constant 0 : index
    %c0_31 = arith.constant 0 : index
    %87 = vector.load %arg13[%c0_30, %c0_31] : memref<8x5xf32, #tpu.memory_space<vmem>>, vector<8x5xf32>
    tpu.vector_store %arg13[%c0_30, %c0_31], %80 {strides = array<i32>} : memref<8x5xf32, #tpu.memory_space<vmem>>, vector<8x5xf32>,
    %88 = vector.shape_cast %86 : vector<8x5xi32> to vector<1x8x5xi32>
    %89 = arith.index_cast %c0_i32_21 : i32 to index
    %c0_32 = arith.constant 0 : index
    %c0_33 = arith.constant 0 : index
    %90 = vector.load %arg11[%89, %c0_32, %c0_33] : memref<8x8x5xi32, #tpu.memory_space<vmem>>, vector<1x8x5xi32>
    tpu.vector_store %arg11[%89, %c0_32, %c0_33], %88 {strides = array<i32>} : memref<8x8x5xi32, #tpu.memory_space<vmem>>, vector<1x8x5xi32>,
    %c1_i32_34 = arith.constant 1 : i32
    %c8_i32_35 = arith.constant 8 : i32
    %91 = arith.muli %arg1, %c8_i32_35 : i32
    %92 = arith.addi %91, %c1_i32_34 : i32
    %93 = arith.index_cast %c1_i32_34 : i32 to index
    %c0_36 = arith.constant 0 : index
    %c0_37 = arith.constant 0 : index
    %94 = vector.load %arg14[%93, %c0_36, %c0_37] : memref<8x8x5xf32, #tpu.memory_space<vmem>>, vector<1x8x5xf32>
    %95 = vector.shape_cast %94 : vector<1x8x5xf32> to vector<8x5xf32>
    %96 = arith.index_cast %c1_i32_34 : i32 to index
    %c0_38 = arith.constant 0 : index
    %c0_39 = arith.constant 0 : index
    %97 = vector.load %arg4[%96, %c0_38, %c0_39] : memref<8x8x1xf32, #tpu.memory_space<vmem>>, vector<1x8x1xf32>
    %98 = vector.shape_cast %97 : vector<1x8x1xf32> to vector<8x1xf32>
    %c0_40 = arith.constant 0 : index
    %c0_41 = arith.constant 0 : index
    %99 = vector.load %arg13[%c0_40, %c0_41] : memref<8x5xf32, #tpu.memory_space<vmem>>, vector<8x5xf32>
    %100 = vector.extract_strided_slice %99 {offsets = [0, 0], sizes = [8, 1], strides = [1, 1]} : vector<8x5xf32> to vector<8x1xf32>
    %101 = vector.extract_strided_slice %17 {offsets = [0, 0], sizes = [1, 5], strides = [1, 1]} : vector<5x5xf32> to vector<1x5xf32>
    %102 = vector.broadcast %100 : vector<8x1xf32> to vector<8x5xf32>
    %103 = vector.broadcast %101 : vector<1x5xf32> to vector<8x5xf32>
    %104 = arith.addf %102, %103 : vector<8x5xf32>
    %105 = vector.extract_strided_slice %99 {offsets = [0, 1], sizes = [8, 1], strides = [1, 1]} : vector<8x5xf32> to vector<8x1xf32>
    %106 = vector.extract_strided_slice %17 {offsets = [1, 0], sizes = [1, 5], strides = [1, 1]} : vector<5x5xf32> to vector<1x5xf32>
    %107 = vector.broadcast %105 : vector<8x1xf32> to vector<8x5xf32>
    %108 = vector.broadcast %106 : vector<1x5xf32> to vector<8x5xf32>
    %109 = arith.addf %107, %108 : vector<8x5xf32>
    %110 = arith.cmpf ogt, %109, %104 : vector<8x5xf32>
    %111 = arith.select %110, %109, %104 : vector<8x5xi1>, vector<8x5xf32>
    %c1_i32_42 = arith.constant 1 : i32
    %112 = vector.broadcast %c1_i32_42 : i32 to vector<8x5xi32>
    %113 = arith.select %110, %112, %20 : vector<8x5xi1>, vector<8x5xi32>
    %114 = vector.extract_strided_slice %99 {offsets = [0, 2], sizes = [8, 1], strides = [1, 1]} : vector<8x5xf32> to vector<8x1xf32>
    %115 = vector.extract_strided_slice %17 {offsets = [2, 0], sizes = [1, 5], strides = [1, 1]} : vector<5x5xf32> to vector<1x5xf32>
    %116 = vector.broadcast %114 : vector<8x1xf32> to vector<8x5xf32>
    %117 = vector.broadcast %115 : vector<1x5xf32> to vector<8x5xf32>
    %118 = arith.addf %116, %117 : vector<8x5xf32>
    %119 = arith.cmpf ogt, %118, %111 : vector<8x5xf32>
    %120 = arith.select %119, %118, %111 : vector<8x5xi1>, vector<8x5xf32>
    %c2_i32_43 = arith.constant 2 : i32
    %121 = vector.broadcast %c2_i32_43 : i32 to vector<8x5xi32>
    %122 = arith.select %119, %121, %113 : vector<8x5xi1>, vector<8x5xi32>
    %123 = vector.extract_strided_slice %99 {offsets = [0, 3], sizes = [8, 1], strides = [1, 1]} : vector<8x5xf32> to vector<8x1xf32>
    %124 = vector.extract_strided_slice %17 {offsets = [3, 0], sizes = [1, 5], strides = [1, 1]} : vector<5x5xf32> to vector<1x5xf32>
    %125 = vector.broadcast %123 : vector<8x1xf32> to vector<8x5xf32>
    %126 = vector.broadcast %124 : vector<1x5xf32> to vector<8x5xf32>
    %127 = arith.addf %125, %126 : vector<8x5xf32>
    %128 = arith.cmpf ogt, %127, %120 : vector<8x5xf32>
    %129 = arith.select %128, %127, %120 : vector<8x5xi1>, vector<8x5xf32>
    %c3_i32_44 = arith.constant 3 : i32
    %130 = vector.broadcast %c3_i32_44 : i32 to vector<8x5xi32>
    %131 = arith.select %128, %130, %122 : vector<8x5xi1>, vector<8x5xi32>
    %132 = vector.extract_strided_slice %99 {offsets = [0, 4], sizes = [8, 1], strides = [1, 1]} : vector<8x5xf32> to vector<8x1xf32>
    %133 = vector.extract_strided_slice %17 {offsets = [4, 0], sizes = [1, 5], strides = [1, 1]} : vector<5x5xf32> to vector<1x5xf32>
    %134 = vector.broadcast %132 : vector<8x1xf32> to vector<8x5xf32>
    %135 = vector.broadcast %133 : vector<1x5xf32> to vector<8x5xf32>
    %136 = arith.addf %134, %135 : vector<8x5xf32>
    %137 = arith.cmpf ogt, %136, %129 : vector<8x5xf32>
    %138 = arith.select %137, %136, %129 : vector<8x5xi1>, vector<8x5xf32>
    %c4_i32_45 = arith.constant 4 : i32
    %139 = vector.broadcast %c4_i32_45 : i32 to vector<8x5xi32>
    %140 = arith.select %137, %139, %131 : vector<8x5xi1>, vector<8x5xi32>
    %cst_46 = arith.constant 0.000000e+00 : f32
    %141 = vector.broadcast %cst_46 : f32 to vector<8x1xf32>
    %142 = arith.cmpf ogt, %98, %141 : vector<8x1xf32>
    %c0_i32_47 = arith.constant 0 : i32
    %143 = arith.cmpi eq, %92, %c0_i32_47 : i32
    %144 = arith.addf %138, %95 : vector<8x5xf32>
    %145 = vector.broadcast %18 : vector<1x5xf32> to vector<8x5xf32>
    %146 = arith.addf %145, %95 : vector<8x5xf32>
    %147 = vector.shape_cast %142 : vector<8x1xi1> to vector<8x1xi1>
    %148 = vector.broadcast %147 : vector<8x1xi1> to vector<8x5xi1>
    %149 = arith.select %148, %144, %99 : vector<8x5xi1>, vector<8x5xf32>
    %150 = arith.select %143, %146, %149 : vector<8x5xf32>
    %true_48 = arith.constant true
    %151 = arith.xori %143, %true_48 : i1
    %152 = vector.broadcast %151 : i1 to vector<8x1xi1>
    %153 = arith.andi %152, %142 : vector<8x1xi1>
    %154 = vector.shape_cast %153 : vector<8x1xi1> to vector<8x1xi1>
    %155 = vector.broadcast %154 : vector<8x1xi1> to vector<8x5xi1>
    %156 = arith.select %155, %140, %19 : vector<8x5xi1>, vector<8x5xi32>
    %c0_49 = arith.constant 0 : index
    %c0_50 = arith.constant 0 : index
    %157 = vector.load %arg13[%c0_49, %c0_50] : memref<8x5xf32, #tpu.memory_space<vmem>>, vector<8x5xf32>
    tpu.vector_store %arg13[%c0_49, %c0_50], %150 {strides = array<i32>} : memref<8x5xf32, #tpu.memory_space<vmem>>, vector<8x5xf32>,
    %158 = vector.shape_cast %156 : vector<8x5xi32> to vector<1x8x5xi32>
    %159 = arith.index_cast %c1_i32_34 : i32 to index
    %c0_51 = arith.constant 0 : index
    %c0_52 = arith.constant 0 : index
    %160 = vector.load %arg11[%159, %c0_51, %c0_52] : memref<8x8x5xi32, #tpu.memory_space<vmem>>, vector<1x8x5xi32>
    tpu.vector_store %arg11[%159, %c0_51, %c0_52], %158 {strides = array<i32>} : memref<8x8x5xi32, #tpu.memory_space<vmem>>, vector<1x8x5xi32>,
    %c2_i32_53 = arith.constant 2 : i32
    %c8_i32_54 = arith.constant 8 : i32
    %161 = arith.muli %arg1, %c8_i32_54 : i32
    %162 = arith.addi %161, %c2_i32_53 : i32
    %163 = arith.index_cast %c2_i32_53 : i32 to index
    %c0_55 = arith.constant 0 : index
    %c0_56 = arith.constant 0 : index
    %164 = vector.load %arg14[%163, %c0_55, %c0_56] : memref<8x8x5xf32, #tpu.memory_space<vmem>>, vector<1x8x5xf32>
    %165 = vector.shape_cast %164 : vector<1x8x5xf32> to vector<8x5xf32>
    %166 = arith.index_cast %c2_i32_53 : i32 to index
    %c0_57 = arith.constant 0 : index
    %c0_58 = arith.constant 0 : index
    %167 = vector.load %arg4[%166, %c0_57, %c0_58] : memref<8x8x1xf32, #tpu.memory_space<vmem>>, vector<1x8x1xf32>
    %168 = vector.shape_cast %167 : vector<1x8x1xf32> to vector<8x1xf32>
    %c0_59 = arith.constant 0 : index
    %c0_60 = arith.constant 0 : index
    %169 = vector.load %arg13[%c0_59, %c0_60] : memref<8x5xf32, #tpu.memory_space<vmem>>, vector<8x5xf32>
    %170 = vector.extract_strided_slice %169 {offsets = [0, 0], sizes = [8, 1], strides = [1, 1]} : vector<8x5xf32> to vector<8x1xf32>
    %171 = vector.extract_strided_slice %17 {offsets = [0, 0], sizes = [1, 5], strides = [1, 1]} : vector<5x5xf32> to vector<1x5xf32>
    %172 = vector.broadcast %170 : vector<8x1xf32> to vector<8x5xf32>
    %173 = vector.broadcast %171 : vector<1x5xf32> to vector<8x5xf32>
    %174 = arith.addf %172, %173 : vector<8x5xf32>
    %175 = vector.extract_strided_slice %169 {offsets = [0, 1], sizes = [8, 1], strides = [1, 1]} : vector<8x5xf32> to vector<8x1xf32>
    %176 = vector.extract_strided_slice %17 {offsets = [1, 0], sizes = [1, 5], strides = [1, 1]} : vector<5x5xf32> to vector<1x5xf32>
    %177 = vector.broadcast %175 : vector<8x1xf32> to vector<8x5xf32>
    %178 = vector.broadcast %176 : vector<1x5xf32> to vector<8x5xf32>
    %179 = arith.addf %177, %178 : vector<8x5xf32>
    %180 = arith.cmpf ogt, %179, %174 : vector<8x5xf32>
    %181 = arith.select %180, %179, %174 : vector<8x5xi1>, vector<8x5xf32>
    %c1_i32_61 = arith.constant 1 : i32
    %182 = vector.broadcast %c1_i32_61 : i32 to vector<8x5xi32>
    %183 = arith.select %180, %182, %20 : vector<8x5xi1>, vector<8x5xi32>
    %184 = vector.extract_strided_slice %169 {offsets = [0, 2], sizes = [8, 1], strides = [1, 1]} : vector<8x5xf32> to vector<8x1xf32>
    %185 = vector.extract_strided_slice %17 {offsets = [2, 0], sizes = [1, 5], strides = [1, 1]} : vector<5x5xf32> to vector<1x5xf32>
    %186 = vector.broadcast %184 : vector<8x1xf32> to vector<8x5xf32>
    %187 = vector.broadcast %185 : vector<1x5xf32> to vector<8x5xf32>
    %188 = arith.addf %186, %187 : vector<8x5xf32>
    %189 = arith.cmpf ogt, %188, %181 : vector<8x5xf32>
    %190 = arith.select %189, %188, %181 : vector<8x5xi1>, vector<8x5xf32>
    %c2_i32_62 = arith.constant 2 : i32
    %191 = vector.broadcast %c2_i32_62 : i32 to vector<8x5xi32>
    %192 = arith.select %189, %191, %183 : vector<8x5xi1>, vector<8x5xi32>
    %193 = vector.extract_strided_slice %169 {offsets = [0, 3], sizes = [8, 1], strides = [1, 1]} : vector<8x5xf32> to vector<8x1xf32>
    %194 = vector.extract_strided_slice %17 {offsets = [3, 0], sizes = [1, 5], strides = [1, 1]} : vector<5x5xf32> to vector<1x5xf32>
    %195 = vector.broadcast %193 : vector<8x1xf32> to vector<8x5xf32>
    %196 = vector.broadcast %194 : vector<1x5xf32> to vector<8x5xf32>
    %197 = arith.addf %195, %196 : vector<8x5xf32>
    %198 = arith.cmpf ogt, %197, %190 : vector<8x5xf32>
    %199 = arith.select %198, %197, %190 : vector<8x5xi1>, vector<8x5xf32>
    %c3_i32_63 = arith.constant 3 : i32
    %200 = vector.broadcast %c3_i32_63 : i32 to vector<8x5xi32>
    %201 = arith.select %198, %200, %192 : vector<8x5xi1>, vector<8x5xi32>
    %202 = vector.extract_strided_slice %169 {offsets = [0, 4], sizes = [8, 1], strides = [1, 1]} : vector<8x5xf32> to vector<8x1xf32>
    %203 = vector.extract_strided_slice %17 {offsets = [4, 0], sizes = [1, 5], strides = [1, 1]} : vector<5x5xf32> to vector<1x5xf32>
    %204 = vector.broadcast %202 : vector<8x1xf32> to vector<8x5xf32>
    %205 = vector.broadcast %203 : vector<1x5xf32> to vector<8x5xf32>
    %206 = arith.addf %204, %205 : vector<8x5xf32>
    %207 = arith.cmpf ogt, %206, %199 : vector<8x5xf32>
    %208 = arith.select %207, %206, %199 : vector<8x5xi1>, vector<8x5xf32>
    %c4_i32_64 = arith.constant 4 : i32
    %209 = vector.broadcast %c4_i32_64 : i32 to vector<8x5xi32>
    %210 = arith.select %207, %209, %201 : vector<8x5xi1>, vector<8x5xi32>
    %cst_65 = arith.constant 0.000000e+00 : f32
    %211 = vector.broadcast %cst_65 : f32 to vector<8x1xf32>
    %212 = arith.cmpf ogt, %168, %211 : vector<8x1xf32>
    %c0_i32_66 = arith.constant 0 : i32
    %213 = arith.cmpi eq, %162, %c0_i32_66 : i32
    %214 = arith.addf %208, %165 : vector<8x5xf32>
    %215 = vector.broadcast %18 : vector<1x5xf32> to vector<8x5xf32>
    %216 = arith.addf %215, %165 : vector<8x5xf32>
    %217 = vector.shape_cast %212 : vector<8x1xi1> to vector<8x1xi1>
    %218 = vector.broadcast %217 : vector<8x1xi1> to vector<8x5xi1>
    %219 = arith.select %218, %214, %169 : vector<8x5xi1>, vector<8x5xf32>
    %220 = arith.select %213, %216, %219 : vector<8x5xf32>
    %true_67 = arith.constant true
    %221 = arith.xori %213, %true_67 : i1
    %222 = vector.broadcast %221 : i1 to vector<8x1xi1>
    %223 = arith.andi %222, %212 : vector<8x1xi1>
    %224 = vector.shape_cast %223 : vector<8x1xi1> to vector<8x1xi1>
    %225 = vector.broadcast %224 : vector<8x1xi1> to vector<8x5xi1>
    %226 = arith.select %225, %210, %19 : vector<8x5xi1>, vector<8x5xi32>
    %c0_68 = arith.constant 0 : index
    %c0_69 = arith.constant 0 : index
    %227 = vector.load %arg13[%c0_68, %c0_69] : memref<8x5xf32, #tpu.memory_space<vmem>>, vector<8x5xf32>
    tpu.vector_store %arg13[%c0_68, %c0_69], %220 {strides = array<i32>} : memref<8x5xf32, #tpu.memory_space<vmem>>, vector<8x5xf32>,
    %228 = vector.shape_cast %226 : vector<8x5xi32> to vector<1x8x5xi32>
    %229 = arith.index_cast %c2_i32_53 : i32 to index
    %c0_70 = arith.constant 0 : index
    %c0_71 = arith.constant 0 : index
    %230 = vector.load %arg11[%229, %c0_70, %c0_71] : memref<8x8x5xi32, #tpu.memory_space<vmem>>, vector<1x8x5xi32>
    tpu.vector_store %arg11[%229, %c0_70, %c0_71], %228 {strides = array<i32>} : memref<8x8x5xi32, #tpu.memory_space<vmem>>, vector<1x8x5xi32>,
    %c3_i32_72 = arith.constant 3 : i32
    %c8_i32_73 = arith.constant 8 : i32
    %231 = arith.muli %arg1, %c8_i32_73 : i32
    %232 = arith.addi %231, %c3_i32_72 : i32
    %233 = arith.index_cast %c3_i32_72 : i32 to index
    %c0_74 = arith.constant 0 : index
    %c0_75 = arith.constant 0 : index
    %234 = vector.load %arg14[%233, %c0_74, %c0_75] : memref<8x8x5xf32, #tpu.memory_space<vmem>>, vector<1x8x5xf32>
    %235 = vector.shape_cast %234 : vector<1x8x5xf32> to vector<8x5xf32>
    %236 = arith.index_cast %c3_i32_72 : i32 to index
    %c0_76 = arith.constant 0 : index
    %c0_77 = arith.constant 0 : index
    %237 = vector.load %arg4[%236, %c0_76, %c0_77] : memref<8x8x1xf32, #tpu.memory_space<vmem>>, vector<1x8x1xf32>
    %238 = vector.shape_cast %237 : vector<1x8x1xf32> to vector<8x1xf32>
    %c0_78 = arith.constant 0 : index
    %c0_79 = arith.constant 0 : index
    %239 = vector.load %arg13[%c0_78, %c0_79] : memref<8x5xf32, #tpu.memory_space<vmem>>, vector<8x5xf32>
    %240 = vector.extract_strided_slice %239 {offsets = [0, 0], sizes = [8, 1], strides = [1, 1]} : vector<8x5xf32> to vector<8x1xf32>
    %241 = vector.extract_strided_slice %17 {offsets = [0, 0], sizes = [1, 5], strides = [1, 1]} : vector<5x5xf32> to vector<1x5xf32>
    %242 = vector.broadcast %240 : vector<8x1xf32> to vector<8x5xf32>
    %243 = vector.broadcast %241 : vector<1x5xf32> to vector<8x5xf32>
    %244 = arith.addf %242, %243 : vector<8x5xf32>
    %245 = vector.extract_strided_slice %239 {offsets = [0, 1], sizes = [8, 1], strides = [1, 1]} : vector<8x5xf32> to vector<8x1xf32>
    %246 = vector.extract_strided_slice %17 {offsets = [1, 0], sizes = [1, 5], strides = [1, 1]} : vector<5x5xf32> to vector<1x5xf32>
    %247 = vector.broadcast %245 : vector<8x1xf32> to vector<8x5xf32>
    %248 = vector.broadcast %246 : vector<1x5xf32> to vector<8x5xf32>
    %249 = arith.addf %247, %248 : vector<8x5xf32>
    %250 = arith.cmpf ogt, %249, %244 : vector<8x5xf32>
    %251 = arith.select %250, %249, %244 : vector<8x5xi1>, vector<8x5xf32>
    %c1_i32_80 = arith.constant 1 : i32
    %252 = vector.broadcast %c1_i32_80 : i32 to vector<8x5xi32>
    %253 = arith.select %250, %252, %20 : vector<8x5xi1>, vector<8x5xi32>
    %254 = vector.extract_strided_slice %239 {offsets = [0, 2], sizes = [8, 1], strides = [1, 1]} : vector<8x5xf32> to vector<8x1xf32>
    %255 = vector.extract_strided_slice %17 {offsets = [2, 0], sizes = [1, 5], strides = [1, 1]} : vector<5x5xf32> to vector<1x5xf32>
    %256 = vector.broadcast %254 : vector<8x1xf32> to vector<8x5xf32>
    %257 = vector.broadcast %255 : vector<1x5xf32> to vector<8x5xf32>
    %258 = arith.addf %256, %257 : vector<8x5xf32>
    %259 = arith.cmpf ogt, %258, %251 : vector<8x5xf32>
    %260 = arith.select %259, %258, %251 : vector<8x5xi1>, vector<8x5xf32>
    %c2_i32_81 = arith.constant 2 : i32
    %261 = vector.broadcast %c2_i32_81 : i32 to vector<8x5xi32>
    %262 = arith.select %259, %261, %253 : vector<8x5xi1>, vector<8x5xi32>
    %263 = vector.extract_strided_slice %239 {offsets = [0, 3], sizes = [8, 1], strides = [1, 1]} : vector<8x5xf32> to vector<8x1xf32>
    %264 = vector.extract_strided_slice %17 {offsets = [3, 0], sizes = [1, 5], strides = [1, 1]} : vector<5x5xf32> to vector<1x5xf32>
    %265 = vector.broadcast %263 : vector<8x1xf32> to vector<8x5xf32>
    %266 = vector.broadcast %264 : vector<1x5xf32> to vector<8x5xf32>
    %267 = arith.addf %265, %266 : vector<8x5xf32>
    %268 = arith.cmpf ogt, %267, %260 : vector<8x5xf32>
    %269 = arith.select %268, %267, %260 : vector<8x5xi1>, vector<8x5xf32>
    %c3_i32_82 = arith.constant 3 : i32
    %270 = vector.broadcast %c3_i32_82 : i32 to vector<8x5xi32>
    %271 = arith.select %268, %270, %262 : vector<8x5xi1>, vector<8x5xi32>
    %272 = vector.extract_strided_slice %239 {offsets = [0, 4], sizes = [8, 1], strides = [1, 1]} : vector<8x5xf32> to vector<8x1xf32>
    %273 = vector.extract_strided_slice %17 {offsets = [4, 0], sizes = [1, 5], strides = [1, 1]} : vector<5x5xf32> to vector<1x5xf32>
    %274 = vector.broadcast %272 : vector<8x1xf32> to vector<8x5xf32>
    %275 = vector.broadcast %273 : vector<1x5xf32> to vector<8x5xf32>
    %276 = arith.addf %274, %275 : vector<8x5xf32>
    %277 = arith.cmpf ogt, %276, %269 : vector<8x5xf32>
    %278 = arith.select %277, %276, %269 : vector<8x5xi1>, vector<8x5xf32>
    %c4_i32_83 = arith.constant 4 : i32
    %279 = vector.broadcast %c4_i32_83 : i32 to vector<8x5xi32>
    %280 = arith.select %277, %279, %271 : vector<8x5xi1>, vector<8x5xi32>
    %cst_84 = arith.constant 0.000000e+00 : f32
    %281 = vector.broadcast %cst_84 : f32 to vector<8x1xf32>
    %282 = arith.cmpf ogt, %238, %281 : vector<8x1xf32>
    %c0_i32_85 = arith.constant 0 : i32
    %283 = arith.cmpi eq, %232, %c0_i32_85 : i32
    %284 = arith.addf %278, %235 : vector<8x5xf32>
    %285 = vector.broadcast %18 : vector<1x5xf32> to vector<8x5xf32>
    %286 = arith.addf %285, %235 : vector<8x5xf32>
    %287 = vector.shape_cast %282 : vector<8x1xi1> to vector<8x1xi1>
    %288 = vector.broadcast %287 : vector<8x1xi1> to vector<8x5xi1>
    %289 = arith.select %288, %284, %239 : vector<8x5xi1>, vector<8x5xf32>
    %290 = arith.select %283, %286, %289 : vector<8x5xf32>
    %true_86 = arith.constant true
    %291 = arith.xori %283, %true_86 : i1
    %292 = vector.broadcast %291 : i1 to vector<8x1xi1>
    %293 = arith.andi %292, %282 : vector<8x1xi1>
    %294 = vector.shape_cast %293 : vector<8x1xi1> to vector<8x1xi1>
    %295 = vector.broadcast %294 : vector<8x1xi1> to vector<8x5xi1>
    %296 = arith.select %295, %280, %19 : vector<8x5xi1>, vector<8x5xi32>
    %c0_87 = arith.constant 0 : index
    %c0_88 = arith.constant 0 : index
    %297 = vector.load %arg13[%c0_87, %c0_88] : memref<8x5xf32, #tpu.memory_space<vmem>>, vector<8x5xf32>
    tpu.vector_store %arg13[%c0_87, %c0_88], %290 {strides = array<i32>} : memref<8x5xf32, #tpu.memory_space<vmem>>, vector<8x5xf32>,
    %298 = vector.shape_cast %296 : vector<8x5xi32> to vector<1x8x5xi32>
    %299 = arith.index_cast %c3_i32_72 : i32 to index
    %c0_89 = arith.constant 0 : index
    %c0_90 = arith.constant 0 : index
    %300 = vector.load %arg11[%299, %c0_89, %c0_90] : memref<8x8x5xi32, #tpu.memory_space<vmem>>, vector<1x8x5xi32>
    tpu.vector_store %arg11[%299, %c0_89, %c0_90], %298 {strides = array<i32>} : memref<8x8x5xi32, #tpu.memory_space<vmem>>, vector<1x8x5xi32>,
    %c4_i32_91 = arith.constant 4 : i32
    %c8_i32_92 = arith.constant 8 : i32
    %301 = arith.muli %arg1, %c8_i32_92 : i32
    %302 = arith.addi %301, %c4_i32_91 : i32
    %303 = arith.index_cast %c4_i32_91 : i32 to index
    %c0_93 = arith.constant 0 : index
    %c0_94 = arith.constant 0 : index
    %304 = vector.load %arg14[%303, %c0_93, %c0_94] : memref<8x8x5xf32, #tpu.memory_space<vmem>>, vector<1x8x5xf32>
    %305 = vector.shape_cast %304 : vector<1x8x5xf32> to vector<8x5xf32>
    %306 = arith.index_cast %c4_i32_91 : i32 to index
    %c0_95 = arith.constant 0 : index
    %c0_96 = arith.constant 0 : index
    %307 = vector.load %arg4[%306, %c0_95, %c0_96] : memref<8x8x1xf32, #tpu.memory_space<vmem>>, vector<1x8x1xf32>
    %308 = vector.shape_cast %307 : vector<1x8x1xf32> to vector<8x1xf32>
    %c0_97 = arith.constant 0 : index
    %c0_98 = arith.constant 0 : index
    %309 = vector.load %arg13[%c0_97, %c0_98] : memref<8x5xf32, #tpu.memory_space<vmem>>, vector<8x5xf32>
    %310 = vector.extract_strided_slice %309 {offsets = [0, 0], sizes = [8, 1], strides = [1, 1]} : vector<8x5xf32> to vector<8x1xf32>
    %311 = vector.extract_strided_slice %17 {offsets = [0, 0], sizes = [1, 5], strides = [1, 1]} : vector<5x5xf32> to vector<1x5xf32>
    %312 = vector.broadcast %310 : vector<8x1xf32> to vector<8x5xf32>
    %313 = vector.broadcast %311 : vector<1x5xf32> to vector<8x5xf32>
    %314 = arith.addf %312, %313 : vector<8x5xf32>
    %315 = vector.extract_strided_slice %309 {offsets = [0, 1], sizes = [8, 1], strides = [1, 1]} : vector<8x5xf32> to vector<8x1xf32>
    %316 = vector.extract_strided_slice %17 {offsets = [1, 0], sizes = [1, 5], strides = [1, 1]} : vector<5x5xf32> to vector<1x5xf32>
    %317 = vector.broadcast %315 : vector<8x1xf32> to vector<8x5xf32>
    %318 = vector.broadcast %316 : vector<1x5xf32> to vector<8x5xf32>
    %319 = arith.addf %317, %318 : vector<8x5xf32>
    %320 = arith.cmpf ogt, %319, %314 : vector<8x5xf32>
    %321 = arith.select %320, %319, %314 : vector<8x5xi1>, vector<8x5xf32>
    %c1_i32_99 = arith.constant 1 : i32
    %322 = vector.broadcast %c1_i32_99 : i32 to vector<8x5xi32>
    %323 = arith.select %320, %322, %20 : vector<8x5xi1>, vector<8x5xi32>
    %324 = vector.extract_strided_slice %309 {offsets = [0, 2], sizes = [8, 1], strides = [1, 1]} : vector<8x5xf32> to vector<8x1xf32>
    %325 = vector.extract_strided_slice %17 {offsets = [2, 0], sizes = [1, 5], strides = [1, 1]} : vector<5x5xf32> to vector<1x5xf32>
    %326 = vector.broadcast %324 : vector<8x1xf32> to vector<8x5xf32>
    %327 = vector.broadcast %325 : vector<1x5xf32> to vector<8x5xf32>
    %328 = arith.addf %326, %327 : vector<8x5xf32>
    %329 = arith.cmpf ogt, %328, %321 : vector<8x5xf32>
    %330 = arith.select %329, %328, %321 : vector<8x5xi1>, vector<8x5xf32>
    %c2_i32_100 = arith.constant 2 : i32
    %331 = vector.broadcast %c2_i32_100 : i32 to vector<8x5xi32>
    %332 = arith.select %329, %331, %323 : vector<8x5xi1>, vector<8x5xi32>
    %333 = vector.extract_strided_slice %309 {offsets = [0, 3], sizes = [8, 1], strides = [1, 1]} : vector<8x5xf32> to vector<8x1xf32>
    %334 = vector.extract_strided_slice %17 {offsets = [3, 0], sizes = [1, 5], strides = [1, 1]} : vector<5x5xf32> to vector<1x5xf32>
    %335 = vector.broadcast %333 : vector<8x1xf32> to vector<8x5xf32>
    %336 = vector.broadcast %334 : vector<1x5xf32> to vector<8x5xf32>
    %337 = arith.addf %335, %336 : vector<8x5xf32>
    %338 = arith.cmpf ogt, %337, %330 : vector<8x5xf32>
    %339 = arith.select %338, %337, %330 : vector<8x5xi1>, vector<8x5xf32>
    %c3_i32_101 = arith.constant 3 : i32
    %340 = vector.broadcast %c3_i32_101 : i32 to vector<8x5xi32>
    %341 = arith.select %338, %340, %332 : vector<8x5xi1>, vector<8x5xi32>
    %342 = vector.extract_strided_slice %309 {offsets = [0, 4], sizes = [8, 1], strides = [1, 1]} : vector<8x5xf32> to vector<8x1xf32>
    %343 = vector.extract_strided_slice %17 {offsets = [4, 0], sizes = [1, 5], strides = [1, 1]} : vector<5x5xf32> to vector<1x5xf32>
    %344 = vector.broadcast %342 : vector<8x1xf32> to vector<8x5xf32>
    %345 = vector.broadcast %343 : vector<1x5xf32> to vector<8x5xf32>
    %346 = arith.addf %344, %345 : vector<8x5xf32>
    %347 = arith.cmpf ogt, %346, %339 : vector<8x5xf32>
    %348 = arith.select %347, %346, %339 : vector<8x5xi1>, vector<8x5xf32>
    %c4_i32_102 = arith.constant 4 : i32
    %349 = vector.broadcast %c4_i32_102 : i32 to vector<8x5xi32>
    %350 = arith.select %347, %349, %341 : vector<8x5xi1>, vector<8x5xi32>
    %cst_103 = arith.constant 0.000000e+00 : f32
    %351 = vector.broadcast %cst_103 : f32 to vector<8x1xf32>
    %352 = arith.cmpf ogt, %308, %351 : vector<8x1xf32>
    %c0_i32_104 = arith.constant 0 : i32
    %353 = arith.cmpi eq, %302, %c0_i32_104 : i32
    %354 = arith.addf %348, %305 : vector<8x5xf32>
    %355 = vector.broadcast %18 : vector<1x5xf32> to vector<8x5xf32>
    %356 = arith.addf %355, %305 : vector<8x5xf32>
    %357 = vector.shape_cast %352 : vector<8x1xi1> to vector<8x1xi1>
    %358 = vector.broadcast %357 : vector<8x1xi1> to vector<8x5xi1>
    %359 = arith.select %358, %354, %309 : vector<8x5xi1>, vector<8x5xf32>
    %360 = arith.select %353, %356, %359 : vector<8x5xf32>
    %true_105 = arith.constant true
    %361 = arith.xori %353, %true_105 : i1
    %362 = vector.broadcast %361 : i1 to vector<8x1xi1>
    %363 = arith.andi %362, %352 : vector<8x1xi1>
    %364 = vector.shape_cast %363 : vector<8x1xi1> to vector<8x1xi1>
    %365 = vector.broadcast %364 : vector<8x1xi1> to vector<8x5xi1>
    %366 = arith.select %365, %350, %19 : vector<8x5xi1>, vector<8x5xi32>
    %c0_106 = arith.constant 0 : index
    %c0_107 = arith.constant 0 : index
    %367 = vector.load %arg13[%c0_106, %c0_107] : memref<8x5xf32, #tpu.memory_space<vmem>>, vector<8x5xf32>
    tpu.vector_store %arg13[%c0_106, %c0_107], %360 {strides = array<i32>} : memref<8x5xf32, #tpu.memory_space<vmem>>, vector<8x5xf32>,
    %368 = vector.shape_cast %366 : vector<8x5xi32> to vector<1x8x5xi32>
    %369 = arith.index_cast %c4_i32_91 : i32 to index
    %c0_108 = arith.constant 0 : index
    %c0_109 = arith.constant 0 : index
    %370 = vector.load %arg11[%369, %c0_108, %c0_109] : memref<8x8x5xi32, #tpu.memory_space<vmem>>, vector<1x8x5xi32>
    tpu.vector_store %arg11[%369, %c0_108, %c0_109], %368 {strides = array<i32>} : memref<8x8x5xi32, #tpu.memory_space<vmem>>, vector<1x8x5xi32>,
    %c5_i32 = arith.constant 5 : i32
    %c8_i32_110 = arith.constant 8 : i32
    %371 = arith.muli %arg1, %c8_i32_110 : i32
    %372 = arith.addi %371, %c5_i32 : i32
    %373 = arith.index_cast %c5_i32 : i32 to index
    %c0_111 = arith.constant 0 : index
    %c0_112 = arith.constant 0 : index
    %374 = vector.load %arg14[%373, %c0_111, %c0_112] : memref<8x8x5xf32, #tpu.memory_space<vmem>>, vector<1x8x5xf32>
    %375 = vector.shape_cast %374 : vector<1x8x5xf32> to vector<8x5xf32>
    %376 = arith.index_cast %c5_i32 : i32 to index
    %c0_113 = arith.constant 0 : index
    %c0_114 = arith.constant 0 : index
    %377 = vector.load %arg4[%376, %c0_113, %c0_114] : memref<8x8x1xf32, #tpu.memory_space<vmem>>, vector<1x8x1xf32>
    %378 = vector.shape_cast %377 : vector<1x8x1xf32> to vector<8x1xf32>
    %c0_115 = arith.constant 0 : index
    %c0_116 = arith.constant 0 : index
    %379 = vector.load %arg13[%c0_115, %c0_116] : memref<8x5xf32, #tpu.memory_space<vmem>>, vector<8x5xf32>
    %380 = vector.extract_strided_slice %379 {offsets = [0, 0], sizes = [8, 1], strides = [1, 1]} : vector<8x5xf32> to vector<8x1xf32>
    %381 = vector.extract_strided_slice %17 {offsets = [0, 0], sizes = [1, 5], strides = [1, 1]} : vector<5x5xf32> to vector<1x5xf32>
    %382 = vector.broadcast %380 : vector<8x1xf32> to vector<8x5xf32>
    %383 = vector.broadcast %381 : vector<1x5xf32> to vector<8x5xf32>
    %384 = arith.addf %382, %383 : vector<8x5xf32>
    %385 = vector.extract_strided_slice %379 {offsets = [0, 1], sizes = [8, 1], strides = [1, 1]} : vector<8x5xf32> to vector<8x1xf32>
    %386 = vector.extract_strided_slice %17 {offsets = [1, 0], sizes = [1, 5], strides = [1, 1]} : vector<5x5xf32> to vector<1x5xf32>
    %387 = vector.broadcast %385 : vector<8x1xf32> to vector<8x5xf32>
    %388 = vector.broadcast %386 : vector<1x5xf32> to vector<8x5xf32>
    %389 = arith.addf %387, %388 : vector<8x5xf32>
    %390 = arith.cmpf ogt, %389, %384 : vector<8x5xf32>
    %391 = arith.select %390, %389, %384 : vector<8x5xi1>, vector<8x5xf32>
    %c1_i32_117 = arith.constant 1 : i32
    %392 = vector.broadcast %c1_i32_117 : i32 to vector<8x5xi32>
    %393 = arith.select %390, %392, %20 : vector<8x5xi1>, vector<8x5xi32>
    %394 = vector.extract_strided_slice %379 {offsets = [0, 2], sizes = [8, 1], strides = [1, 1]} : vector<8x5xf32> to vector<8x1xf32>
    %395 = vector.extract_strided_slice %17 {offsets = [2, 0], sizes = [1, 5], strides = [1, 1]} : vector<5x5xf32> to vector<1x5xf32>
    %396 = vector.broadcast %394 : vector<8x1xf32> to vector<8x5xf32>
    %397 = vector.broadcast %395 : vector<1x5xf32> to vector<8x5xf32>
    %398 = arith.addf %396, %397 : vector<8x5xf32>
    %399 = arith.cmpf ogt, %398, %391 : vector<8x5xf32>
    %400 = arith.select %399, %398, %391 : vector<8x5xi1>, vector<8x5xf32>
    %c2_i32_118 = arith.constant 2 : i32
    %401 = vector.broadcast %c2_i32_118 : i32 to vector<8x5xi32>
    %402 = arith.select %399, %401, %393 : vector<8x5xi1>, vector<8x5xi32>
    %403 = vector.extract_strided_slice %379 {offsets = [0, 3], sizes = [8, 1], strides = [1, 1]} : vector<8x5xf32> to vector<8x1xf32>
    %404 = vector.extract_strided_slice %17 {offsets = [3, 0], sizes = [1, 5], strides = [1, 1]} : vector<5x5xf32> to vector<1x5xf32>
    %405 = vector.broadcast %403 : vector<8x1xf32> to vector<8x5xf32>
    %406 = vector.broadcast %404 : vector<1x5xf32> to vector<8x5xf32>
    %407 = arith.addf %405, %406 : vector<8x5xf32>
    %408 = arith.cmpf ogt, %407, %400 : vector<8x5xf32>
    %409 = arith.select %408, %407, %400 : vector<8x5xi1>, vector<8x5xf32>
    %c3_i32_119 = arith.constant 3 : i32
    %410 = vector.broadcast %c3_i32_119 : i32 to vector<8x5xi32>
    %411 = arith.select %408, %410, %402 : vector<8x5xi1>, vector<8x5xi32>
    %412 = vector.extract_strided_slice %379 {offsets = [0, 4], sizes = [8, 1], strides = [1, 1]} : vector<8x5xf32> to vector<8x1xf32>
    %413 = vector.extract_strided_slice %17 {offsets = [4, 0], sizes = [1, 5], strides = [1, 1]} : vector<5x5xf32> to vector<1x5xf32>
    %414 = vector.broadcast %412 : vector<8x1xf32> to vector<8x5xf32>
    %415 = vector.broadcast %413 : vector<1x5xf32> to vector<8x5xf32>
    %416 = arith.addf %414, %415 : vector<8x5xf32>
    %417 = arith.cmpf ogt, %416, %409 : vector<8x5xf32>
    %418 = arith.select %417, %416, %409 : vector<8x5xi1>, vector<8x5xf32>
    %c4_i32_120 = arith.constant 4 : i32
    %419 = vector.broadcast %c4_i32_120 : i32 to vector<8x5xi32>
    %420 = arith.select %417, %419, %411 : vector<8x5xi1>, vector<8x5xi32>
    %cst_121 = arith.constant 0.000000e+00 : f32
    %421 = vector.broadcast %cst_121 : f32 to vector<8x1xf32>
    %422 = arith.cmpf ogt, %378, %421 : vector<8x1xf32>
    %c0_i32_122 = arith.constant 0 : i32
    %423 = arith.cmpi eq, %372, %c0_i32_122 : i32
    %424 = arith.addf %418, %375 : vector<8x5xf32>
    %425 = vector.broadcast %18 : vector<1x5xf32> to vector<8x5xf32>
    %426 = arith.addf %425, %375 : vector<8x5xf32>
    %427 = vector.shape_cast %422 : vector<8x1xi1> to vector<8x1xi1>
    %428 = vector.broadcast %427 : vector<8x1xi1> to vector<8x5xi1>
    %429 = arith.select %428, %424, %379 : vector<8x5xi1>, vector<8x5xf32>
    %430 = arith.select %423, %426, %429 : vector<8x5xf32>
    %true_123 = arith.constant true
    %431 = arith.xori %423, %true_123 : i1
    %432 = vector.broadcast %431 : i1 to vector<8x1xi1>
    %433 = arith.andi %432, %422 : vector<8x1xi1>
    %434 = vector.shape_cast %433 : vector<8x1xi1> to vector<8x1xi1>
    %435 = vector.broadcast %434 : vector<8x1xi1> to vector<8x5xi1>
    %436 = arith.select %435, %420, %19 : vector<8x5xi1>, vector<8x5xi32>
    %c0_124 = arith.constant 0 : index
    %c0_125 = arith.constant 0 : index
    %437 = vector.load %arg13[%c0_124, %c0_125] : memref<8x5xf32, #tpu.memory_space<vmem>>, vector<8x5xf32>
    tpu.vector_store %arg13[%c0_124, %c0_125], %430 {strides = array<i32>} : memref<8x5xf32, #tpu.memory_space<vmem>>, vector<8x5xf32>,
    %438 = vector.shape_cast %436 : vector<8x5xi32> to vector<1x8x5xi32>
    %439 = arith.index_cast %c5_i32 : i32 to index
    %c0_126 = arith.constant 0 : index
    %c0_127 = arith.constant 0 : index
    %440 = vector.load %arg11[%439, %c0_126, %c0_127] : memref<8x8x5xi32, #tpu.memory_space<vmem>>, vector<1x8x5xi32>
    tpu.vector_store %arg11[%439, %c0_126, %c0_127], %438 {strides = array<i32>} : memref<8x8x5xi32, #tpu.memory_space<vmem>>, vector<1x8x5xi32>,
    %c6_i32 = arith.constant 6 : i32
    %c8_i32_128 = arith.constant 8 : i32
    %441 = arith.muli %arg1, %c8_i32_128 : i32
    %442 = arith.addi %441, %c6_i32 : i32
    %443 = arith.index_cast %c6_i32 : i32 to index
    %c0_129 = arith.constant 0 : index
    %c0_130 = arith.constant 0 : index
    %444 = vector.load %arg14[%443, %c0_129, %c0_130] : memref<8x8x5xf32, #tpu.memory_space<vmem>>, vector<1x8x5xf32>
    %445 = vector.shape_cast %444 : vector<1x8x5xf32> to vector<8x5xf32>
    %446 = arith.index_cast %c6_i32 : i32 to index
    %c0_131 = arith.constant 0 : index
    %c0_132 = arith.constant 0 : index
    %447 = vector.load %arg4[%446, %c0_131, %c0_132] : memref<8x8x1xf32, #tpu.memory_space<vmem>>, vector<1x8x1xf32>
    %448 = vector.shape_cast %447 : vector<1x8x1xf32> to vector<8x1xf32>
    %c0_133 = arith.constant 0 : index
    %c0_134 = arith.constant 0 : index
    %449 = vector.load %arg13[%c0_133, %c0_134] : memref<8x5xf32, #tpu.memory_space<vmem>>, vector<8x5xf32>
    %450 = vector.extract_strided_slice %449 {offsets = [0, 0], sizes = [8, 1], strides = [1, 1]} : vector<8x5xf32> to vector<8x1xf32>
    %451 = vector.extract_strided_slice %17 {offsets = [0, 0], sizes = [1, 5], strides = [1, 1]} : vector<5x5xf32> to vector<1x5xf32>
    %452 = vector.broadcast %450 : vector<8x1xf32> to vector<8x5xf32>
    %453 = vector.broadcast %451 : vector<1x5xf32> to vector<8x5xf32>
    %454 = arith.addf %452, %453 : vector<8x5xf32>
    %455 = vector.extract_strided_slice %449 {offsets = [0, 1], sizes = [8, 1], strides = [1, 1]} : vector<8x5xf32> to vector<8x1xf32>
    %456 = vector.extract_strided_slice %17 {offsets = [1, 0], sizes = [1, 5], strides = [1, 1]} : vector<5x5xf32> to vector<1x5xf32>
    %457 = vector.broadcast %455 : vector<8x1xf32> to vector<8x5xf32>
    %458 = vector.broadcast %456 : vector<1x5xf32> to vector<8x5xf32>
    %459 = arith.addf %457, %458 : vector<8x5xf32>
    %460 = arith.cmpf ogt, %459, %454 : vector<8x5xf32>
    %461 = arith.select %460, %459, %454 : vector<8x5xi1>, vector<8x5xf32>
    %c1_i32_135 = arith.constant 1 : i32
    %462 = vector.broadcast %c1_i32_135 : i32 to vector<8x5xi32>
    %463 = arith.select %460, %462, %20 : vector<8x5xi1>, vector<8x5xi32>
    %464 = vector.extract_strided_slice %449 {offsets = [0, 2], sizes = [8, 1], strides = [1, 1]} : vector<8x5xf32> to vector<8x1xf32>
    %465 = vector.extract_strided_slice %17 {offsets = [2, 0], sizes = [1, 5], strides = [1, 1]} : vector<5x5xf32> to vector<1x5xf32>
    %466 = vector.broadcast %464 : vector<8x1xf32> to vector<8x5xf32>
    %467 = vector.broadcast %465 : vector<1x5xf32> to vector<8x5xf32>
    %468 = arith.addf %466, %467 : vector<8x5xf32>
    %469 = arith.cmpf ogt, %468, %461 : vector<8x5xf32>
    %470 = arith.select %469, %468, %461 : vector<8x5xi1>, vector<8x5xf32>
    %c2_i32_136 = arith.constant 2 : i32
    %471 = vector.broadcast %c2_i32_136 : i32 to vector<8x5xi32>
    %472 = arith.select %469, %471, %463 : vector<8x5xi1>, vector<8x5xi32>
    %473 = vector.extract_strided_slice %449 {offsets = [0, 3], sizes = [8, 1], strides = [1, 1]} : vector<8x5xf32> to vector<8x1xf32>
    %474 = vector.extract_strided_slice %17 {offsets = [3, 0], sizes = [1, 5], strides = [1, 1]} : vector<5x5xf32> to vector<1x5xf32>
    %475 = vector.broadcast %473 : vector<8x1xf32> to vector<8x5xf32>
    %476 = vector.broadcast %474 : vector<1x5xf32> to vector<8x5xf32>
    %477 = arith.addf %475, %476 : vector<8x5xf32>
    %478 = arith.cmpf ogt, %477, %470 : vector<8x5xf32>
    %479 = arith.select %478, %477, %470 : vector<8x5xi1>, vector<8x5xf32>
    %c3_i32_137 = arith.constant 3 : i32
    %480 = vector.broadcast %c3_i32_137 : i32 to vector<8x5xi32>
    %481 = arith.select %478, %480, %472 : vector<8x5xi1>, vector<8x5xi32>
    %482 = vector.extract_strided_slice %449 {offsets = [0, 4], sizes = [8, 1], strides = [1, 1]} : vector<8x5xf32> to vector<8x1xf32>
    %483 = vector.extract_strided_slice %17 {offsets = [4, 0], sizes = [1, 5], strides = [1, 1]} : vector<5x5xf32> to vector<1x5xf32>
    %484 = vector.broadcast %482 : vector<8x1xf32> to vector<8x5xf32>
    %485 = vector.broadcast %483 : vector<1x5xf32> to vector<8x5xf32>
    %486 = arith.addf %484, %485 : vector<8x5xf32>
    %487 = arith.cmpf ogt, %486, %479 : vector<8x5xf32>
    %488 = arith.select %487, %486, %479 : vector<8x5xi1>, vector<8x5xf32>
    %c4_i32_138 = arith.constant 4 : i32
    %489 = vector.broadcast %c4_i32_138 : i32 to vector<8x5xi32>
    %490 = arith.select %487, %489, %481 : vector<8x5xi1>, vector<8x5xi32>
    %cst_139 = arith.constant 0.000000e+00 : f32
    %491 = vector.broadcast %cst_139 : f32 to vector<8x1xf32>
    %492 = arith.cmpf ogt, %448, %491 : vector<8x1xf32>
    %c0_i32_140 = arith.constant 0 : i32
    %493 = arith.cmpi eq, %442, %c0_i32_140 : i32
    %494 = arith.addf %488, %445 : vector<8x5xf32>
    %495 = vector.broadcast %18 : vector<1x5xf32> to vector<8x5xf32>
    %496 = arith.addf %495, %445 : vector<8x5xf32>
    %497 = vector.shape_cast %492 : vector<8x1xi1> to vector<8x1xi1>
    %498 = vector.broadcast %497 : vector<8x1xi1> to vector<8x5xi1>
    %499 = arith.select %498, %494, %449 : vector<8x5xi1>, vector<8x5xf32>
    %500 = arith.select %493, %496, %499 : vector<8x5xf32>
    %true_141 = arith.constant true
    %501 = arith.xori %493, %true_141 : i1
    %502 = vector.broadcast %501 : i1 to vector<8x1xi1>
    %503 = arith.andi %502, %492 : vector<8x1xi1>
    %504 = vector.shape_cast %503 : vector<8x1xi1> to vector<8x1xi1>
    %505 = vector.broadcast %504 : vector<8x1xi1> to vector<8x5xi1>
    %506 = arith.select %505, %490, %19 : vector<8x5xi1>, vector<8x5xi32>
    %c0_142 = arith.constant 0 : index
    %c0_143 = arith.constant 0 : index
    %507 = vector.load %arg13[%c0_142, %c0_143] : memref<8x5xf32, #tpu.memory_space<vmem>>, vector<8x5xf32>
    tpu.vector_store %arg13[%c0_142, %c0_143], %500 {strides = array<i32>} : memref<8x5xf32, #tpu.memory_space<vmem>>, vector<8x5xf32>,
    %508 = vector.shape_cast %506 : vector<8x5xi32> to vector<1x8x5xi32>
    %509 = arith.index_cast %c6_i32 : i32 to index
    %c0_144 = arith.constant 0 : index
    %c0_145 = arith.constant 0 : index
    %510 = vector.load %arg11[%509, %c0_144, %c0_145] : memref<8x8x5xi32, #tpu.memory_space<vmem>>, vector<1x8x5xi32>
    tpu.vector_store %arg11[%509, %c0_144, %c0_145], %508 {strides = array<i32>} : memref<8x8x5xi32, #tpu.memory_space<vmem>>, vector<1x8x5xi32>,
    %c7_i32 = arith.constant 7 : i32
    %c8_i32_146 = arith.constant 8 : i32
    %511 = arith.muli %arg1, %c8_i32_146 : i32
    %512 = arith.addi %511, %c7_i32 : i32
    %513 = arith.index_cast %c7_i32 : i32 to index
    %c0_147 = arith.constant 0 : index
    %c0_148 = arith.constant 0 : index
    %514 = vector.load %arg14[%513, %c0_147, %c0_148] : memref<8x8x5xf32, #tpu.memory_space<vmem>>, vector<1x8x5xf32>
    %515 = vector.shape_cast %514 : vector<1x8x5xf32> to vector<8x5xf32>
    %516 = arith.index_cast %c7_i32 : i32 to index
    %c0_149 = arith.constant 0 : index
    %c0_150 = arith.constant 0 : index
    %517 = vector.load %arg4[%516, %c0_149, %c0_150] : memref<8x8x1xf32, #tpu.memory_space<vmem>>, vector<1x8x1xf32>
    %518 = vector.shape_cast %517 : vector<1x8x1xf32> to vector<8x1xf32>
    %c0_151 = arith.constant 0 : index
    %c0_152 = arith.constant 0 : index
    %519 = vector.load %arg13[%c0_151, %c0_152] : memref<8x5xf32, #tpu.memory_space<vmem>>, vector<8x5xf32>
    %520 = vector.extract_strided_slice %519 {offsets = [0, 0], sizes = [8, 1], strides = [1, 1]} : vector<8x5xf32> to vector<8x1xf32>
    %521 = vector.extract_strided_slice %17 {offsets = [0, 0], sizes = [1, 5], strides = [1, 1]} : vector<5x5xf32> to vector<1x5xf32>
    %522 = vector.broadcast %520 : vector<8x1xf32> to vector<8x5xf32>
    %523 = vector.broadcast %521 : vector<1x5xf32> to vector<8x5xf32>
    %524 = arith.addf %522, %523 : vector<8x5xf32>
    %525 = vector.extract_strided_slice %519 {offsets = [0, 1], sizes = [8, 1], strides = [1, 1]} : vector<8x5xf32> to vector<8x1xf32>
    %526 = vector.extract_strided_slice %17 {offsets = [1, 0], sizes = [1, 5], strides = [1, 1]} : vector<5x5xf32> to vector<1x5xf32>
    %527 = vector.broadcast %525 : vector<8x1xf32> to vector<8x5xf32>
    %528 = vector.broadcast %526 : vector<1x5xf32> to vector<8x5xf32>
    %529 = arith.addf %527, %528 : vector<8x5xf32>
    %530 = arith.cmpf ogt, %529, %524 : vector<8x5xf32>
    %531 = arith.select %530, %529, %524 : vector<8x5xi1>, vector<8x5xf32>
    %c1_i32_153 = arith.constant 1 : i32
    %532 = vector.broadcast %c1_i32_153 : i32 to vector<8x5xi32>
    %533 = arith.select %530, %532, %20 : vector<8x5xi1>, vector<8x5xi32>
    %534 = vector.extract_strided_slice %519 {offsets = [0, 2], sizes = [8, 1], strides = [1, 1]} : vector<8x5xf32> to vector<8x1xf32>
    %535 = vector.extract_strided_slice %17 {offsets = [2, 0], sizes = [1, 5], strides = [1, 1]} : vector<5x5xf32> to vector<1x5xf32>
    %536 = vector.broadcast %534 : vector<8x1xf32> to vector<8x5xf32>
    %537 = vector.broadcast %535 : vector<1x5xf32> to vector<8x5xf32>
    %538 = arith.addf %536, %537 : vector<8x5xf32>
    %539 = arith.cmpf ogt, %538, %531 : vector<8x5xf32>
    %540 = arith.select %539, %538, %531 : vector<8x5xi1>, vector<8x5xf32>
    %c2_i32_154 = arith.constant 2 : i32
    %541 = vector.broadcast %c2_i32_154 : i32 to vector<8x5xi32>
    %542 = arith.select %539, %541, %533 : vector<8x5xi1>, vector<8x5xi32>
    %543 = vector.extract_strided_slice %519 {offsets = [0, 3], sizes = [8, 1], strides = [1, 1]} : vector<8x5xf32> to vector<8x1xf32>
    %544 = vector.extract_strided_slice %17 {offsets = [3, 0], sizes = [1, 5], strides = [1, 1]} : vector<5x5xf32> to vector<1x5xf32>
    %545 = vector.broadcast %543 : vector<8x1xf32> to vector<8x5xf32>
    %546 = vector.broadcast %544 : vector<1x5xf32> to vector<8x5xf32>
    %547 = arith.addf %545, %546 : vector<8x5xf32>
    %548 = arith.cmpf ogt, %547, %540 : vector<8x5xf32>
    %549 = arith.select %548, %547, %540 : vector<8x5xi1>, vector<8x5xf32>
    %c3_i32_155 = arith.constant 3 : i32
    %550 = vector.broadcast %c3_i32_155 : i32 to vector<8x5xi32>
    %551 = arith.select %548, %550, %542 : vector<8x5xi1>, vector<8x5xi32>
    %552 = vector.extract_strided_slice %519 {offsets = [0, 4], sizes = [8, 1], strides = [1, 1]} : vector<8x5xf32> to vector<8x1xf32>
    %553 = vector.extract_strided_slice %17 {offsets = [4, 0], sizes = [1, 5], strides = [1, 1]} : vector<5x5xf32> to vector<1x5xf32>
    %554 = vector.broadcast %552 : vector<8x1xf32> to vector<8x5xf32>
    %555 = vector.broadcast %553 : vector<1x5xf32> to vector<8x5xf32>
    %556 = arith.addf %554, %555 : vector<8x5xf32>
    %557 = arith.cmpf ogt, %556, %549 : vector<8x5xf32>
    %558 = arith.select %557, %556, %549 : vector<8x5xi1>, vector<8x5xf32>
    %c4_i32_156 = arith.constant 4 : i32
    %559 = vector.broadcast %c4_i32_156 : i32 to vector<8x5xi32>
    %560 = arith.select %557, %559, %551 : vector<8x5xi1>, vector<8x5xi32>
    %cst_157 = arith.constant 0.000000e+00 : f32
    %561 = vector.broadcast %cst_157 : f32 to vector<8x1xf32>
    %562 = arith.cmpf ogt, %518, %561 : vector<8x1xf32>
    %c0_i32_158 = arith.constant 0 : i32
    %563 = arith.cmpi eq, %512, %c0_i32_158 : i32
    %564 = arith.addf %558, %515 : vector<8x5xf32>
    %565 = vector.broadcast %18 : vector<1x5xf32> to vector<8x5xf32>
    %566 = arith.addf %565, %515 : vector<8x5xf32>
    %567 = vector.shape_cast %562 : vector<8x1xi1> to vector<8x1xi1>
    %568 = vector.broadcast %567 : vector<8x1xi1> to vector<8x5xi1>
    %569 = arith.select %568, %564, %519 : vector<8x5xi1>, vector<8x5xf32>
    %570 = arith.select %563, %566, %569 : vector<8x5xf32>
    %true_159 = arith.constant true
    %571 = arith.xori %563, %true_159 : i1
    %572 = vector.broadcast %571 : i1 to vector<8x1xi1>
    %573 = arith.andi %572, %562 : vector<8x1xi1>
    %574 = vector.shape_cast %573 : vector<8x1xi1> to vector<8x1xi1>
    %575 = vector.broadcast %574 : vector<8x1xi1> to vector<8x5xi1>
    %576 = arith.select %575, %560, %19 : vector<8x5xi1>, vector<8x5xi32>
    %c0_160 = arith.constant 0 : index
    %c0_161 = arith.constant 0 : index
    %577 = vector.load %arg13[%c0_160, %c0_161] : memref<8x5xf32, #tpu.memory_space<vmem>>, vector<8x5xf32>
    tpu.vector_store %arg13[%c0_160, %c0_161], %570 {strides = array<i32>} : memref<8x5xf32, #tpu.memory_space<vmem>>, vector<8x5xf32>,
    %578 = vector.shape_cast %576 : vector<8x5xi32> to vector<1x8x5xi32>
    %579 = arith.index_cast %c7_i32 : i32 to index
    %c0_162 = arith.constant 0 : index
    %c0_163 = arith.constant 0 : index
    %580 = vector.load %arg11[%579, %c0_162, %c0_163] : memref<8x8x5xi32, #tpu.memory_space<vmem>>, vector<1x8x5xi32>
    tpu.vector_store %arg11[%579, %c0_162, %c0_163], %578 {strides = array<i32>} : memref<8x8x5xi32, #tpu.memory_space<vmem>>, vector<1x8x5xi32>,
    %c8_i32_164 = arith.constant 8 : i32
    %c0_i32_165 = arith.constant 0 : i32
    %581 = arith.cmpi eq, %arg1, %c0_i32_165 : i32
    %582 = arith.extui %581 : i1 to i32
    %c0_i32_166 = arith.constant 0 : i32
    %583 = arith.cmpi ne, %582, %c0_i32_166 : i32
    scf.if %583 {
      %c0_167 = arith.constant 0 : index
      %c0_168 = arith.constant 0 : index
      %584 = vector.load %arg13[%c0_167, %c0_168] : memref<8x5xf32, #tpu.memory_space<vmem>>, vector<8x5xf32>
      %c0_169 = arith.constant 0 : index
      %c0_170 = arith.constant 0 : index
      %585 = vector.load %arg10[%c0_169, %c0_170] : memref<1x5xf32, #tpu.memory_space<vmem>>, vector<1x5xf32>
      %586 = vector.broadcast %585 : vector<1x5xf32> to vector<8x5xf32>
      %587 = arith.addf %584, %586 : vector<8x5xf32>
      %c0_171 = arith.constant 0 : index
      %c0_172 = arith.constant 0 : index
      %588 = vector.load %arg12[%c0_171, %c0_172] : memref<8x5xf32, #tpu.memory_space<vmem>>, vector<8x5xf32>
      tpu.vector_store %arg12[%c0_171, %c0_172], %587 {strides = array<i32>} : memref<8x5xf32, #tpu.memory_space<vmem>>, vector<8x5xf32>,
    } else {
    }
    return
  }
  func.func @transform_0(%arg0: i32, %arg1: i32) -> (i32, i32, i32) {
    %c0_i32 = arith.constant 0 : i32
    %c0_i32_0 = arith.constant 0 : i32
    return %arg1, %arg0, %c0_i32 : i32, i32, i32
  }
  func.func @transform_1(%arg0: i32, %arg1: i32) -> (i32, i32, i32) {
    %c0_i32 = arith.constant 0 : i32
    %c0_i32_0 = arith.constant 0 : i32
    return %arg1, %arg0, %c0_i32 : i32, i32, i32
  }
  func.func @transform_2(%arg0: i32, %arg1: i32) -> (i32, i32, i32) {
    %c0_i32 = arith.constant 0 : i32
    %c0_i32_0 = arith.constant 0 : i32
    return %arg1, %arg0, %c0_i32 : i32, i32, i32
  }
  func.func @transform_3(%arg0: i32, %arg1: i32) -> (i32, i32) {
    %c0_i32 = arith.constant 0 : i32
    %c0_i32_0 = arith.constant 0 : i32
    %c0_i32_1 = arith.constant 0 : i32
    return %c0_i32, %c0_i32_0 : i32, i32
  }
  func.func @transform_4(%arg0: i32, %arg1: i32) -> (i32, i32) {
    %c0_i32 = arith.constant 0 : i32
    %c0_i32_0 = arith.constant 0 : i32
    %c0_i32_1 = arith.constant 0 : i32
    return %c0_i32, %c0_i32_0 : i32, i32
  }
  func.func @transform_5(%arg0: i32, %arg1: i32) -> (i32, i32) {
    %c0_i32 = arith.constant 0 : i32
    %c0_i32_0 = arith.constant 0 : i32
    %c0_i32_1 = arith.constant 0 : i32
    return %c0_i32, %c0_i32_0 : i32, i32
  }
  func.func @transform_6(%arg0: i32, %arg1: i32) -> (i32, i32) {
    %c0_i32 = arith.constant 0 : i32
    %c0_i32_0 = arith.constant 0 : i32
    %c0_i32_1 = arith.constant 0 : i32
    return %c0_i32, %c0_i32_0 : i32, i32
  }
  func.func @transform_7(%arg0: i32, %arg1: i32) -> (i32, i32) {
    %c0_i32 = arith.constant 0 : i32
    %c0_i32_0 = arith.constant 0 : i32
    %c0_i32_1 = arith.constant 0 : i32
    return %c0_i32, %c0_i32_0 : i32, i32
  }
  func.func @transform_8(%arg0: i32, %arg1: i32) -> (i32, i32) {
    %c0_i32 = arith.constant 0 : i32
    %c0_i32_0 = arith.constant 0 : i32
    %c0_i32_1 = arith.constant 0 : i32
    return %c0_i32, %c0_i32_0 : i32, i32
  }
  func.func @transform_9(%arg0: i32, %arg1: i32) -> (i32, i32, i32) {
    %c0_i32 = arith.constant 0 : i32
    %c0_i32_0 = arith.constant 0 : i32
    return %arg1, %arg0, %c0_i32 : i32, i32, i32
  }
  func.func @transform_10(%arg0: i32, %arg1: i32) -> (i32, i32) {
    %c0_i32 = arith.constant 0 : i32
    %c0_i32_0 = arith.constant 0 : i32
    return %arg0, %c0_i32 : i32, i32
  }
}

</mosaic_0001>

<bundles_post_ra>
// kernel: custom-call.4
= control target key start
LH: loop header
LB: loop body
LE: loop exit
PB: predicated region body
PF: predicated region fallthrough
CT: control target
= control target key end

     0   :  { %s6_s0 = inlined_call_operand.vmem [shape: s32[7,8], index: 0, kind: output, shape index: {}]  }

// kernel: lstm_crf_forward.3
= control target key start
LH: loop header
LB: loop body
LE: loop exit
PB: predicated region body
PF: predicated region fallthrough
CT: control target
= control target key end

     0   :  { %vm60_vm0 = vcmask 130048   ;;  %vm38_vm1 = vcmask 39936   ;;  %v904_v6 = vmov 0.0   ;;  %v905_v9 = vmov 4   ;;  %s1326_s4 = inlined_call_operand.vmem [shape: f32[16,5], index: 4, kind: input, shape index: {}]   ;;  %s1327_s3 = inlined_call_operand.vmem [shape: f32[16,5], index: 3, kind: input, shape index: {}]   ;;  %s1328_s1 = inlined_call_operand.vmem [shape: f32[8,8,16], index: 1, kind: input, shape index: {}]   ;;  %s1329_s0 = inlined_call_operand.vmem [shape: f32[8,8,16], index: 0, kind: input, shape index: {}]   ;;  %s1330_s5 = inlined_call_operand.vmem [shape: f32[1,5], index: 5, kind: input, shape index: {}]   ;;  %s1331_s7 = inlined_call_operand.vmem [shape: f32[1,5], index: 7, kind: input, shape index: {}]   ;;  %s1332_s2 = inlined_call_operand.vmem [shape: f32[8,8,1], index: 2, kind: input, shape index: {}]   ;;  %s1333_s6 = inlined_call_operand.vmem [shape: f32[5,5], index: 6, kind: input, shape index: {}]   ;;  %s1334_s9 = inlined_call_operand.vmem [shape: s32[8,8,5], index: 9, kind: output, shape index: {0}]   ;;  %s1335_s8 = inlined_call_operand.vmem [shape: f32[1,5], index: 8, kind: input, shape index: {}]   ;;  %s1336_s10 = inlined_call_operand.vmem [shape: f32[8,5], index: 10, kind: output, shape index: {1}]  }
   0x1   :  { %v59_v0 = vld [vmem:[%s1326_s4 + $0x8] sm:$0xff]  ;;  %v58_v2 = vld [vmem:[%s1326_s4] sm:$0xff]  ;;  %39 = vst.msk [vmem:[#allocation2] sm:$0xff] %vm38_vm1, %v904_v6  ;;  %859 = vset.pattern.permute.xlu2 %v905_v9  ;;  %v906_v10 = vmov 2   ;;  %v907_v11 = vmov 0   ;;  %v908_v24 = vmov 3  }
   0x2   :  { %v49_v1 = vld [vmem:[%s1327_s3 + $0x8] sm:$0xff]  ;;  %99 = vmatpush.msra.mxu0 %v59_v0  ;;  %v48_v3 = vld [vmem:[%s1327_s3] sm:$0xff]  ;;  %845 = vmatpush.msra.mxu2 %v59_v0  ;;  %v909_v25 = vmov 1   ;;  %v52_v30 = vld [vmem:[%s1328_s1 + $0x10] sm:$0xff] }
   0x3   :  { %164 = vmatpush.msra.mxu1 %v49_v1  ;;  %v50_v4 = vld [vmem:[%s1328_s1] sm:$0xff]  ;;  %847 = vmatpush.msra.mxu3 %v49_v1  ;;  %v51_v7 = vld [vmem:[%s1328_s1 + $0x8] sm:$0xff]  ;;  %v42_v31 = vld [vmem:[%s1329_s0 + $0x10] sm:$0xff] }
   0x4   :  { %v40_v5 = vld [vmem:[%s1329_s0] sm:$0xff]  ;;  %100 = vmatpush.msra.mxu0 %v58_v2  ;;  %846 = vmatpush.msra.mxu2 %v58_v2  ;;  %v41_v8 = vld [vmem:[%s1329_s0 + $0x8] sm:$0xff]  ;;  %v833_v61 = vld [vmem:[%s1332_s2 + $0x10] sm:$0xff] }
   0x5   :  { %165 = vmatpush.msra.mxu1 %v48_v3  ;;  %815 = vmatmul.msk.f32.vlgmr.msra.gmra.mxu0 %vm60_vm0, %v50_v4  ;;  %v1000_v12 = vld [vmem:[%s1330_s5] ss:$0 sm:$0xff]  ;;  %v831_v22 = vld [vmem:[%s1332_s2 + $0x8] sm:$0xff]  ;;  %vm409_vm8 = vcmp.gt.f32.partialorder %v833_v61, 0.0  ;;  %v43_v4 = vld [vmem:[%s1329_s0 + $0x18] sm:$0xff] }
   0x6   :  { %823 = vmatmul.msk.f32.vlgmr.msra.gmra.mxu1 %vm60_vm0, %v40_v5  ;;  %848 = vmatpush.msra.mxu3 %v48_v3  ;;  %v902_v17 = vld [vmem:[%s1331_s7] ss:$0 sm:$0xff]  ;;  %vm337_vm2 = vcmp.gt.f32.partialorder %v831_v22, 0.0  ;;  %v1062_v62 = vsel %vm409_vm8, 1, %v907_v11  ;;  %v53_v3 = vld [vmem:[%s1328_s1 + $0x18] sm:$0xff] }
   0x7   :  { %857 = vset.pattern.permute.xlu1 %v906_v10  ;;  %855 = vset.pattern.permute.xlu0 %v907_v11  ;;  %v1014_v23 = vsel %vm337_vm2, 1, %v907_v11  ;;  %v212_v34 = vld [vmem:[%s1333_s6] sm:$0x1f] }
   0x8   :  { %v1007_v19 = vld [vmem:[#allocation2] sm:$0xff]  ;;  %v1036_v35 = vperm.slane %v212_v34, 0  ;;  %v1038_v36 = vperm.slane %v212_v34, 1  ;;  %v1040_v38 = vperm.slane %v212_v34, 2  ;;  %v1043_v41 = vperm.slane %v212_v34, 3 }
   0x9   :  { %v1046_v44 = vperm.slane %v212_v34, 4 }
   0xd   :  { %816 = vmatmul.msk.f32.gmra.mxu0 %vm60_vm0, %v51_v7 }
   0xe   :  { %824 = vmatmul.msk.f32.gmra.mxu1 %vm60_vm0, %v41_v8 }
  0x15   :  { %817 = vmatmul.msk.f32.gmra.mxu0 %vm60_vm0, %v52_v30 }
  0x16   :  { %825 = vmatmul.msk.f32.gmra.mxu1 %vm60_vm0, %v42_v31 }
  0x1d   :  { %818 = vmatmul.msk.f32.gmra.mxu0 %vm60_vm0, %v53_v3 }
  0x1e   :  { %826 = vmatmul.msk.f32.gmra.mxu1 %vm60_vm0, %v43_v4 }
  0x82   :  { %v102_v13 = vpop.f32.mrf.mxu0 }
  0x83   :  { %v167_v14 = vpop.f32.mrf.mxu1 }
  0x84   :  { %v168_v15 = vadd.f32 %v167_v14, %v102_v13 }
  0x86   :  { %v195_v16 = vadd.f32 %v1000_v12, %v168_v15 }
  0x88   :  { %204 = vst.msk [vmem:[#allocation3] sm:$0xff] %vm38_vm1, %v195_v16 }
  0x8a   :  { %v105_v26 = vpop.f32.mrf.mxu0 }
  0x8b   :  { %v170_v27 = vpop.f32.mrf.mxu1 }
  0x8c   :  { %v171_v28 = vadd.f32 %v170_v27, %v105_v26 }
  0x8e   :  { %v196_v29 = vadd.f32 %v1000_v12, %v171_v28 }
  0x8f   :  { %v217_v18 = vld [vmem:[#allocation3] sm:$0xff] }
  0x90   :  { %v269_v20 = vadd.f32 %v902_v17, %v217_v18  ;;  %205 = vst.msk [vmem:[#allocation3 + $0x8] sm:$0xff] %vm38_vm1, %v196_v29 }
  0x92   :  { %291 = vst.msk [vmem:[#allocation2] sm:$0xff] %vm38_vm1, %v269_v20  ;;  %v108_v63 = vpop.f32.mrf.mxu0 }
  0x93   :  { %v173_v0 = vpop.f32.mrf.mxu1 }
  0x94   :  { %v174_v1 = vadd.f32 %v173_v0, %v108_v63 }
  0x96   :  { %v197_v2 = vadd.f32 %v1000_v12, %v174_v1 }
  0x97   :  { %v295_v55 = vld [vmem:[#allocation3 + $0x8] sm:$0xff] }
  0x98   :  { %206 = vst.msk [vmem:[#allocation3 + $0x10] sm:$0xff] %vm38_vm1, %v197_v2 }
  0x99   :  { %v298_v21 = vld [vmem:[#allocation2] sm:$0xff] }
  0x9a   :  { %330 = vperm.xlu2 %859, %v298_v21   ;;  %314 = vperm.xlu1 %857, %v298_v21  }
  0x9b   :  { %301 = vperm.xlu0 %855, %v298_v21  }
  0x9f   :  { %v367_v31 = vld [vmem:[#allocation3 + $0x10] sm:$0xff] }
  0xa2   :  { %858 = vset.pattern.permute.xlu1 %v908_v24  ;;  %860 = vset.pattern.permute.xlu2 %v907_v11 }
  0xa3   :  { %856 = vset.pattern.permute.xlu0 %v909_v25  ;;  %322 = vperm.xlu1 %858, %v298_v21  }
  0xa4   :  { %306 = vperm.xlu0 %856, %v298_v21   ;;  %343 = vperm.xlu2 %860, %v1014_v23  }
  0xab   :  { %861 = vset.pattern.permute.xlu1 %v907_v11 }
  0xac   :  { %862 = vset.pattern.permute.xlu2 %v909_v25  ;;  %863 = vset.pattern.permute.xlu0 %v906_v10 }
  0xf4   :  { %v331_v37 = vpop.permute.xlu2 %330 }
  0xf5   :  { %v333_v51 = vadd.f32 %v331_v37, %v1046_v44 }
  0xfe   :  { %v344_v52 = vpop.permute.xlu2 %343 }
  0xff   :  { %vm345_vm7 = vcmp.eq.s32.totalorder %v344_v52, 1 }
 0x10c   :  { %v315_v33 = vpop.permute.xlu1 %314 }
 0x10d   :  { %v302_v32 = vpop.permute.xlu0 %301  ;;  %v317_v45 = vadd.f32 %v315_v33, %v1040_v38 }
 0x10e   :  { %v304_v40 = vadd.f32 %v302_v32, %v1036_v35 }
 0x115   :  { %v323_v43 = vpop.permute.xlu1 %322 }
 0x116   :  { %v307_v39 = vpop.permute.xlu0 %306  ;;  %v325_v48 = vadd.f32 %v323_v43, %v1043_v41  ;;  %v176_v43 = vpop.f32.mrf.mxu1 }
 0x117   :  { %v309_v42 = vadd.f32 %v307_v39, %v1038_v36  ;;  %v835_v39 = vld [vmem:[%s1332_s2 + $0x18] sm:$0xff] }
 0x118   :  { %vm481_vm14 = vcmp.gt.f32.partialorder %v835_v39, 0.0 }
 0x119   :  { %vm310_vm3 = vcmp.gt.f32.partialorder %v309_v42, %v304_v40 }
 0x11a   :  { %v311_v46 = vsel %vm310_vm3, %v309_v42, %v304_v40  ;;  %v312_v47 = vsel %vm310_vm3, 1, %v907_v11  ;;  %v1094_v40 = vsel %vm481_vm14, 1, %v907_v11  ;;  %v111_v42 = vpop.f32.mrf.mxu0 }
 0x11b   :  { %vm318_vm4 = vcmp.gt.f32.partialorder %v317_v45, %v311_v46 }
 0x11c   :  { %v319_v49 = vsel %vm318_vm4, %v317_v45, %v311_v46  ;;  %v320_v50 = vsel %vm318_vm4, 2, %v312_v47  ;;  %v177_v45 = vadd.f32 %v176_v43, %v111_v42  ;;  %v54_v47 = vld [vmem:[%s1328_s1 + $0x20] sm:$0xff] }
 0x11d   :  { %vm326_vm5 = vcmp.gt.f32.partialorder %v325_v48, %v319_v49  ;;  %819 = vmatmul.msk.f32.vlgmr.msra.gmra.mxu2 %vm60_vm0, %v54_v47 }
 0x11e   :  { %v327_v53 = vsel %vm326_vm5, %v325_v48, %v319_v49  ;;  %v328_v54 = vsel %vm326_vm5, 3, %v320_v50  ;;  %v198_v46 = vadd.f32 %v1000_v12, %v177_v45  ;;  %v44_v48 = vld [vmem:[%s1329_s0 + $0x20] sm:$0xff] }
 0x11f   :  { %vm334_vm6 = vcmp.gt.f32.partialorder %v333_v51, %v327_v53  ;;  %827 = vmatmul.msk.f32.vlgmr.msra.gmra.mxu3 %vm60_vm0, %v44_v48 }
 0x120   :  { %v335_v56 = vsel %vm334_vm6, %v333_v51, %v327_v53  ;;  %v1052_v57 = vsel %vm334_vm6, 4, %v328_v54  ;;  %207 = vst.msk [vmem:[#allocation3 + $0x18] sm:$0xff] %vm38_vm1, %v198_v46 }
 0x121   :  { %v339_v58 = vadd.f32 %v335_v56, %v295_v55 }
 0x123   :  { %v346_v59 = vsel %vm345_vm7, %v339_v58, %v298_v21 }
 0x124   :  { %362 = vst.msk [vmem:[#allocation2] sm:$0xff] %vm38_vm1, %v346_v59 }
 0x127   :  { %v439_v3 = vld [vmem:[#allocation3 + $0x18] sm:$0xff] }
 0x12b   :  { %v370_v60 = vld [vmem:[#allocation2] sm:$0xff] }
 0x12c   :  { %386 = vperm.xlu0 %863, %v370_v60   ;;  %378 = vperm.xlu2 %862, %v370_v60  }
 0x12d   :  { %373 = vperm.xlu1 %861, %v370_v60  }
 0x134   :  { %865 = vset.pattern.permute.xlu2 %v905_v9  ;;  %868 = vset.pattern.permute.xlu0 %v909_v25 }
 0x135   :  { %864 = vset.pattern.permute.xlu1 %v908_v24  ;;  %402 = vperm.xlu2 %865, %v370_v60  }
 0x136   :  { %394 = vperm.xlu1 %864, %v370_v60  }
 0x13d   :  { %867 = vset.pattern.permute.xlu2 %v907_v11 }
 0x13e   :  { %866 = vset.pattern.permute.xlu1 %v907_v11 }
 0x13f   :  { %415 = vperm.xlu1 %866, %v1062_v62  }
 0x147   :  { %869 = vset.pattern.permute.xlu1 %v906_v10 }
 0x186   :  { %v379_v5 = vpop.permute.xlu2 %378 }
 0x187   :  { %v381_v8 = vadd.f32 %v379_v5, %v1038_v36 }
 0x18f   :  { %v403_v18 = vpop.permute.xlu2 %402 }
 0x190   :  { %v405_v26 = vadd.f32 %v403_v18, %v1046_v44 }
 0x19e   :  { %v387_v6 = vpop.permute.xlu0 %386 }
 0x19f   :  { %v374_v7 = vpop.permute.xlu1 %373  ;;  %v389_v14 = vadd.f32 %v387_v6, %v1040_v38 }
 0x1a0   :  { %v376_v13 = vadd.f32 %v374_v7, %v1036_v35 }
 0x1a2   :  { %vm382_vm9 = vcmp.gt.f32.partialorder %v381_v8, %v376_v13 }
 0x1a3   :  { %v383_v15 = vsel %vm382_vm9, %v381_v8, %v376_v13  ;;  %v384_v16 = vsel %vm382_vm9, 1, %v907_v11 }
 0x1a4   :  { %vm390_vm10 = vcmp.gt.f32.partialorder %v389_v14, %v383_v15 }
 0x1a5   :  { %v392_v17 = vsel %vm390_vm10, 2, %v384_v16  ;;  %v391_v22 = vsel %vm390_vm10, %v389_v14, %v383_v15  ;;  %v837_v14 = vld [vmem:[%s1332_s2 + $0x20] sm:$0xff]  ;;  %v114_v16 = vpop.f32.mrf.mxu2 }
 0x1a6   :  { %vm553_vm6 = vcmp.gt.f32.partialorder %v837_v14, 0.0 }
 0x1a7   :  { %v1123_v15 = vsel %vm553_vm6, 1, %v907_v11 }
 0x1a8   :  { %v395_v20 = vpop.permute.xlu1 %394 }
 0x1a9   :  { %v397_v21 = vadd.f32 %v395_v20, %v1043_v41 }
 0x1ab   :  { %vm398_vm11 = vcmp.gt.f32.partialorder %v397_v21, %v391_v22 }
 0x1ac   :  { %v399_v27 = vsel %vm398_vm11, %v397_v21, %v391_v22  ;;  %v400_v28 = vsel %vm398_vm11, 3, %v392_v17  ;;  %v179_v17 = vpop.f32.mrf.mxu3  ;;  %v55_v21 = vld [vmem:[%s1328_s1 + $0x28] sm:$0xff] }
 0x1ad   :  { %vm406_vm12 = vcmp.gt.f32.partialorder %v405_v26, %v399_v27  ;;  %v180_v18 = vadd.f32 %v179_v17, %v114_v16  ;;  %v45_v22 = vld [vmem:[%s1329_s0 + $0x28] sm:$0xff]  ;;  %820 = vmatmul.msk.f32.gmra.mxu2 %vm60_vm0, %v55_v21 }
 0x1ae   :  { %v407_v29 = vsel %vm406_vm12, %v405_v26, %v399_v27  ;;  %v1084_v30 = vsel %vm406_vm12, 4, %v400_v28  ;;  %828 = vmatmul.msk.f32.gmra.mxu3 %vm60_vm0, %v45_v22 }
 0x1af   :  { %v411_v32 = vadd.f32 %v407_v29, %v367_v31  ;;  %v199_v20 = vadd.f32 %v1000_v12, %v180_v18 }
 0x1b1   :  { %v416_v33 = vpop.permute.xlu1 %415  ;;  %208 = vst.msk [vmem:[#allocation3 + $0x20] sm:$0xff] %vm38_vm1, %v199_v20 }
 0x1b2   :  { %vm417_vm13 = vcmp.eq.s32.totalorder %v416_v33, 1 }
 0x1b3   :  { %v418_v34 = vsel %vm417_vm13, %v411_v32, %v370_v60 }
 0x1b4   :  { %434 = vst.msk [vmem:[#allocation2] sm:$0xff] %vm38_vm1, %v418_v34 }
 0x1b8   :  { %v511_v47 = vld [vmem:[#allocation3 + $0x20] sm:$0xff] }
 0x1bb   :  { %v442_v37 = vld [vmem:[#allocation2] sm:$0xff] }
 0x1bc   :  { %458 = vperm.xlu1 %869, %v442_v37   ;;  %450 = vperm.xlu0 %868, %v442_v37  }
 0x1bd   :  { %445 = vperm.xlu2 %867, %v442_v37  }
 0x1c4   :  { %871 = vset.pattern.permute.xlu1 %v905_v9  ;;  %873 = vset.pattern.permute.xlu0 %v907_v11 }
 0x1c5   :  { %870 = vset.pattern.permute.xlu2 %v908_v24  ;;  %474 = vperm.xlu1 %871, %v442_v37  }
 0x1c6   :  { %466 = vperm.xlu2 %870, %v442_v37  }
 0x1cd   :  { %874 = vset.pattern.permute.xlu1 %v909_v25 }
 0x1ce   :  { %872 = vset.pattern.permute.xlu2 %v907_v11 }
 0x1cf   :  { %487 = vperm.xlu2 %872, %v1094_v40  }
 0x1d7   :  { %875 = vset.pattern.permute.xlu2 %v906_v10 }
 0x217   :  { %v446_v49 = vpop.permute.xlu2 %445 }
 0x218   :  { %v448_v52 = vadd.f32 %v446_v49, %v1036_v35 }
 0x220   :  { %v467_v54 = vpop.permute.xlu2 %466 }
 0x221   :  { %v469_v59 = vadd.f32 %v467_v54, %v1043_v41 }
 0x229   :  { %v488_v2 = vpop.permute.xlu2 %487 }
 0x22a   :  { %vm489_vm5 = vcmp.eq.s32.totalorder %v488_v2, 1 }
 0x22e   :  { %v459_v50 = vpop.permute.xlu1 %458  ;;  %v451_v51 = vpop.permute.xlu0 %450 }
 0x22f   :  { %v453_v53 = vadd.f32 %v451_v51, %v1038_v36  ;;  %v461_v55 = vadd.f32 %v459_v50, %v1040_v38 }
 0x231   :  { %vm454_vm15 = vcmp.gt.f32.partialorder %v453_v53, %v448_v52 }
 0x232   :  { %v455_v56 = vsel %vm454_vm15, %v453_v53, %v448_v52  ;;  %v456_v58 = vsel %vm454_vm15, 1, %v907_v11 }
 0x233   :  { %vm462_vm2 = vcmp.gt.f32.partialorder %v461_v55, %v455_v56 }
 0x234   :  { %v464_v60 = vsel %vm462_vm2, 2, %v456_v58  ;;  %v463_v61 = vsel %vm462_vm2, %v461_v55, %v455_v56  ;;  %v839_v56 = vld [vmem:[%s1332_s2 + $0x28] sm:$0xff] }
 0x235   :  { %vm470_vm3 = vcmp.gt.f32.partialorder %v469_v59, %v463_v61  ;;  %vm625_vm12 = vcmp.gt.f32.partialorder %v839_v56, 0.0  ;;  %v47_v56 = vld [vmem:[%s1329_s0 + $0x38] sm:$0xff] }
 0x236   :  { %v472_v63 = vsel %vm470_vm3, 3, %v464_v60  ;;  %v471_v4 = vsel %vm470_vm3, %v469_v59, %v463_v61  ;;  %v1160_v58 = vsel %vm625_vm12, 1, %v907_v11  ;;  %v117_v59 = vpop.f32.mrf.mxu2  ;;  %v182_v60 = vpop.f32.mrf.mxu3 }
 0x237   :  { %v475_v0 = vpop.permute.xlu1 %474  ;;  %v183_v61 = vadd.f32 %v182_v60, %v117_v59 }
 0x238   :  { %v477_v1 = vadd.f32 %v475_v0, %v1046_v44  ;;  %v56_v0 = vld [vmem:[%s1328_s1 + $0x30] sm:$0xff] }
 0x239   :  { %821 = vmatmul.msk.f32.gmra.mxu2 %vm60_vm0, %v56_v0  ;;  %v214_v0 = vlaneseq }
 0x23a   :  { %vm478_vm4 = vcmp.gt.f32.partialorder %v477_v1, %v471_v4 }
 0x23b   :  { %v479_v5 = vsel %vm478_vm4, %v477_v1, %v471_v4  ;;  %v1116_v6 = vsel %vm478_vm4, 4, %v472_v63  ;;  %v200_v63 = vadd.f32 %v1000_v12, %v183_v61  ;;  %v46_v1 = vld [vmem:[%s1329_s0 + $0x30] sm:$0xff] }
 0x23c   :  { %v483_v7 = vadd.f32 %v479_v5, %v439_v3  ;;  %829 = vmatmul.msk.f32.gmra.mxu3 %vm60_vm0, %v46_v1 }
 0x23d   :  { %209 = vst.msk [vmem:[#allocation3 + $0x28] sm:$0xff] %vm38_vm1, %v200_v63 }
 0x23e   :  { %v490_v8 = vsel %vm489_vm5, %v483_v7, %v442_v37 }
 0x23f   :  { %506 = vst.msk [vmem:[#allocation2] sm:$0xff] %vm38_vm1, %v490_v8 }
 0x244   :  { %830 = vmatmul.msk.f32.gmra.mxu3 %vm60_vm0, %v47_v56 }
 0x246   :  { %v514_v13 = vld [vmem:[#allocation2] sm:$0xff] }
 0x247   :  { %530 = vperm.xlu2 %875, %v514_v13   ;;  %522 = vperm.xlu1 %874, %v514_v13  }
 0x248   :  { %517 = vperm.xlu0 %873, %v514_v13  }
 0x24f   :  { %877 = vset.pattern.permute.xlu2 %v905_v9  ;;  %876 = vset.pattern.permute.xlu1 %v908_v24 }
 0x250   :  { %559 = vperm.xlu0 %873, %v1123_v15   ;;  %546 = vperm.xlu2 %877, %v514_v13  }
 0x251   :  { %538 = vperm.xlu1 %876, %v514_v13  }
 0x258   :  { %879 = vset.pattern.permute.xlu2 %v907_v11  ;;  %880 = vset.pattern.permute.xlu0 %v909_v25 }
 0x259   :  { %878 = vset.pattern.permute.xlu1 %v907_v11 }
 0x25a   :  { %222 = vperm.xlu1 %878, %v1007_v19  }
 0x262   :  { %881 = vset.pattern.permute.xlu1 %v906_v10 }
 0x2a1   :  { %v531_v26 = vpop.permute.xlu2 %530 }
 0x2a2   :  { %v533_v32 = vadd.f32 %v531_v26, %v1040_v38 }
 0x2aa   :  { %v547_v39 = vpop.permute.xlu2 %546 }
 0x2ab   :  { %v549_v46 = vadd.f32 %v547_v39, %v1046_v44  ;;  %v841_v39 = vld [vmem:[%s1332_s2 + $0x30] sm:$0xff] }
 0x2ac   :  { %vm697_vm4 = vcmp.gt.f32.partialorder %v841_v39, 0.0 }
 0x2b9   :  { %v523_v27 = vpop.permute.xlu1 %522 }
 0x2ba   :  { %v525_v28 = vadd.f32 %v523_v27, %v1038_v36  ;;  %v518_v29 = vpop.permute.xlu0 %517  ;;  %v583_v27 = vld [vmem:[#allocation3 + $0x28] sm:$0xff] }
 0x2bb   :  { %v520_v31 = vadd.f32 %v518_v29, %v1036_v35 }
 0x2bd   :  { %vm526_vm7 = vcmp.gt.f32.partialorder %v525_v28, %v520_v31 }
 0x2be   :  { %v527_v33 = vsel %vm526_vm7, %v525_v28, %v520_v31  ;;  %v528_v34 = vsel %vm526_vm7, 1, %v907_v11 }
 0x2bf   :  { %vm534_vm8 = vcmp.gt.f32.partialorder %v533_v32, %v527_v33 }
 0x2c0   :  { %v536_v37 = vsel %vm534_vm8, 2, %v528_v34  ;;  %v535_v45 = vsel %vm534_vm8, %v533_v32, %v527_v33 }
 0x2c2   :  { %v560_v50 = vpop.permute.xlu0 %559 }
 0x2c3   :  { %v539_v42 = vpop.permute.xlu1 %538  ;;  %vm561_vm11 = vcmp.eq.s32.totalorder %v560_v50, 1 }
 0x2c4   :  { %v541_v43 = vadd.f32 %v539_v42, %v1043_v41  ;;  %v1204_v42 = vsel %vm697_vm4, 1, %v907_v11 }
 0x2c6   :  { %vm542_vm9 = vcmp.gt.f32.partialorder %v541_v43, %v535_v45 }
 0x2c7   :  { %v543_v48 = vsel %vm542_vm9, %v541_v43, %v535_v45  ;;  %v544_v49 = vsel %vm542_vm9, 3, %v536_v37 }
 0x2c8   :  { %vm550_vm10 = vcmp.gt.f32.partialorder %v549_v46, %v543_v48 }
 0x2c9   :  { %v551_v51 = vsel %vm550_vm10, %v549_v46, %v543_v48  ;;  %v1149_v52 = vsel %vm550_vm10, 4, %v544_v49  ;;  %v120_v48 = vpop.f32.mrf.mxu2  ;;  %v185_v49 = vpop.f32.mrf.mxu3 }
 0x2ca   :  { %v555_v53 = vadd.f32 %v551_v51, %v511_v47  ;;  %v186_v50 = vadd.f32 %v185_v49, %v120_v48 }
 0x2cc   :  { %v562_v54 = vsel %vm561_vm11, %v555_v53, %v514_v13 }
 0x2cd   :  { %578 = vst.msk [vmem:[#allocation2] sm:$0xff] %vm38_vm1, %v562_v54 }
 0x2d4   :  { %v586_v55 = vld [vmem:[#allocation2] sm:$0xff] }
 0x2d5   :  { %602 = vperm.xlu1 %881, %v586_v55   ;;  %594 = vperm.xlu0 %880, %v586_v55  }
 0x2d6   :  { %589 = vperm.xlu2 %879, %v586_v55  }
 0x2dd   :  { %883 = vset.pattern.permute.xlu1 %v905_v9  ;;  %228 = vperm.xlu0 %880, %v1007_v19  }
 0x2de   :  { %882 = vset.pattern.permute.xlu2 %v908_v24  ;;  %618 = vperm.xlu1 %883, %v586_v55  }
 0x2df   :  { %610 = vperm.xlu2 %882, %v586_v55  }
 0x2e5   :  { %887 = vset.pattern.permute.xlu0 %v905_v9 }
 0x2e6   :  { %885 = vset.pattern.permute.xlu1 %v906_v10  ;;  %255 = vperm.xlu0 %887, %v1007_v19  }
 0x2e7   :  { %237 = vperm.xlu1 %885, %v1007_v19   ;;  %884 = vset.pattern.permute.xlu2 %v907_v11 }
 0x2e8   :  { %631 = vperm.xlu2 %884, %v1160_v58  }
 0x2ef   :  { %888 = vset.pattern.permute.xlu1 %v907_v11 }
 0x2f0   :  { %886 = vset.pattern.permute.xlu2 %v908_v24 }
 0x2f1   :  { %246 = vperm.xlu2 %886, %v1007_v19   ;;  %v223_v19 = vpop.permute.xlu1 %222 }
 0x2f2   :  { %v226_v47 = vadd.f32 %v1036_v35, %v223_v19 }
 0x2f9   :  { %889 = vset.pattern.permute.xlu2 %v909_v25 }
 0x330   :  { %v590_v2 = vpop.permute.xlu2 %589 }
 0x331   :  { %v592_v5 = vadd.f32 %v590_v2, %v1036_v35 }
 0x339   :  { %v611_v8 = vpop.permute.xlu2 %610 }
 0x33a   :  { %v613_v17 = vadd.f32 %v611_v8, %v1043_v41 }
 0x342   :  { %v632_v29 = vpop.permute.xlu2 %631 }
 0x343   :  { %vm633_vm3 = vcmp.eq.s32.totalorder %v632_v29, 1 }
 0x347   :  { %v603_v3 = vpop.permute.xlu1 %602  ;;  %v595_v4 = vpop.permute.xlu0 %594 }
 0x348   :  { %v597_v7 = vadd.f32 %v595_v4, %v1038_v36  ;;  %v605_v13 = vadd.f32 %v603_v3, %v1040_v38  ;;  %v1231_v3 = vand.u32 127, %v214_v0 }
 0x34a   :  { %vm598_vm13 = vcmp.gt.f32.partialorder %v597_v7, %v592_v5 }
 0x34b   :  { %v599_v14 = vsel %vm598_vm13, %v597_v7, %v592_v5  ;;  %v600_v16 = vsel %vm598_vm13, 1, %v907_v11 }
 0x34c   :  { %vm606_vm14 = vcmp.gt.f32.partialorder %v605_v13, %v599_v14 }
 0x34d   :  { %v608_v18 = vsel %vm606_vm14, 2, %v600_v16  ;;  %v607_v20 = vsel %vm606_vm14, %v605_v13, %v599_v14 }
 0x34e   :  { %vm614_vm15 = vcmp.gt.f32.partialorder %v613_v17, %v607_v20 }
 0x34f   :  { %v616_v21 = vsel %vm614_vm15, 3, %v608_v18  ;;  %v615_v28 = vsel %vm614_vm15, %v613_v17, %v607_v20  ;;  %v229_v43 = vpop.permute.xlu0 %228 }
 0x350   :  { %v619_v22 = vpop.permute.xlu1 %618  ;;  %v232_v45 = vadd.f32 %v1038_v36, %v229_v43 }
 0x351   :  { %v621_v26 = vadd.f32 %v619_v22, %v1046_v44 }
 0x352   :  { %vm233_vm5 = vcmp.gt.f32.partialorder %v232_v45, %v226_v47 }
 0x353   :  { %vm622_vm2 = vcmp.gt.f32.partialorder %v621_v26, %v615_v28  ;;  %v235_v61 = vsel %vm233_vm5, 1, %v907_v11 }
 0x354   :  { %v623_v31 = vsel %vm622_vm2, %v621_v26, %v615_v28  ;;  %v1187_v32 = vsel %vm622_vm2, 4, %v616_v21 }
 0x355   :  { %v627_v33 = vadd.f32 %v623_v31, %v583_v27 }
 0x357   :  { %v634_v34 = vsel %vm633_vm3, %v627_v33, %v586_v55  ;;  %v57_v55 = vld [vmem:[%s1328_s1 + $0x38] sm:$0xff] }
 0x358   :  { %650 = vst.msk [vmem:[#allocation2] sm:$0xff] %vm38_vm1, %v634_v34  ;;  %822 = vmatmul.msk.f32.gmra.mxu2 %vm60_vm0, %v57_v55  ;;  %v256_v59 = vpop.permute.xlu0 %255 }
 0x359   :  { %v238_v46 = vpop.permute.xlu1 %237  ;;  %v259_v63 = vadd.f32 %v1046_v44, %v256_v59 }
 0x35a   :  { %v241_v51 = vadd.f32 %v1040_v38, %v238_v46 }
 0x35f   :  { %v1190_v37 = vld [vmem:[#allocation2] sm:$0xff] }
 0x360   :  { %690 = vperm.xlu0 %887, %v1190_v37   ;;  %666 = vperm.xlu2 %889, %v1190_v37  }
 0x361   :  { %661 = vperm.xlu1 %888, %v1190_v37  }
 0x368   :  { %891 = vset.pattern.permute.xlu2 %v908_v24  ;;  %895 = vset.pattern.permute.xlu0 %v906_v10 }
 0x369   :  { %890 = vset.pattern.permute.xlu1 %v906_v10  ;;  %682 = vperm.xlu2 %891, %v1190_v37   ;;  %v247_v10 = vpop.permute.xlu2 %246 }
 0x36a   :  { %674 = vperm.xlu1 %890, %v1190_v37  }
 0x371   :  { %893 = vset.pattern.permute.xlu2 %v907_v11 }
 0x372   :  { %892 = vset.pattern.permute.xlu1 %v907_v11  ;;  %287 = vperm.xlu2 %893, %v907_v11  }
 0x373   :  { %703 = vperm.xlu1 %892, %v1204_v42  }
 0x37a   :  { %502 = vperm.xlu2 %893, %v1094_v40   ;;  %v201_v40 = vadd.f32 %v1000_v12, %v186_v50 }
 0x37b   :  { %430 = vperm.xlu1 %892, %v1062_v62   ;;  %v234_v62 = vsel %vm233_vm5, %v232_v45, %v226_v47 }
 0x37c   :  { %210 = vst.msk [vmem:[#allocation3 + $0x30] sm:$0xff] %vm38_vm1, %v201_v40  ;;  %vm242_vm6 = vcmp.gt.f32.partialorder %v241_v51, %v234_v62 }
 0x37d   :  { %v243_v54 = vsel %vm242_vm6, %v241_v51, %v234_v62  ;;  %v244_v1 = vsel %vm242_vm6, 2, %v235_v61 }
 0x382   :  { %894 = vset.pattern.permute.xlu2 %v909_v25  ;;  %v250_v25 = vadd.f32 %v1043_v41, %v247_v10 }
 0x383   :  { %v655_v34 = vld [vmem:[#allocation3 + $0x30] sm:$0xff] }
 0x384   :  { %vm251_vm7 = vcmp.gt.f32.partialorder %v250_v25, %v243_v54 }
 0x385   :  { %v252_v19 = vsel %vm251_vm7, %v250_v25, %v243_v54  ;;  %v253_v2 = vsel %vm251_vm7, 3, %v244_v1 }
 0x386   :  { %vm260_vm8 = vcmp.gt.f32.partialorder %v259_v63, %v252_v19 }
 0x387   :  { %v262_v5 = vsel %vm260_vm8, 4, %v253_v2 }
 0x3ba   :  { %v667_v53 = vpop.permute.xlu2 %666 }
 0x3bb   :  { %v669_v17 = vadd.f32 %v667_v53, %v1038_v36 }
 0x3c3   :  { %v683_v60 = vpop.permute.xlu2 %682 }
 0x3c4   :  { %v685_v26 = vadd.f32 %v683_v60, %v1043_v41 }
 0x3cc   :  { %v288_v4 = vpop.permute.xlu2 %287 }
 0x3cd   :  { %vm289_vm9 = vcmp.eq.s32.totalorder %v288_v4, 1 }
 0x3ce   :  { %v290_v7 = vsel %vm289_vm9, %v262_v5, %v1231_v3 }
 0x3cf   :  { %292 = vst.msk [vmem:[%s1334_s9] sm:$0xff] %vm38_vm1, %v290_v7  ;;  %v903_v7 = vld [vmem:[%s1335_s8] ss:$0 sm:$0xff] }
 0x3d2   :  { %v691_v21 = vpop.permute.xlu0 %690 }
 0x3d3   :  { %v662_v8 = vpop.permute.xlu1 %661  ;;  %v693_v29 = vadd.f32 %v691_v21, %v1046_v44 }
 0x3d4   :  { %v503_v13 = vpop.permute.xlu2 %502  ;;  %v664_v16 = vadd.f32 %v662_v8, %v1036_v35 }
 0x3d5   :  { %vm504_vm0 = vcmp.eq.s32.totalorder %v503_v13, 1 }
 0x3d6   :  { %v505_v14 = vsel %vm504_vm0, %v1116_v6, %v1231_v3  ;;  %vm670_vm10 = vcmp.gt.f32.partialorder %v669_v17, %v664_v16 }
 0x3d7   :  { %836 = vst.msk [vmem:[%s1334_s9 + $0x18] sm:$0xff] %vm38_vm1, %v505_v14  ;;  %v671_v22 = vsel %vm670_vm10, %v669_v17, %v664_v16  ;;  %v672_v27 = vsel %vm670_vm10, 1, %v907_v11 }
 0x3dc   :  { %v675_v18 = vpop.permute.xlu1 %674 }
 0x3dd   :  { %v677_v20 = vadd.f32 %v675_v18, %v1040_v38 }
 0x3df   :  { %vm678_vm11 = vcmp.gt.f32.partialorder %v677_v20, %v671_v22 }
 0x3e0   :  { %v679_v6 = vsel %vm678_vm11, %v677_v20, %v671_v22  ;;  %v680_v28 = vsel %vm678_vm11, 2, %v672_v27 }
 0x3e1   :  { %vm686_vm12 = vcmp.gt.f32.partialorder %v685_v26, %v679_v6 }
 0x3e2   :  { %v687_v31 = vsel %vm686_vm12, %v685_v26, %v679_v6  ;;  %v688_v33 = vsel %vm686_vm12, 3, %v680_v28 }
 0x3e3   :  { %vm694_vm13 = vcmp.gt.f32.partialorder %v693_v29, %v687_v31 }
 0x3e4   :  { %v695_v39 = vsel %vm694_vm13, %v693_v29, %v687_v31  ;;  %v1250_v10 = vsel %vm694_vm13, 4, %v688_v33 }
 0x3e5   :  { %v704_v43 = vpop.permute.xlu1 %703  ;;  %v699_v45 = vadd.f32 %v695_v39, %v655_v34 }
 0x3e6   :  { %vm705_vm14 = vcmp.eq.s32.totalorder %v704_v43, 1 }
 0x3e7   :  { %v706_v46 = vsel %vm705_vm14, %v699_v45, %v1190_v37 }
 0x3e8   :  { %722 = vst.msk [vmem:[#allocation2] sm:$0xff] %vm38_vm1, %v706_v46 }
 0x3ed   :  { %v431_v47 = vpop.permute.xlu1 %430 }
 0x3ee   :  { %vm432_vm15 = vcmp.eq.s32.totalorder %v431_v47, 1 }
 0x3ef   :  { %v433_v48 = vsel %vm432_vm15, %v1084_v30, %v1231_v3  ;;  %v1256_v49 = vld [vmem:[#allocation2] sm:$0xff]  ;;  %v843_v30 = vld [vmem:[%s1332_s2 + $0x38] sm:$0xff] }
 0x3f0   :  { %834 = vst.msk [vmem:[%s1334_s9 + $0x10] sm:$0xff] %vm38_vm1, %v433_v48  ;;  %746 = vperm.xlu0 %895, %v1256_v49   ;;  %738 = vperm.xlu2 %894, %v1256_v49   ;;  %vm769_vm2 = vcmp.gt.f32.partialorder %v843_v30, 0.0 }
 0x3f1   :  { %733 = vperm.xlu1 %892, %v1256_v49   ;;  %v773_v37 = vsel %vm769_vm2, 1, %v907_v11 }
 0x3f8   :  { %896 = vset.pattern.permute.xlu0 %v907_v11  ;;  %899 = vset.pattern.permute.xlu2 %v905_v9  ;;  %v123_v9 = vpop.f32.mrf.mxu2 }
 0x3f9   :  { %897 = vset.pattern.permute.xlu1 %v908_v24  ;;  %358 = vperm.xlu0 %896, %v1014_v23   ;;  %v188_v23 = vpop.f32.mrf.mxu3 }
 0x3fa   :  { %762 = vperm.xlu2 %899, %v1256_v49   ;;  %754 = vperm.xlu1 %897, %v1256_v49   ;;  %v189_v24 = vadd.f32 %v188_v23, %v123_v9 }
 0x3fc   :  { %v202_v50 = vadd.f32 %v1000_v12, %v189_v24 }
 0x3fe   :  { %211 = vst.msk [vmem:[#allocation3 + $0x38] sm:$0xff] %vm38_vm1, %v202_v50 }
 0x401   :  { %646 = vperm.xlu0 %896, %v1160_v58  }
 0x402   :  { %900 = vset.pattern.permute.xlu2 %v907_v11  ;;  %898 = vset.pattern.permute.xlu1 %v907_v11 }
 0x403   :  { %574 = vperm.xlu2 %900, %v1123_v15   ;;  %775 = vperm.xlu1 %898, %v773_v37  }
 0x40b   :  { %718 = vperm.xlu1 %898, %v1204_v42   ;;  %790 = vperm.xlu2 %900, %v773_v37  }
 0x44a   :  { %v739_v51 = vpop.permute.xlu2 %738 }
 0x44b   :  { %v741_v62 = vadd.f32 %v739_v51, %v1038_v36 }
 0x454   :  { %v763_v53 = vpop.permute.xlu2 %762 }
 0x455   :  { %v765_v36 = vadd.f32 %v763_v53, %v1046_v44 }
 0x45d   :  { %v575_v58 = vpop.permute.xlu2 %574 }
 0x45e   :  { %vm576_vm3 = vcmp.eq.s32.totalorder %v575_v58, 1 }
 0x45f   :  { %v577_v40 = vsel %vm576_vm3, %v1149_v52, %v1231_v3 }
 0x460   :  { %838 = vst.msk [vmem:[%s1334_s9 + $0x20] sm:$0xff] %vm38_vm1, %v577_v40 }
 0x462   :  { %v747_v15 = vpop.permute.xlu0 %746 }
 0x463   :  { %v734_v42 = vpop.permute.xlu1 %733  ;;  %v749_v54 = vadd.f32 %v747_v15, %v1040_v38 }
 0x464   :  { %v736_v12 = vadd.f32 %v734_v42, %v1036_v35 }
 0x465   :  { %v791_v61 = vpop.permute.xlu2 %790 }
 0x466   :  { %vm742_vm4 = vcmp.gt.f32.partialorder %v741_v62, %v736_v12  ;;  %vm792_vm8 = vcmp.eq.s32.totalorder %v791_v61, 1 }
 0x467   :  { %v743_v25 = vsel %vm742_vm4, %v741_v62, %v736_v12  ;;  %v744_v56 = vsel %vm742_vm4, 1, %v907_v11 }
 0x468   :  { %vm750_vm5 = vcmp.gt.f32.partialorder %v749_v54, %v743_v25 }
 0x469   :  { %v751_v35 = vsel %vm750_vm5, %v749_v54, %v743_v25  ;;  %v752_v38 = vsel %vm750_vm5, 2, %v744_v56 }
 0x46b   :  { %v359_v55 = vpop.permute.xlu0 %358 }
 0x46c   :  { %vm360_vm6 = vcmp.eq.s32.totalorder %v359_v55, 1  ;;  %v755_v52 = vpop.permute.xlu1 %754 }
 0x46d   :  { %v361_v59 = vsel %vm360_vm6, %v1052_v57, %v1231_v3  ;;  %v757_v60 = vadd.f32 %v755_v52, %v1043_v41  ;;  %v727_v57 = vld [vmem:[#allocation3 + $0x38] sm:$0xff] }
 0x46e   :  { %832 = vst.msk [vmem:[%s1334_s9 + $0x8] sm:$0xff] %vm38_vm1, %v361_v59 }
 0x46f   :  { %vm758_vm7 = vcmp.gt.f32.partialorder %v757_v60, %v751_v35 }
 0x470   :  { %v759_v63 = vsel %vm758_vm7, %v757_v60, %v751_v35  ;;  %v760_v11 = vsel %vm758_vm7, 3, %v752_v38 }
 0x471   :  { %vm766_vm9 = vcmp.gt.f32.partialorder %v765_v36, %v759_v63 }
 0x472   :  { %v767_v0 = vsel %vm766_vm9, %v765_v36, %v759_v63  ;;  %v768_v1 = vsel %vm766_vm9, 4, %v760_v11 }
 0x473   :  { %v793_v41 = vsel %vm792_vm8, %v768_v1, %v1231_v3  ;;  %v647_v19 = vpop.permute.xlu0 %646  ;;  %v771_v4 = vadd.f32 %v767_v0, %v727_v57 }
 0x474   :  { %844 = vst.msk [vmem:[%s1334_s9 + $0x38] sm:$0xff] %vm38_vm1, %v793_v41  ;;  %vm648_vm0 = vcmp.eq.s32.totalorder %v647_v19, 1 }
 0x475   :  { %v649_v44 = vsel %vm648_vm0, %v1187_v32, %v1231_v3  ;;  %v776_v2 = vpop.permute.xlu1 %775 }
 0x476   :  { %840 = vst.msk [vmem:[%s1334_s9 + $0x28] sm:$0xff] %vm38_vm1, %v649_v44  ;;  %vm777_vm10 = vcmp.eq.s32.totalorder %v776_v2, 1 }
 0x477   :  { %v778_v5 = vsel %vm777_vm10, %v771_v4, %v1256_v49 }
 0x478   :  { %794 = vst.msk [vmem:[#allocation2] sm:$0xff] %vm38_vm1, %v778_v5 }
 0x47d   :  { %v719_v8 = vpop.permute.xlu1 %718 }
 0x47e   :  { %vm720_vm11 = vcmp.eq.s32.totalorder %v719_v8, 1 }
 0x47f   :  { %v800_v13 = vld [vmem:[#allocation2] sm:$0xff]  ;;  %v721_v32 = vsel %vm720_vm11, %v1250_v10, %v1231_v3 }
 0x480   :  { %v805_v14 = vadd.f32 %v903_v7, %v800_v13  ;;  %842 = vst.msk [vmem:[%s1334_s9 + $0x30] sm:$0xff] %vm38_vm1, %v721_v32 }
 0x482   :  { %806 = vst.msk [vmem:[%s1336_s10] sm:$0xff] %vm38_vm1, %v805_v14 }

// kernel: lstm_crf_forward.2
= control target key start
LH: loop header
LB: loop body
LE: loop exit
PB: predicated region body
PF: predicated region fallthrough
CT: control target
= control target key end

     0   :  { %vm99_vm0 = vcmask 130048   ;;  %v2213_v3 = vmov 0.0   ;;  %s2214_s22 = smov 16   ;;  %vm184_vm1 = vcmask 523264   ;;  %s2217_s15 = smov 48   ;;  %s2979_s4 = inlined_call_operand.vmem [shape: f32[16,64], index: 4, kind: input, shape index: {}]   ;;  %s2980_s7 = inlined_call_operand.vmem [shape: f32[16,64], index: 7, kind: input, shape index: {}]   ;;  %s2981_s0 = inlined_call_operand.vmem [shape: f32[8,8,16], index: 0, kind: input, shape index: {}, may-alias: {0,1}]   ;;  %s2982_s1 = inlined_call_operand.vmem [shape: f32[8,8,16], index: 1, kind: input, shape index: {}, may-alias: {0,1}]   ;;  %s2983_s5 = inlined_call_operand.vmem [shape: f32[16,64], index: 5, kind: input, shape index: {}]   ;;  %s2984_s6 = inlined_call_operand.vmem [shape: f32[1,64], index: 6, kind: input, shape index: {}]   ;;  %s2985_s9 = inlined_call_operand.vmem [shape: f32[1,64], index: 9, kind: input, shape index: {}]   ;;  %s2986_s8 = inlined_call_operand.vmem [shape: f32[16,64], index: 8, kind: input, shape index: {}]   ;;  %s2987_s2 = inlined_call_operand.vmem [shape: f32[8,8,1], index: 2, kind: input, shape index: {}, may-alias: {2,3}]   ;;  %s2988_s3 = inlined_call_operand.vmem [shape: f32[8,8,1], index: 3, kind: input, shape index: {}, may-alias: {2,3}]   ;;  %s2989_s10 = inlined_call_operand.vmem [shape: f32[8,8,16], index: 10, kind: output, shape index: {0}]   ;;  %s2990_s11 = inlined_call_operand.vmem [shape: f32[8,8,16], index: 11, kind: output, shape index: {1}]  }
   0x1   :  { %v113_v0 = vld [vmem:[%s2979_s4 + $0x8] sm:$0xff]  ;;  %v112_v2 = vld [vmem:[%s2979_s4] sm:$0xff]  ;;  %100 = vst.msk [vmem:[#allocation4] sm:$0xff] %vm99_vm0, %v2213_v3  ;;  %v195_v11 = vld [vmem:[%s2982_s1 + $0x10] sm:$0xff]  ;;  %s2218_s18 = smov 32   ;;  %s2219_s19 = smov 112  }
   0x2   :  { %v202_v1 = vld [vmem:[%s2980_s7 + $0x8] sm:$0xff]  ;;  %157 = vmatpush.msra.mxu0 %v113_v0  ;;  %v201_v4 = vld [vmem:[%s2980_s7] sm:$0xff]  ;;  %101 = vst.msk [vmem:[#allocation5] sm:$0xff] %vm99_vm0, %v2213_v3  ;;  %v196_v12 = vld [vmem:[%s2982_s1 + $0x18] sm:$0xff]  ;;  %s2220_s20 = smov 80  }
   0x3   :  { %245 = vmatpush.msra.mxu1 %v202_v1  ;;  %v104_v5 = vld [vmem:[%s2981_s0] sm:$0xff]  ;;  %v2304_v7 = vld [vmem:[%s2983_s5 + $0x8] sm:$0xff]  ;;  %102 = vst.msk [vmem:[#allocation6] sm:$0xff] %vm99_vm0, %v2213_v3  ;;  %v199_v20 = vld [vmem:[%s2982_s1 + $0x30] sm:$0xff] }
   0x4   :  { %v193_v6 = vld [vmem:[%s2982_s1] sm:$0xff]  ;;  %158 = vmatpush.msra.mxu0 %v112_v2  ;;  %103 = vst.msk [vmem:[#allocation7] sm:$0xff] %vm99_vm0, %v2213_v3  ;;  %305 = vmatpush.msra.mxu2 %v2304_v7  ;;  %v194_v10 = vld [vmem:[%s2982_s1 + $0x8] sm:$0xff]  ;;  %v200_v21 = vld [vmem:[%s2982_s1 + $0x38] sm:$0xff] }
   0x5   :  { %246 = vmatpush.msra.mxu1 %v201_v4  ;;  %1984 = vmatmul.msk.f32.vlgmr.msra.gmra.mxu0 %vm99_vm0, %v104_v5  ;;  %v2313_v8 = vld [vmem:[%s2983_s5] sm:$0xff]  ;;  %v2340_v13 = vld [vmem:[%s2986_s8 + $0x8] sm:$0xff]  ;;  %v2216_v4 = vmov 0  }
   0x6   :  { %1992 = vmatmul.msk.f32.vlgmr.msra.gmra.mxu1 %vm99_vm0, %v193_v6  ;;  %306 = vmatpush.msra.mxu2 %v2313_v8  ;;  %v2345_v14 = vld [vmem:[%s2986_s8] sm:$0xff]  ;;  %v198_v19 = vld [vmem:[%s2982_s1 + $0x28] sm:$0xff] }
   0x7   :  { %408 = vmatpush.msra.mxu3 %v2340_v13  ;;  %v197_v17 = vld [vmem:[%s2982_s1 + $0x20] sm:$0xff]  ;;  %s2215_s1 = smov 96   ;;  %2068 = vset.pattern.permute.xlu2 %v2216_v4 }
   0x8   :  { %v2317_v9 = vld [vmem:[#allocation4] sm:$0xff]  ;;  %512 = vmatpush.msrb.mxu2 %v2304_v7  ;;  %2069 = vset.pattern.permute.xlu0 %v2216_v4 }
   0x9   :  { %2000 = vmatmul.msk.f32.vlgmr.msra.gmra.mxu2 %vm99_vm0, %v2317_v9  ;;  %v287_v16 = vld [vmem:[#allocation5] sm:$0xff]  ;;  %409 = vmatpush.msra.mxu3 %v2345_v14  ;;  %v2378_v22 = vld [vmem:[%s2984_s6] ss:$0 sm:$0xff] }
   0xa   :  { %513 = vmatpush.msrb.mxu2 %v2313_v8  ;;  %v2348_v15 = vld [vmem:[#allocation6] sm:$0xff]  ;;  %333 = vrot.lane.b32.xlu1 %v287_v16, %s2214_s22  ;;  %v2072_v23 = vld [vmem:[%s2985_s9] ss:$0 sm:$0xff] }
   0xb   :  { %2003 = vmatmul.msk.f32.vlgmr.msra.gmra.mxu3 %vm99_vm0, %v2348_v15  ;;  %v390_v18 = vld [vmem:[#allocation7] sm:$0xff]  ;;  %2070 = vset.pattern.permute.xlu1 %v2216_v4 }
   0xc   :  { %720 = vmatpush.msra.mxu2 %v2304_v7  ;;  %616 = vmatpush.msrb.mxu3 %v2340_v13 }
   0xe   :  { %1993 = vmatmul.msk.f32.gmra.mxu1 %vm99_vm0, %v194_v10  ;;  %721 = vmatpush.msra.mxu2 %v2313_v8 }
   0xf   :  { %617 = vmatpush.msrb.mxu3 %v2345_v14 }
  0x11   :  { %824 = vmatpush.msra.mxu3 %v2340_v13 }
  0x12   :  { %436 = vrot.lane.b32.xlu1 %v390_v18, %s2214_s22 }
  0x13   :  { %825 = vmatpush.msra.mxu3 %v2345_v14 }
  0x16   :  { %1994 = vmatmul.msk.f32.gmra.mxu1 %vm99_vm0, %v195_v11 }
  0x1e   :  { %1995 = vmatmul.msk.f32.gmra.mxu1 %vm99_vm0, %v196_v12 }
  0x26   :  { %1996 = vmatmul.msk.f32.gmra.mxu1 %vm99_vm0, %v197_v17 }
  0x2e   :  { %1997 = vmatmul.msk.f32.gmra.mxu1 %vm99_vm0, %v198_v19 }
  0x36   :  { %1998 = vmatmul.msk.f32.gmra.mxu1 %vm99_vm0, %v199_v20 }
  0x3e   :  { %1999 = vmatmul.msk.f32.gmra.mxu1 %vm99_vm0, %v200_v21 }
  0x82   :  { %v160_v24 = vpop.f32.mrf.mxu0 }
  0x83   :  { %v248_v25 = vpop.f32.mrf.mxu1  ;;  %v161_v26 = vadd.f32 %v2378_v22, %v160_v24  ;;  %v284_v24 = vld [vmem:[%s2987_s2] sm:$0xff] }
  0x84   :  { %v249_v27 = vadd.f32 %v2072_v23, %v248_v25  ;;  %vm353_vm10 = vcmp.gt.f32.partialorder %v284_v24, 0.0 }
  0x85   :  { %185 = vst.msk [vmem:[#allocation2] sm:$0xff] %vm184_vm1, %v161_v26  ;;  %v354_v25 = vsel %vm353_vm10, 1, %v2216_v4  ;;  %v334_v26 = vpop.permute.xlu1 %333 }
  0x86   :  { %272 = vst.msk [vmem:[#allocation3] sm:$0xff] %vm184_vm1, %v249_v27 }
  0x8b   :  { %v251_v28 = vpop.f32.mrf.mxu1 }
  0x8c   :  { %v252_v29 = vadd.f32 %v2072_v23, %v251_v28  ;;  %v285_v30 = vld [vmem:[#allocation2] sm:$0xff]  ;;  %v308_v31 = vpop.f32.mrf.mxu2 }
  0x8d   :  { %v311_v32 = vadd.f32 %v308_v31, %v285_v30  ;;  %v2002_v31 = vld [vmem:[%s2988_s3 + $0x38] sm:$0xff] }
  0x8e   :  { %273 = vst.msk [vmem:[#allocation3 + $0x8] sm:$0xff] %vm184_vm1, %v252_v29  ;;  %v411_v46 = vpop.f32.mrf.mxu3  ;;  %vm456_vm11 = vcmp.gt.f32.partialorder %v2002_v31, 0.0 }
  0x8f   :  { %2073 = vtanh.f32 %v311_v32  ;;  %v2001_v50 = vmul.f32 -1.442695, %v311_v32  ;;  %v457_v32 = vsel %vm456_vm11, 1, %v2216_v4 }
  0x93   :  { %v254_v33 = vpop.f32.mrf.mxu1 }
  0x94   :  { %v255_v34 = vadd.f32 %v2072_v23, %v254_v33  ;;  %v437_v33 = vpop.permute.xlu1 %436 }
  0x95   :  { %v2074_v35 = vpop.eup %2073 }
  0x96   :  { %274 = vst.msk [vmem:[#allocation3 + $0x10] sm:$0xff] %vm184_vm1, %v255_v34  ;;  %338 = vrot.lane.b32.xlu0 %v2074_v35, %s2215_s1 }
  0x9b   :  { %v257_v36 = vpop.f32.mrf.mxu1 }
  0x9c   :  { %v258_v37 = vadd.f32 %v2072_v23, %v257_v36 }
  0x9e   :  { %275 = vst.msk [vmem:[#allocation3 + $0x18] sm:$0xff] %vm184_vm1, %v258_v37 }
  0xa3   :  { %v260_v38 = vpop.f32.mrf.mxu1 }
  0xa4   :  { %v261_v39 = vadd.f32 %v2072_v23, %v260_v38 }
  0xa6   :  { %276 = vst.msk [vmem:[#allocation3 + $0x20] sm:$0xff] %vm184_vm1, %v261_v39 }
  0xab   :  { %v263_v40 = vpop.f32.mrf.mxu1 }
  0xac   :  { %v264_v41 = vadd.f32 %v2072_v23, %v263_v40 }
  0xae   :  { %277 = vst.msk [vmem:[#allocation3 + $0x28] sm:$0xff] %vm184_vm1, %v264_v41 }
  0xb3   :  { %v266_v42 = vpop.f32.mrf.mxu1 }
  0xb4   :  { %v267_v43 = vadd.f32 %v2072_v23, %v266_v42 }
  0xb6   :  { %278 = vst.msk [vmem:[#allocation3 + $0x30] sm:$0xff] %vm184_vm1, %v267_v43 }
  0xbb   :  { %v269_v44 = vpop.f32.mrf.mxu1 }
  0xbc   :  { %v270_v45 = vadd.f32 %v2072_v23, %v269_v44 }
  0xbe   :  { %279 = vst.msk [vmem:[#allocation3 + $0x38] sm:$0xff] %vm184_vm1, %v270_v45 }
  0xc5   :  { %v388_v47 = vld [vmem:[#allocation3 + $0x38] sm:$0xff] }
  0xc6   :  { %v414_v48 = vadd.f32 %v411_v46, %v388_v47 }
  0xc8   :  { %2075 = vtanh.f32 %v414_v48  ;;  %v2004_v1 = vmul.f32 -1.442695, %v414_v48 }
  0xc9   :  { %2077 = vpow2.f32 %v2001_v50  ;;  %v105_v50 = vld [vmem:[%s2981_s0 + $0x8] sm:$0xff] }
  0xca   :  { %1985 = vmatmul.msk.f32.gmra.mxu0 %vm99_vm0, %v105_v50 }
  0xce   :  { %v2076_v49 = vpop.eup %2075 }
  0xcf   :  { %441 = vrot.lane.b32.xlu0 %v2076_v49, %s2215_s1  ;;  %v2078_v51 = vpop.eup %2077 }
  0xd0   :  { %v315_v52 = vadd.f32 1.0, %v2078_v51 }
  0xd2   :  { %2079 = vrcp.f32 %v315_v52  ;;  %vm321_vm2 = vweird.f32 %v315_v52  ;;  %v327_v57 = vand.u32 2147483648, %v315_v52  ;;  %v325_v59 = vand.u32 2147483647, %v315_v52 }
  0xd3   :  { %2081 = vpow2.f32 %v2004_v1 }
  0xd4   :  { %v328_v60 = vor.u32 1.1754944e-38, %v327_v57  ;;  %vm326_vm5 = vcmp.eq.f32.partialorder %v325_v59, 8.507059e+37 }
  0xd8   :  { %v2080_v53 = vpop.eup %2079 }
  0xd9   :  { %v317_v54 = vmul.f32 %v2080_v53, %v315_v52  ;;  %vm322_vm3 = vweird.f32 %v2080_v53  ;;  %v2082_v2 = vpop.eup %2081 }
  0xda   :  { %vm323_vm4 = vmor %vm321_vm2, %vm322_vm3  ;;  %v418_v3 = vadd.f32 1.0, %v2082_v2 }
  0xdb   :  { %v318_v55 = vsub.f32 1.0, %v317_v54 }
  0xdc   :  { %2083 = vrcp.f32 %v418_v3  ;;  %v430_v16 = vand.u32 2147483648, %v418_v3  ;;  %vm424_vm7 = vweird.f32 %v418_v3  ;;  %v428_v17 = vand.u32 2147483647, %v418_v3 }
  0xdd   :  { %v319_v56 = vmul.f32 %v2080_v53, %v318_v55 }
  0xde   :  { %v431_v19 = vor.u32 1.1754944e-38, %v430_v16  ;;  %vm429_vm9 = vcmp.eq.f32.partialorder %v428_v17, 8.507059e+37 }
  0xdf   :  { %v320_v58 = vadd.f32 %v2080_v53, %v319_v56 }
  0xe1   :  { %v324_v61 = vsel %vm323_vm4, %v2080_v53, %v320_v58  ;;  %v596_v58 = vld [vmem:[#allocation3 + $0x30] sm:$0xff] }
  0xe2   :  { %v2395_v62 = vsel %vm326_vm5, %v328_v60, %v324_v61  ;;  %v2084_v5 = vpop.eup %2083 }
  0xe3   :  { %v420_v6 = vmul.f32 %v2084_v5, %v418_v3  ;;  %vm425_vm6 = vweird.f32 %v2084_v5  ;;  %v336_v27 = vmul.f32 %v334_v26, %v2395_v62 }
  0xe4   :  { %vm426_vm8 = vmor %vm424_vm7, %vm425_vm6 }
  0xe5   :  { %v421_v10 = vsub.f32 1.0, %v420_v6 }
  0xe7   :  { %v422_v11 = vmul.f32 %v2084_v5, %v421_v10 }
  0xe9   :  { %v423_v12 = vadd.f32 %v2084_v5, %v422_v11 }
  0xeb   :  { %v427_v18 = vsel %vm426_vm8, %v2084_v5, %v423_v12 }
  0xec   :  { %v432_v20 = vsel %vm429_vm9, %v431_v19, %v427_v18 }
 0x108   :  { %v339_v63 = vpop.permute.xlu0 %338 }
 0x109   :  { %v341_v0 = vmul.f32 %v339_v63, %v2395_v62 }
 0x10b   :  { %343 = vrot.lane.b32.xlu2 %v341_v0, %s2214_s22 }
 0x141   :  { %v442_v21 = vpop.permute.xlu0 %441 }
 0x142   :  { %v444_v23 = vmul.f32 %v442_v21, %v432_v20 }
 0x144   :  { %446 = vrot.lane.b32.xlu2 %v444_v23, %s2214_s22 }
 0x147   :  { %v163_v56 = vpop.f32.mrf.mxu0 }
 0x148   :  { %v164_v57 = vadd.f32 %v2378_v22, %v163_v56  ;;  %v2010_v56 = vld [vmem:[%s2988_s3 + $0x30] sm:$0xff] }
 0x149   :  { %vm664_vm10 = vcmp.gt.f32.partialorder %v2010_v56, 0.0 }
 0x14a   :  { %186 = vst.msk [vmem:[#allocation2 + $0x8] sm:$0xff] %vm184_vm1, %v164_v57  ;;  %v665_v57 = vsel %vm664_vm10, 1, %v2216_v4 }
 0x14c   :  { %356 = vperm.xlu2 %2068, %v354_v25  }
 0x154   :  { %463 = vrot.lane.b32.xlu2 %v2348_v15, %s2217_s15  ;;  %v439_v15 = vmul.f32 %v437_v33, %v432_v20 }
 0x165   :  { %v344_v28 = vpop.permute.xlu2 %343 }
 0x166   :  { %v346_v29 = vadd.f32 %v344_v28, %v336_v27 }
 0x168   :  { %2085 = vtanh.f32 %v346_v29 }
 0x16e   :  { %v2086_v30 = vpop.eup %2085 }
 0x16f   :  { %349 = vrot.lane.b32.xlu0 %v2086_v30, %s2218_s18 }
 0x177   :  { %459 = vperm.xlu0 %2069, %v457_v32  }
 0x19e   :  { %v447_v34 = vpop.permute.xlu2 %446 }
 0x19f   :  { %v449_v35 = vadd.f32 %v447_v34, %v439_v15 }
 0x1a1   :  { %2087 = vtanh.f32 %v449_v35 }
 0x1a6   :  { %v357_v36 = vpop.permute.xlu2 %356 }
 0x1a7   :  { %v2088_v37 = vpop.eup %2087  ;;  %vm358_vm12 = vcmp.eq.s32.totalorder %v357_v36, 1 }
 0x1a8   :  { %452 = vrot.lane.b32.xlu1 %v2088_v37, %s2218_s18  ;;  %v359_v38 = vsel %vm358_vm12, %v346_v29, %v334_v26 }
 0x1a9   :  { %370 = vrot.lane.b32.xlu0 %v359_v38, %s2219_s19 }
 0x1ae   :  { %v464_v42 = vpop.permute.xlu2 %463 }
 0x1b0   :  { %360 = vrot.lane.b32.xlu1 %v2317_v9, %s2217_s15 }
 0x1e1   :  { %v350_v39 = vpop.permute.xlu0 %349 }
 0x1e2   :  { %v352_v46 = vmul.f32 %v350_v39, %v2395_v62  ;;  %v492_v62 = vld [vmem:[#allocation2 + $0x8] sm:$0xff] }
 0x1e9   :  { %v460_v40 = vpop.permute.xlu0 %459 }
 0x1ea   :  { %vm461_vm13 = vcmp.eq.s32.totalorder %v460_v40, 1 }
 0x1eb   :  { %v462_v48 = vsel %vm461_vm13, %v449_v35, %v437_v33  ;;  %v2006_v35 = vld [vmem:[%s2987_s2 + $0x8] sm:$0xff] }
 0x1ec   :  { %vm560_vm8 = vcmp.gt.f32.partialorder %v2006_v35, 0.0 }
 0x21a   :  { %v453_v41 = vpop.permute.xlu1 %452 }
 0x21b   :  { %v455_v43 = vmul.f32 %v453_v41, %v432_v20  ;;  %v371_v44 = vpop.permute.xlu0 %370  ;;  %v561_v41 = vsel %vm560_vm8, 1, %v2216_v4 }
 0x21c   :  { %373 = vst.msk [vmem:[#allocation5] sm:$0xff] %vm99_vm0, %v371_v44 }
 0x21d   :  { %v2421_v45 = vsel %vm461_vm13, %v455_v43, %v464_v42 }
 0x21e   :  { %468 = vrot.lane.b32.xlu2 %v2421_v45, %s2220_s20 }
 0x222   :  { %v361_v47 = vpop.permute.xlu1 %360 }
 0x223   :  { %v2427_v9 = vsel %vm358_vm12, %v352_v46, %v361_v47  ;;  %v494_v49 = vld [vmem:[#allocation5] sm:$0xff] }
 0x224   :  { %365 = vrot.lane.b32.xlu1 %v2427_v9, %s2220_s20 }
 0x22c   :  { %473 = vrot.lane.b32.xlu1 %v462_v48, %s2219_s19 }
 0x234   :  { %540 = vrot.lane.b32.xlu1 %v494_v49, %s2214_s22 }
 0x278   :  { %v469_v51 = vpop.permute.xlu2 %468 }
 0x279   :  { %471 = vst.msk [vmem:[#allocation6] sm:$0xff] %vm99_vm0, %v469_v51 }
 0x280   :  { %v2438_v52 = vld [vmem:[#allocation6] sm:$0xff] }
 0x281   :  { %2011 = vmatmul.msk.f32.vlgmr.msrb.gmra.mxu3 %vm99_vm0, %v2438_v52 }
 0x282   :  { %1032 = vmatpush.msrb.mxu3 %v2340_v13 }
 0x284   :  { %1033 = vmatpush.msrb.mxu3 %v2345_v14 }
 0x296   :  { %v366_v53 = vpop.permute.xlu1 %365 }
 0x297   :  { %368 = vst.msk [vmem:[#allocation4] sm:$0xff] %vm99_vm0, %v366_v53 }
 0x29e   :  { %v474_v54 = vpop.permute.xlu1 %473  ;;  %v2445_v55 = vld [vmem:[#allocation4] sm:$0xff] }
 0x29f   :  { %476 = vst.msk [vmem:[#allocation7] sm:$0xff] %vm99_vm0, %v474_v54  ;;  %2007 = vmatmul.msk.f32.vlgmr.msrb.gmra.mxu2 %vm99_vm0, %v2445_v55 }
 0x2a0   :  { %928 = vmatpush.msrb.mxu2 %v2304_v7 }
 0x2a2   :  { %929 = vmatpush.msrb.mxu2 %v2313_v8 }
 0x2a6   :  { %v598_v2 = vld [vmem:[#allocation7] sm:$0xff]  ;;  %v541_v42 = vpop.permute.xlu1 %540 }
 0x304   :  { %v619_v59 = vpop.f32.mrf.mxu3 }
 0x305   :  { %v622_v60 = vadd.f32 %v619_v59, %v596_v58 }
 0x307   :  { %2089 = vtanh.f32 %v622_v60  ;;  %v2012_v3 = vmul.f32 -1.442695, %v622_v60 }
 0x30d   :  { %v2090_v61 = vpop.eup %2089 }
 0x30e   :  { %649 = vrot.lane.b32.xlu0 %v2090_v61, %s2215_s1 }
 0x322   :  { %v515_v63 = vpop.f32.mrf.mxu2 }
 0x323   :  { %v518_v0 = vadd.f32 %v515_v63, %v492_v62 }
 0x325   :  { %2091 = vtanh.f32 %v518_v0  ;;  %v2008_v5 = vmul.f32 -1.442695, %v518_v0 }
 0x326   :  { %2093 = vpow2.f32 %v2012_v3 }
 0x327   :  { %2095 = vpow2.f32 %v2008_v5 }
 0x32b   :  { %v2092_v1 = vpop.eup %2091 }
 0x32c   :  { %545 = vrot.lane.b32.xlu2 %v2092_v1, %s2215_s1  ;;  %v2094_v6 = vpop.eup %2093 }
 0x32d   :  { %v626_v10 = vadd.f32 1.0, %v2094_v6  ;;  %v2096_v11 = vpop.eup %2095  ;;  %v106_v6 = vld [vmem:[%s2981_s0 + $0x10] sm:$0xff] }
 0x32e   :  { %v522_v12 = vadd.f32 1.0, %v2096_v11  ;;  %1986 = vmatmul.msk.f32.gmra.mxu0 %vm99_vm0, %v106_v6 }
 0x32f   :  { %2097 = vrcp.f32 %v626_v10  ;;  %v638_v25 = vand.u32 2147483648, %v626_v10  ;;  %vm632_vm15 = vweird.f32 %v626_v10  ;;  %v636_v26 = vand.u32 2147483647, %v626_v10 }
 0x330   :  { %2099 = vrcp.f32 %v522_v12  ;;  %v534_v33 = vand.u32 2147483648, %v522_v12  ;;  %vm528_vm5 = vweird.f32 %v522_v12  ;;  %v532_v34 = vand.u32 2147483647, %v522_v12 }
 0x331   :  { %v639_v29 = vor.u32 1.1754944e-38, %v638_v25  ;;  %vm637_vm3 = vcmp.eq.f32.partialorder %v636_v26, 8.507059e+37  ;;  %v804_v26 = vld [vmem:[#allocation3 + $0x28] sm:$0xff] }
 0x332   :  { %v535_v37 = vor.u32 1.1754944e-38, %v534_v33  ;;  %vm533_vm7 = vcmp.eq.f32.partialorder %v532_v34, 8.507059e+37 }
 0x334   :  { %644 = vrot.lane.b32.xlu2 %v598_v2, %s2214_s22 }
 0x335   :  { %v2098_v16 = vpop.eup %2097 }
 0x336   :  { %v628_v17 = vmul.f32 %v2098_v16, %v626_v10  ;;  %v2100_v18 = vpop.eup %2099  ;;  %vm633_vm14 = vweird.f32 %v2098_v16 }
 0x337   :  { %v524_v20 = vmul.f32 %v2100_v18, %v522_v12  ;;  %vm634_vm2 = vmor %vm632_vm15, %vm633_vm14  ;;  %vm529_vm4 = vweird.f32 %v2100_v18 }
 0x338   :  { %v629_v19 = vsub.f32 1.0, %v628_v17  ;;  %vm530_vm6 = vmor %vm528_vm5, %vm529_vm4 }
 0x339   :  { %v525_v23 = vsub.f32 1.0, %v524_v20 }
 0x33a   :  { %v630_v21 = vmul.f32 %v2098_v16, %v629_v19 }
 0x33b   :  { %v526_v27 = vmul.f32 %v2100_v18, %v525_v23 }
 0x33c   :  { %v631_v24 = vadd.f32 %v2098_v16, %v630_v21 }
 0x33d   :  { %v527_v30 = vadd.f32 %v2100_v18, %v526_v27 }
 0x33e   :  { %v635_v28 = vsel %vm634_vm2, %v2098_v16, %v631_v24 }
 0x33f   :  { %v640_v31 = vsel %vm637_vm3, %v639_v29, %v635_v28  ;;  %v531_v36 = vsel %vm530_vm6, %v2100_v18, %v527_v30 }
 0x340   :  { %v536_v38 = vsel %vm533_vm7, %v535_v37, %v531_v36 }
 0x341   :  { %v543_v48 = vmul.f32 %v541_v42, %v536_v38 }
 0x380   :  { %v650_v32 = vpop.permute.xlu0 %649 }
 0x381   :  { %v652_v15 = vmul.f32 %v650_v32, %v640_v31 }
 0x383   :  { %654 = vrot.lane.b32.xlu1 %v652_v15, %s2214_s22 }
 0x386   :  { %v546_v39 = vpop.permute.xlu2 %545 }
 0x387   :  { %v548_v40 = vmul.f32 %v546_v39, %v536_v38 }
 0x389   :  { %550 = vrot.lane.b32.xlu0 %v548_v40, %s2214_s22 }
 0x38b   :  { %563 = vperm.xlu1 %2070, %v561_v41  }
 0x38e   :  { %v645_v43 = vpop.permute.xlu2 %644 }
 0x38f   :  { %v647_v44 = vmul.f32 %v645_v43, %v640_v31 }
 0x393   :  { %671 = vrot.lane.b32.xlu1 %v2438_v52, %s2217_s15 }
 0x3ab   :  { %v166_v18 = vpop.f32.mrf.mxu0 }
 0x3ac   :  { %v167_v19 = vadd.f32 %v2378_v22, %v166_v18 }
 0x3ae   :  { %187 = vst.msk [vmem:[#allocation2 + $0x10] sm:$0xff] %vm184_vm1, %v167_v19 }
 0x3b5   :  { %v700_v20 = vld [vmem:[#allocation2 + $0x10] sm:$0xff] }
 0x3f5   :  { %v655_v46 = vpop.permute.xlu1 %654 }
 0x3f6   :  { %v657_v47 = vadd.f32 %v655_v46, %v647_v44 }
 0x3f8   :  { %2101 = vtanh.f32 %v657_v47 }
 0x3fb   :  { %v551_v49 = vpop.permute.xlu0 %550 }
 0x3fc   :  { %v553_v50 = vadd.f32 %v551_v49, %v543_v48 }
 0x3fd   :  { %v564_v51 = vpop.permute.xlu1 %563 }
 0x3fe   :  { %v2102_v53 = vpop.eup %2101  ;;  %2103 = vtanh.f32 %v553_v50  ;;  %vm565_vm9 = vcmp.eq.s32.totalorder %v564_v51, 1 }
 0x3ff   :  { %660 = vrot.lane.b32.xlu0 %v2102_v53, %s2218_s18  ;;  %v566_v54 = vsel %vm565_vm9, %v553_v50, %v541_v42 }
 0x400   :  { %577 = vrot.lane.b32.xlu1 %v566_v54, %s2219_s19 }
 0x404   :  { %v2104_v52 = vpop.eup %2103 }
 0x405   :  { %556 = vrot.lane.b32.xlu2 %v2104_v52, %s2218_s18  ;;  %v672_v59 = vpop.permute.xlu1 %671 }
 0x407   :  { %567 = vrot.lane.b32.xlu0 %v2445_v55, %s2217_s15 }
 0x40d   :  { %667 = vperm.xlu2 %2068, %v665_v57  }
 0x45f   :  { %v557_v58 = vpop.permute.xlu2 %556 }
 0x460   :  { %v559_v1 = vmul.f32 %v557_v58, %v536_v38 }
 0x467   :  { %v668_v60 = vpop.permute.xlu2 %667 }
 0x468   :  { %vm669_vm11 = vcmp.eq.s32.totalorder %v668_v60, 1 }
 0x469   :  { %v670_v3 = vsel %vm669_vm11, %v657_v47, %v645_v43 }
 0x471   :  { %v661_v61 = vpop.permute.xlu0 %660 }
 0x472   :  { %v663_v62 = vmul.f32 %v661_v61, %v640_v31  ;;  %v578_v63 = vpop.permute.xlu1 %577  ;;  %v2014_v61 = vld [vmem:[%s2987_s2 + $0x10] sm:$0xff] }
 0x473   :  { %580 = vst.msk [vmem:[#allocation5] sm:$0xff] %vm99_vm0, %v578_v63  ;;  %vm768_vm6 = vcmp.gt.f32.partialorder %v2014_v61, 0.0 }
 0x474   :  { %v2476_v0 = vsel %vm669_vm11, %v663_v62, %v672_v59  ;;  %v769_v62 = vsel %vm768_vm6, 1, %v2216_v4 }
 0x475   :  { %676 = vrot.lane.b32.xlu0 %v2476_v0, %s2220_s20 }
 0x479   :  { %v568_v55 = vpop.permute.xlu0 %567 }
 0x47a   :  { %v2481_v2 = vsel %vm565_vm9, %v559_v1, %v568_v55  ;;  %v702_v5 = vld [vmem:[#allocation5] sm:$0xff] }
 0x47b   :  { %572 = vrot.lane.b32.xlu2 %v2481_v2, %s2220_s20 }
 0x483   :  { %681 = vrot.lane.b32.xlu2 %v670_v3, %s2219_s19 }
 0x48b   :  { %748 = vrot.lane.b32.xlu2 %v702_v5, %s2214_s22 }
 0x4d5   :  { %v573_v10 = vpop.permute.xlu2 %572 }
 0x4d6   :  { %575 = vst.msk [vmem:[#allocation4] sm:$0xff] %vm99_vm0, %v573_v10 }
 0x4dd   :  { %v682_v11 = vpop.permute.xlu2 %681  ;;  %v2492_v12 = vld [vmem:[#allocation4] sm:$0xff] }
 0x4de   :  { %684 = vst.msk [vmem:[#allocation7] sm:$0xff] %vm99_vm0, %v682_v11  ;;  %2015 = vmatmul.msk.f32.vlgmr.msra.gmra.mxu2 %vm99_vm0, %v2492_v12 }
 0x4df   :  { %1136 = vmatpush.msra.mxu2 %v2304_v7 }
 0x4e1   :  { %1137 = vmatpush.msra.mxu2 %v2313_v8 }
 0x4e5   :  { %v806_v25 = vld [vmem:[#allocation7] sm:$0xff]  ;;  %v749_v63 = vpop.permute.xlu2 %748 }
 0x4e7   :  { %v677_v16 = vpop.permute.xlu0 %676 }
 0x4e8   :  { %679 = vst.msk [vmem:[#allocation6] sm:$0xff] %vm99_vm0, %v677_v16 }
 0x4ef   :  { %v2500_v17 = vld [vmem:[#allocation6] sm:$0xff] }
 0x4f0   :  { %2019 = vmatmul.msk.f32.vlgmr.msra.gmra.mxu3 %vm99_vm0, %v2500_v17 }
 0x4f1   :  { %1240 = vmatpush.msra.mxu3 %v2340_v13 }
 0x4f3   :  { %1241 = vmatpush.msra.mxu3 %v2345_v14 }
 0x561   :  { %v723_v21 = vpop.f32.mrf.mxu2 }
 0x562   :  { %v726_v23 = vadd.f32 %v723_v21, %v700_v20  ;;  %v2018_v20 = vld [vmem:[%s2988_s3 + $0x28] sm:$0xff] }
 0x563   :  { %vm872_vm8 = vcmp.gt.f32.partialorder %v2018_v20, 0.0 }
 0x564   :  { %2105 = vtanh.f32 %v726_v23  ;;  %v2016_v30 = vmul.f32 -1.442695, %v726_v23  ;;  %v873_v21 = vsel %vm872_vm8, 1, %v2216_v4 }
 0x56a   :  { %v2106_v24 = vpop.eup %2105 }
 0x56b   :  { %753 = vrot.lane.b32.xlu0 %v2106_v24, %s2215_s1 }
 0x573   :  { %852 = vrot.lane.b32.xlu0 %v806_v25, %s2214_s22  ;;  %v827_v27 = vpop.f32.mrf.mxu3 }
 0x574   :  { %v830_v28 = vadd.f32 %v827_v27, %v804_v26 }
 0x576   :  { %2107 = vtanh.f32 %v830_v28  ;;  %v2020_v33 = vmul.f32 -1.442695, %v830_v28 }
 0x577   :  { %2109 = vpow2.f32 %v2016_v30 }
 0x57c   :  { %v2108_v29 = vpop.eup %2107 }
 0x57d   :  { %857 = vrot.lane.b32.xlu1 %v2108_v29, %s2215_s1  ;;  %v2110_v31 = vpop.eup %2109 }
 0x57e   :  { %v730_v32 = vadd.f32 1.0, %v2110_v31 }
 0x580   :  { %2111 = vrcp.f32 %v730_v32  ;;  %v742_v40 = vand.u32 2147483648, %v730_v32  ;;  %vm736_vm13 = vweird.f32 %v730_v32  ;;  %v740_v41 = vand.u32 2147483647, %v730_v32 }
 0x581   :  { %2113 = vpow2.f32 %v2020_v33 }
 0x582   :  { %v743_v44 = vor.u32 1.1754944e-38, %v742_v40  ;;  %vm741_vm15 = vcmp.eq.f32.partialorder %v740_v41, 8.507059e+37 }
 0x586   :  { %v2112_v15 = vpop.eup %2111 }
 0x587   :  { %v732_v34 = vmul.f32 %v2112_v15, %v730_v32  ;;  %v2114_v35 = vpop.eup %2113  ;;  %vm737_vm12 = vweird.f32 %v2112_v15 }
 0x588   :  { %v834_v37 = vadd.f32 1.0, %v2114_v35  ;;  %vm738_vm14 = vmor %vm736_vm13, %vm737_vm12 }
 0x589   :  { %v733_v36 = vsub.f32 1.0, %v732_v34 }
 0x58a   :  { %2115 = vrcp.f32 %v834_v37  ;;  %v846_v54 = vand.u32 2147483648, %v834_v37  ;;  %vm840_vm3 = vweird.f32 %v834_v37  ;;  %v844_v52 = vand.u32 2147483647, %v834_v37 }
 0x58b   :  { %v734_v38 = vmul.f32 %v2112_v15, %v733_v36 }
 0x58c   :  { %v847_v57 = vor.u32 1.1754944e-38, %v846_v54  ;;  %vm845_vm5 = vcmp.eq.f32.partialorder %v844_v52, 8.507059e+37 }
 0x58d   :  { %v735_v39 = vadd.f32 %v2112_v15, %v734_v38 }
 0x58f   :  { %v739_v43 = vsel %vm738_vm14, %v2112_v15, %v735_v39  ;;  %v107_v15 = vld [vmem:[%s2981_s0 + $0x18] sm:$0xff] }
 0x590   :  { %v2116_v42 = vpop.eup %2115  ;;  %v744_v47 = vsel %vm741_vm15, %v743_v44, %v739_v43  ;;  %1987 = vmatmul.msk.f32.gmra.mxu0 %vm99_vm0, %v107_v15 }
 0x591   :  { %v836_v46 = vmul.f32 %v2116_v42, %v834_v37  ;;  %vm841_vm2 = vweird.f32 %v2116_v42  ;;  %v751_v6 = vmul.f32 %v749_v63, %v744_v47 }
 0x592   :  { %vm842_vm4 = vmor %vm840_vm3, %vm841_vm2 }
 0x593   :  { %v837_v50 = vsub.f32 1.0, %v836_v46 }
 0x595   :  { %v838_v51 = vmul.f32 %v2116_v42, %v837_v50 }
 0x597   :  { %v839_v53 = vadd.f32 %v2116_v42, %v838_v51 }
 0x599   :  { %v843_v56 = vsel %vm842_vm4, %v2116_v42, %v839_v53 }
 0x59a   :  { %v848_v58 = vsel %vm845_vm5, %v847_v57, %v843_v56 }
 0x5dd   :  { %v754_v48 = vpop.permute.xlu0 %753 }
 0x5de   :  { %v756_v49 = vmul.f32 %v754_v48, %v744_v47 }
 0x5e0   :  { %758 = vrot.lane.b32.xlu1 %v756_v49, %s2214_s22 }
 0x5e5   :  { %v853_v1 = vpop.permute.xlu0 %852 }
 0x5e6   :  { %v855_v55 = vmul.f32 %v853_v1, %v848_v58 }
 0x5ef   :  { %v858_v59 = vpop.permute.xlu1 %857 }
 0x5f0   :  { %v860_v60 = vmul.f32 %v858_v59, %v848_v58 }
 0x5f2   :  { %862 = vrot.lane.b32.xlu2 %v860_v60, %s2214_s22 }
 0x5fa   :  { %771 = vperm.xlu2 %2068, %v769_v62  }
 0x602   :  { %879 = vrot.lane.b32.xlu2 %v2500_v17, %s2217_s15 }
 0x60d   :  { %v169_v39 = vpop.f32.mrf.mxu0 }
 0x60e   :  { %v170_v40 = vadd.f32 %v2378_v22, %v169_v39 }
 0x610   :  { %188 = vst.msk [vmem:[#allocation2 + $0x18] sm:$0xff] %vm184_vm1, %v170_v40 }
 0x617   :  { %v908_v41 = vld [vmem:[#allocation2 + $0x18] sm:$0xff] }
 0x64c   :  { %v863_v3 = vpop.permute.xlu2 %862 }
 0x64d   :  { %v865_v5 = vadd.f32 %v863_v3, %v855_v55 }
 0x64f   :  { %2117 = vtanh.f32 %v865_v5 }
 0x652   :  { %v759_v10 = vpop.permute.xlu1 %758 }
 0x653   :  { %v761_v11 = vadd.f32 %v759_v10, %v751_v6 }
 0x654   :  { %v772_v16 = vpop.permute.xlu2 %771 }
 0x655   :  { %v2118_v18 = vpop.eup %2117  ;;  %2119 = vtanh.f32 %v761_v11  ;;  %vm773_vm7 = vcmp.eq.s32.totalorder %v772_v16, 1 }
 0x656   :  { %868 = vrot.lane.b32.xlu1 %v2118_v18, %s2218_s18  ;;  %v774_v19 = vsel %vm773_vm7, %v761_v11, %v749_v63 }
 0x657   :  { %785 = vrot.lane.b32.xlu2 %v774_v19, %s2219_s19 }
 0x65b   :  { %v2120_v17 = vpop.eup %2119 }
 0x65c   :  { %764 = vrot.lane.b32.xlu0 %v2120_v17, %s2218_s18  ;;  %v880_v23 = vpop.permute.xlu2 %879 }
 0x65e   :  { %775 = vrot.lane.b32.xlu1 %v2492_v12, %s2217_s15 }
 0x664   :  { %875 = vperm.xlu0 %2069, %v873_v21  }
 0x6b1   :  { %v786_v24 = vpop.permute.xlu2 %785 }
 0x6b2   :  { %788 = vst.msk [vmem:[#allocation5] sm:$0xff] %vm99_vm0, %v786_v24 }
 0x6b9   :  { %v910_v33 = vld [vmem:[#allocation5] sm:$0xff] }
 0x6c8   :  { %v869_v25 = vpop.permute.xlu1 %868 }
 0x6c9   :  { %v871_v30 = vmul.f32 %v869_v25, %v848_v58 }
 0x6ce   :  { %v765_v26 = vpop.permute.xlu0 %764 }
 0x6cf   :  { %v767_v27 = vmul.f32 %v765_v26, %v744_v47 }
 0x6d0   :  { %v776_v28 = vpop.permute.xlu1 %775 }
 0x6d1   :  { %v2531_v29 = vsel %vm773_vm7, %v767_v27, %v776_v28 }
 0x6d2   :  { %780 = vrot.lane.b32.xlu0 %v2531_v29, %s2220_s20 }
 0x6d6   :  { %v876_v12 = vpop.permute.xlu0 %875 }
 0x6d7   :  { %vm877_vm9 = vcmp.eq.s32.totalorder %v876_v12, 1 }
 0x6d8   :  { %v2535_v31 = vsel %vm877_vm9, %v871_v30, %v880_v23  ;;  %v878_v32 = vsel %vm877_vm9, %v865_v5, %v853_v1  ;;  %v2022_v5 = vld [vmem:[%s2987_s2 + $0x18] sm:$0xff] }
 0x6d9   :  { %884 = vrot.lane.b32.xlu1 %v2535_v31, %s2220_s20  ;;  %vm976_vm14 = vcmp.gt.f32.partialorder %v2022_v5, 0.0 }
 0x6da   :  { %889 = vrot.lane.b32.xlu0 %v878_v32, %s2219_s19  ;;  %v977_v11 = vsel %vm976_vm14, 1, %v2216_v4 }
 0x6e2   :  { %956 = vrot.lane.b32.xlu0 %v910_v33, %s2214_s22 }
 0x744   :  { %v781_v34 = vpop.permute.xlu0 %780 }
 0x745   :  { %783 = vst.msk [vmem:[#allocation4] sm:$0xff] %vm99_vm0, %v781_v34  ;;  %v2576_v34 = vld [vmem:[%s2988_s3 + $0x20] sm:$0xff] }
 0x746   :  { %vm1080_vm5 = vcmp.gt.f32.partialorder %v2576_v34, 0.0 }
 0x74b   :  { %v885_v35 = vpop.permute.xlu1 %884 }
 0x74c   :  { %887 = vst.msk [vmem:[#allocation6] sm:$0xff] %vm99_vm0, %v885_v35  ;;  %v890_v36 = vpop.permute.xlu0 %889  ;;  %v2547_v37 = vld [vmem:[#allocation4] sm:$0xff] }
 0x74d   :  { %892 = vst.msk [vmem:[#allocation7] sm:$0xff] %vm99_vm0, %v890_v36  ;;  %2023 = vmatmul.msk.f32.vlgmr.msrb.gmra.mxu2 %vm99_vm0, %v2547_v37  ;;  %v1081_v36 = vsel %vm1080_vm5, 1, %v2216_v4 }
 0x74e   :  { %1344 = vmatpush.msrb.mxu2 %v2304_v7  ;;  %v1012_v7 = vld [vmem:[#allocation3 + $0x20] sm:$0xff] }
 0x750   :  { %1345 = vmatpush.msrb.mxu2 %v2313_v8 }
 0x753   :  { %v2554_v38 = vld [vmem:[#allocation6] sm:$0xff] }
 0x754   :  { %2027 = vmatmul.msk.f32.vlgmr.msrb.gmra.mxu3 %vm99_vm0, %v2554_v38  ;;  %v957_v25 = vpop.permute.xlu0 %956 }
 0x755   :  { %1448 = vmatpush.msrb.mxu3 %v2340_v13  ;;  %v1014_v13 = vld [vmem:[#allocation7] sm:$0xff] }
 0x757   :  { %1449 = vmatpush.msrb.mxu3 %v2345_v14 }
 0x7d0   :  { %v931_v42 = vpop.f32.mrf.mxu2 }
 0x7d1   :  { %v934_v43 = vadd.f32 %v931_v42, %v908_v41 }
 0x7d3   :  { %2121 = vtanh.f32 %v934_v43  ;;  %v2024_v49 = vmul.f32 -1.442695, %v934_v43 }
 0x7d7   :  { %v1035_v8 = vpop.f32.mrf.mxu3 }
 0x7d8   :  { %v1038_v44 = vadd.f32 %v1035_v8, %v1012_v7 }
 0x7d9   :  { %v2122_v46 = vpop.eup %2121 }
 0x7da   :  { %2123 = vtanh.f32 %v1038_v44  ;;  %961 = vrot.lane.b32.xlu1 %v2122_v46, %s2215_s1  ;;  %v2028_v14 = vmul.f32 -1.442695, %v1038_v44 }
 0x7dc   :  { %2125 = vpow2.f32 %v2028_v14 }
 0x7e0   :  { %v2124_v47 = vpop.eup %2123 }
 0x7e1   :  { %1065 = vrot.lane.b32.xlu2 %v2124_v47, %s2215_s1 }
 0x7e2   :  { %1060 = vrot.lane.b32.xlu1 %v1014_v13, %s2214_s22  ;;  %v2126_v22 = vpop.eup %2125 }
 0x7e3   :  { %v1042_v48 = vadd.f32 1.0, %v2126_v22  ;;  %v108_v22 = vld [vmem:[%s2981_s0 + $0x20] sm:$0xff] }
 0x7e4   :  { %1988 = vmatmul.msk.f32.gmra.mxu0 %vm99_vm0, %v108_v22 }
 0x7e5   :  { %2127 = vrcp.f32 %v1042_v48  ;;  %v1054_v58 = vand.u32 2147483648, %v1042_v48  ;;  %vm1048_vm11 = vweird.f32 %v1042_v48  ;;  %v1052_v60 = vand.u32 2147483647, %v1042_v48 }
 0x7e6   :  { %2129 = vpow2.f32 %v2024_v49 }
 0x7e7   :  { %v1055_v62 = vor.u32 1.1754944e-38, %v1054_v58  ;;  %vm1053_vm13 = vcmp.eq.f32.partialorder %v1052_v60, 8.507059e+37 }
 0x7eb   :  { %v2128_v50 = vpop.eup %2127 }
 0x7ec   :  { %v1044_v51 = vmul.f32 %v2128_v50, %v1042_v48  ;;  %v2130_v53 = vpop.eup %2129  ;;  %vm1049_vm10 = vweird.f32 %v2128_v50 }
 0x7ed   :  { %v938_v54 = vadd.f32 1.0, %v2130_v53  ;;  %vm1050_vm12 = vmor %vm1048_vm11, %vm1049_vm10 }
 0x7ee   :  { %v1045_v52 = vsub.f32 1.0, %v1044_v51  ;;  %v2614_v51 = vld [vmem:[%s2986_s8] sm:$0xff] }
 0x7ef   :  { %2131 = vrcp.f32 %v938_v54  ;;  %v950_v18 = vand.u32 2147483648, %v938_v54  ;;  %vm944_vm2 = vweird.f32 %v938_v54  ;;  %v948_v19 = vand.u32 2147483647, %v938_v54 }
 0x7f0   :  { %v1046_v56 = vmul.f32 %v2128_v50, %v1045_v52 }
 0x7f1   :  { %v951_v20 = vor.u32 1.1754944e-38, %v950_v18  ;;  %vm949_vm4 = vcmp.eq.f32.partialorder %v948_v19, 8.507059e+37 }
 0x7f2   :  { %v1047_v57 = vadd.f32 %v2128_v50, %v1046_v56  ;;  %v2626_v56 = vld [vmem:[%s2983_s5 + $0x8] sm:$0xff] }
 0x7f4   :  { %v1051_v61 = vsel %vm1050_vm12, %v2128_v50, %v1047_v57  ;;  %v2608_v50 = vld [vmem:[%s2986_s8 + $0x8] sm:$0xff]  ;;  %v2632_v57 = vld [vmem:[%s2983_s5] sm:$0xff] }
 0x7f5   :  { %v2132_v59 = vpop.eup %2131  ;;  %v1056_v55 = vsel %vm1053_vm13, %v1055_v62, %v1051_v61  ;;  %v1220_v61 = vld [vmem:[#allocation3 + $0x18] sm:$0xff] }
 0x7f6   :  { %v940_v63 = vmul.f32 %v2132_v59, %v938_v54  ;;  %vm945_vm15 = vweird.f32 %v2132_v59 }
 0x7f7   :  { %vm946_vm3 = vmor %vm944_vm2, %vm945_vm15 }
 0x7f8   :  { %v941_v6 = vsub.f32 1.0, %v940_v63 }
 0x7fa   :  { %v942_v10 = vmul.f32 %v2132_v59, %v941_v6 }
 0x7fc   :  { %v943_v16 = vadd.f32 %v2132_v59, %v942_v10 }
 0x7fe   :  { %v947_v17 = vsel %vm946_vm3, %v2132_v59, %v943_v16  ;;  %v2638_v59 = vld [vmem:[%s2984_s6] ss:$0 sm:$0xff] }
 0x7ff   :  { %v952_v23 = vsel %vm949_vm4, %v951_v20, %v947_v17 }
 0x800   :  { %v959_v26 = vmul.f32 %v957_v25, %v952_v23 }
 0x83b   :  { %v1066_v1 = vpop.permute.xlu2 %1065 }
 0x83c   :  { %v1068_v3 = vmul.f32 %v1066_v1, %v1056_v55 }
 0x83e   :  { %1070 = vrot.lane.b32.xlu0 %v1068_v3, %s2214_s22 }
 0x846   :  { %979 = vperm.xlu0 %2069, %v977_v11  }
 0x84c   :  { %v962_v21 = vpop.permute.xlu1 %961 }
 0x84d   :  { %v964_v24 = vmul.f32 %v962_v21, %v952_v23 }
 0x84e   :  { %1087 = vrot.lane.b32.xlu0 %v2554_v38, %s2217_s15 }
 0x84f   :  { %966 = vrot.lane.b32.xlu2 %v964_v24, %s2214_s22 }
 0x854   :  { %v1061_v30 = vpop.permute.xlu1 %1060 }
 0x855   :  { %v1063_v12 = vmul.f32 %v1061_v30, %v1056_v55 }
 0x861   :  { %v172_v58 = vpop.f32.mrf.mxu0 }
 0x862   :  { %v173_v60 = vadd.f32 %v2638_v59, %v172_v58 }
 0x864   :  { %189 = vst.msk [vmem:[#allocation2 + $0x20] sm:$0xff] %vm184_vm1, %v173_v60 }
 0x8a9   :  { %v967_v27 = vpop.permute.xlu2 %966 }
 0x8aa   :  { %v969_v28 = vadd.f32 %v967_v27, %v959_v26 }
 0x8ac   :  { %2133 = vtanh.f32 %v969_v28 }
 0x8b0   :  { %v1071_v32 = vpop.permute.xlu0 %1070 }
 0x8b1   :  { %v1073_v33 = vadd.f32 %v1071_v32, %v1063_v12 }
 0x8b2   :  { %v2134_v15 = vpop.eup %2133 }
 0x8b3   :  { %2135 = vtanh.f32 %v1073_v33  ;;  %972 = vrot.lane.b32.xlu1 %v2134_v15, %s2218_s18 }
 0x8b8   :  { %v980_v35 = vpop.permute.xlu0 %979 }
 0x8b9   :  { %v2136_v38 = vpop.eup %2135  ;;  %vm981_vm6 = vcmp.eq.s32.totalorder %v980_v35, 1 }
 0x8ba   :  { %1076 = vrot.lane.b32.xlu2 %v2136_v38, %s2218_s18  ;;  %v982_v39 = vsel %vm981_vm6, %v969_v28, %v957_v25 }
 0x8bb   :  { %1083 = vperm.xlu1 %2070, %v1081_v36   ;;  %993 = vrot.lane.b32.xlu0 %v982_v39, %s2219_s19 }
 0x8c0   :  { %v1088_v41 = vpop.permute.xlu0 %1087 }
 0x8c2   :  { %983 = vrot.lane.b32.xlu2 %v2547_v37, %s2217_s15 }
 0x914   :  { %v1077_v40 = vpop.permute.xlu2 %1076 }
 0x915   :  { %v1079_v44 = vmul.f32 %v1077_v40, %v1056_v55  ;;  %v1116_v55 = vld [vmem:[#allocation2 + $0x20] sm:$0xff] }
 0x91c   :  { %v984_v7 = vpop.permute.xlu2 %983 }
 0x925   :  { %v973_v42 = vpop.permute.xlu1 %972 }
 0x926   :  { %v975_v43 = vmul.f32 %v973_v42, %v952_v23 }
 0x928   :  { %v2585_v8 = vsel %vm981_vm6, %v975_v43, %v984_v7 }
 0x929   :  { %988 = vrot.lane.b32.xlu1 %v2585_v8, %s2220_s20 }
 0x92d   :  { %v1084_v46 = vpop.permute.xlu1 %1083  ;;  %v994_v47 = vpop.permute.xlu0 %993 }
 0x92e   :  { %vm1085_vm7 = vcmp.eq.s32.totalorder %v1084_v46, 1  ;;  %996 = vst.msk [vmem:[#allocation5] sm:$0xff] %vm99_vm0, %v994_v47 }
 0x92f   :  { %v2590_v13 = vsel %vm1085_vm7, %v1079_v44, %v1088_v41  ;;  %v1086_v14 = vsel %vm1085_vm7, %v1073_v33, %v1061_v30 }
 0x930   :  { %1092 = vrot.lane.b32.xlu2 %v2590_v13, %s2220_s20 }
 0x931   :  { %1097 = vrot.lane.b32.xlu1 %v1086_v14, %s2219_s19  ;;  %v2649_v14 = vld [vmem:[%s2987_s2 + $0x20] sm:$0xff] }
 0x932   :  { %vm1184_vm2 = vcmp.gt.f32.partialorder %v2649_v14, 0.0 }
 0x935   :  { %v1118_v37 = vld [vmem:[#allocation5] sm:$0xff] }
 0x939   :  { %1164 = vrot.lane.b32.xlu1 %v1118_v37, %s2214_s22  ;;  %v1185_v37 = vsel %vm1184_vm2, 1, %v2216_v4 }
 0x98a   :  { %v1093_v48 = vpop.permute.xlu2 %1092 }
 0x98b   :  { %1095 = vst.msk [vmem:[#allocation6] sm:$0xff] %vm99_vm0, %v1093_v48 }
 0x992   :  { %v2601_v49 = vld [vmem:[#allocation6] sm:$0xff] }
 0x993   :  { %2035 = vmatmul.msk.f32.vlgmr.msra.gmra.mxu3 %vm99_vm0, %v2601_v49 }
 0x994   :  { %1656 = vmatpush.msra.mxu3 %v2608_v50 }
 0x996   :  { %1657 = vmatpush.msra.mxu3 %v2614_v51 }
 0x99b   :  { %v989_v53 = vpop.permute.xlu1 %988 }
 0x99c   :  { %991 = vst.msk [vmem:[#allocation4] sm:$0xff] %vm99_vm0, %v989_v53 }
 0x9a3   :  { %v1098_v54 = vpop.permute.xlu1 %1097  ;;  %v2618_v52 = vld [vmem:[#allocation4] sm:$0xff] }
 0x9a4   :  { %1100 = vst.msk [vmem:[#allocation7] sm:$0xff] %vm99_vm0, %v1098_v54  ;;  %2031 = vmatmul.msk.f32.vlgmr.msra.gmra.mxu2 %vm99_vm0, %v2618_v52 }
 0x9a5   :  { %1552 = vmatpush.msra.mxu2 %v2626_v56 }
 0x9a7   :  { %1553 = vmatpush.msra.mxu2 %v2632_v57 }
 0x9ab   :  { %v1222_v10 = vld [vmem:[#allocation7] sm:$0xff]  ;;  %v1165_v22 = vpop.permute.xlu1 %1164 }
 0xa16   :  { %v1243_v62 = vpop.f32.mrf.mxu3 }
 0xa17   :  { %v1246_v63 = vadd.f32 %v1243_v62, %v1220_v61 }
 0xa19   :  { %2137 = vtanh.f32 %v1246_v63  ;;  %v2036_v16 = vmul.f32 -1.442695, %v1246_v63 }
 0xa1f   :  { %v2138_v1 = vpop.eup %2137 }
 0xa20   :  { %1273 = vrot.lane.b32.xlu0 %v2138_v1, %s2215_s1  ;;  %v2659_v1 = vld [vmem:[%s2988_s3 + $0x18] sm:$0xff] }
 0xa21   :  { %vm1288_vm3 = vcmp.gt.f32.partialorder %v2659_v1, 0.0 }
 0xa27   :  { %v1139_v3 = vpop.f32.mrf.mxu2 }
 0xa28   :  { %v1142_v5 = vadd.f32 %v1139_v3, %v1116_v55  ;;  %v1289_v55 = vsel %vm1288_vm3, 1, %v2216_v4 }
 0xa2a   :  { %2139 = vtanh.f32 %v1142_v5  ;;  %v2032_v11 = vmul.f32 -1.442695, %v1142_v5 }
 0xa2c   :  { %2141 = vpow2.f32 %v2032_v11 }
 0xa2d   :  { %2143 = vpow2.f32 %v2036_v16 }
 0xa30   :  { %v2140_v6 = vpop.eup %2139 }
 0xa31   :  { %1169 = vrot.lane.b32.xlu2 %v2140_v6, %s2215_s1 }
 0xa32   :  { %v2142_v18 = vpop.eup %2141 }
 0xa33   :  { %v1146_v19 = vadd.f32 1.0, %v2142_v18  ;;  %v2144_v17 = vpop.eup %2143 }
 0xa34   :  { %v1250_v20 = vadd.f32 1.0, %v2144_v17 }
 0xa35   :  { %2145 = vrcp.f32 %v1146_v19  ;;  %v1158_v12 = vand.u32 2147483648, %v1146_v19  ;;  %vm1152_vm9 = vweird.f32 %v1146_v19  ;;  %v1156_v32 = vand.u32 2147483647, %v1146_v19 }
 0xa36   :  { %2147 = vrcp.f32 %v1250_v20  ;;  %v1262_v41 = vand.u32 2147483648, %v1250_v20  ;;  %vm1256_vm13 = vweird.f32 %v1250_v20  ;;  %v1260_v42 = vand.u32 2147483647, %v1250_v20 }
 0xa37   :  { %v1159_v35 = vor.u32 1.1754944e-38, %v1158_v12  ;;  %vm1157_vm11 = vcmp.eq.f32.partialorder %v1156_v32, 8.507059e+37 }
 0xa38   :  { %v1263_v7 = vor.u32 1.1754944e-38, %v1262_v41  ;;  %vm1261_vm15 = vcmp.eq.f32.partialorder %v1260_v42, 8.507059e+37 }
 0xa39   :  { %1268 = vrot.lane.b32.xlu2 %v1222_v10, %s2214_s22 }
 0xa3b   :  { %v2146_v21 = vpop.eup %2145 }
 0xa3c   :  { %v1148_v23 = vmul.f32 %v2146_v21, %v1146_v19  ;;  %v2148_v24 = vpop.eup %2147  ;;  %vm1153_vm8 = vweird.f32 %v2146_v21 }
 0xa3d   :  { %v1252_v26 = vmul.f32 %v2148_v24, %v1250_v20  ;;  %vm1154_vm10 = vmor %vm1152_vm9, %vm1153_vm8  ;;  %vm1257_vm12 = vweird.f32 %v2148_v24 }
 0xa3e   :  { %v1149_v25 = vsub.f32 1.0, %v1148_v23  ;;  %vm1258_vm14 = vmor %vm1256_vm13, %vm1257_vm12 }
 0xa3f   :  { %v1253_v28 = vsub.f32 1.0, %v1252_v26 }
 0xa40   :  { %v1150_v27 = vmul.f32 %v2146_v21, %v1149_v25  ;;  %v109_v25 = vld [vmem:[%s2981_s0 + $0x28] sm:$0xff] }
 0xa41   :  { %v1254_v33 = vmul.f32 %v2148_v24, %v1253_v28  ;;  %1989 = vmatmul.msk.f32.gmra.mxu0 %vm99_vm0, %v109_v25 }
 0xa42   :  { %v1151_v30 = vadd.f32 %v2146_v21, %v1150_v27 }
 0xa43   :  { %v1255_v39 = vadd.f32 %v2148_v24, %v1254_v33 }
 0xa44   :  { %v1155_v15 = vsel %vm1154_vm10, %v2146_v21, %v1151_v30 }
 0xa45   :  { %v1160_v36 = vsel %vm1157_vm11, %v1159_v35, %v1155_v15  ;;  %v1259_v43 = vsel %vm1258_vm14, %v2148_v24, %v1255_v39 }
 0xa46   :  { %v1264_v44 = vsel %vm1261_vm15, %v1263_v7, %v1259_v43  ;;  %v1167_v48 = vmul.f32 %v1165_v22, %v1160_v36 }
 0xa8b   :  { %v1170_v38 = vpop.permute.xlu2 %1169 }
 0xa8c   :  { %v1172_v40 = vmul.f32 %v1170_v38, %v1160_v36  ;;  %v1428_v38 = vld [vmem:[#allocation3 + $0x10] sm:$0xff] }
 0xa8e   :  { %1174 = vrot.lane.b32.xlu0 %v1172_v40, %s2214_s22 }
 0xa92   :  { %v1274_v46 = vpop.permute.xlu0 %1273 }
 0xa93   :  { %v1276_v47 = vmul.f32 %v1274_v46, %v1264_v44  ;;  %v1269_v58 = vpop.permute.xlu2 %1268 }
 0xa94   :  { %v1271_v60 = vmul.f32 %v1269_v58, %v1264_v44 }
 0xa95   :  { %1278 = vrot.lane.b32.xlu1 %v1276_v47, %s2214_s22 }
 0xa9d   :  { %1187 = vperm.xlu1 %2070, %v1185_v37  }
 0xaa5   :  { %1295 = vrot.lane.b32.xlu1 %v2601_v49, %s2217_s15 }
 0xabe   :  { %v175_v32 = vpop.f32.mrf.mxu0 }
 0xabf   :  { %v176_v33 = vadd.f32 %v2638_v59, %v175_v32 }
 0xac1   :  { %190 = vst.msk [vmem:[#allocation2 + $0x28] sm:$0xff] %vm184_vm1, %v176_v33 }
 0xb00   :  { %v1175_v53 = vpop.permute.xlu0 %1174 }
 0xb01   :  { %v1177_v54 = vadd.f32 %v1175_v53, %v1167_v48 }
 0xb03   :  { %2149 = vtanh.f32 %v1177_v54 }
 0xb07   :  { %v1279_v61 = vpop.permute.xlu1 %1278 }
 0xb08   :  { %v1281_v62 = vadd.f32 %v1279_v61, %v1271_v60 }
 0xb09   :  { %v2150_v63 = vpop.eup %2149 }
 0xb0a   :  { %2151 = vtanh.f32 %v1281_v62  ;;  %1180 = vrot.lane.b32.xlu2 %v2150_v63, %s2218_s18 }
 0xb0f   :  { %v1188_v49 = vpop.permute.xlu1 %1187 }
 0xb10   :  { %v2152_v3 = vpop.eup %2151  ;;  %vm1189_vm4 = vcmp.eq.s32.totalorder %v1188_v49, 1 }
 0xb11   :  { %1284 = vrot.lane.b32.xlu0 %v2152_v3, %s2218_s18  ;;  %v1190_v5 = vsel %vm1189_vm4, %v1177_v54, %v1165_v22 }
 0xb12   :  { %1201 = vrot.lane.b32.xlu1 %v1190_v5, %s2219_s19  ;;  %1291 = vperm.xlu2 %2068, %v1289_v55  }
 0xb17   :  { %v1296_v10 = vpop.permute.xlu1 %1295 }
 0xb19   :  { %1191 = vrot.lane.b32.xlu0 %v2618_v52, %s2217_s15 }
 0xb64   :  { %v1181_v6 = vpop.permute.xlu2 %1180 }
 0xb65   :  { %v1183_v20 = vmul.f32 %v1181_v6, %v1160_v36 }
 0xb6c   :  { %v1292_v11 = vpop.permute.xlu2 %1291 }
 0xb6d   :  { %vm1293_vm5 = vcmp.eq.s32.totalorder %v1292_v11, 1 }
 0xb6e   :  { %v1294_v52 = vsel %vm1293_vm5, %v1281_v62, %v1269_v58 }
 0xb83   :  { %v1285_v16 = vpop.permute.xlu0 %1284 }
 0xb84   :  { %v1287_v18 = vmul.f32 %v1285_v16, %v1264_v44  ;;  %v1202_v19 = vpop.permute.xlu1 %1201 }
 0xb85   :  { %1204 = vst.msk [vmem:[#allocation5] sm:$0xff] %vm99_vm0, %v1202_v19 }
 0xb86   :  { %v2670_v17 = vsel %vm1293_vm5, %v1287_v18, %v1296_v10 }
 0xb87   :  { %1300 = vrot.lane.b32.xlu0 %v2670_v17, %s2220_s20 }
 0xb8b   :  { %v1192_v21 = vpop.permute.xlu0 %1191 }
 0xb8c   :  { %v2675_v23 = vsel %vm1189_vm4, %v1183_v20, %v1192_v21  ;;  %v1326_v24 = vld [vmem:[#allocation5] sm:$0xff] }
 0xb8d   :  { %1196 = vrot.lane.b32.xlu2 %v2675_v23, %s2220_s20 }
 0xb95   :  { %1305 = vrot.lane.b32.xlu2 %v1294_v52, %s2219_s19  ;;  %v2709_v52 = vld [vmem:[%s2987_s2 + $0x28] sm:$0xff] }
 0xb96   :  { %vm1392_vm14 = vcmp.gt.f32.partialorder %v2709_v52, 0.0 }
 0xb9d   :  { %1372 = vrot.lane.b32.xlu2 %v1326_v24, %s2214_s22  ;;  %v1393_v24 = vsel %vm1392_vm14, 1, %v2216_v4 }
 0xbe7   :  { %v1197_v26 = vpop.permute.xlu2 %1196 }
 0xbe8   :  { %1199 = vst.msk [vmem:[#allocation4] sm:$0xff] %vm99_vm0, %v1197_v26 }
 0xbef   :  { %v1306_v27 = vpop.permute.xlu2 %1305  ;;  %v2686_v28 = vld [vmem:[#allocation4] sm:$0xff] }
 0xbf0   :  { %1308 = vst.msk [vmem:[#allocation7] sm:$0xff] %vm99_vm0, %v1306_v27  ;;  %2039 = vmatmul.msk.f32.vlgmr.msrb.gmra.mxu2 %vm99_vm0, %v2686_v28 }
 0xbf1   :  { %1760 = vmatpush.msrb.mxu2 %v2626_v56  ;;  %v1324_v56 = vld [vmem:[#allocation2 + $0x28] sm:$0xff] }
 0xbf3   :  { %1761 = vmatpush.msrb.mxu2 %v2632_v57 }
 0xbf7   :  { %v1430_v36 = vld [vmem:[#allocation7] sm:$0xff]  ;;  %v1373_v25 = vpop.permute.xlu2 %1372 }
 0xbf9   :  { %v1301_v30 = vpop.permute.xlu0 %1300 }
 0xbfa   :  { %1303 = vst.msk [vmem:[#allocation6] sm:$0xff] %vm99_vm0, %v1301_v30 }
 0xc01   :  { %v2694_v12 = vld [vmem:[#allocation6] sm:$0xff] }
 0xc02   :  { %2043 = vmatmul.msk.f32.vlgmr.msrb.gmra.mxu3 %vm99_vm0, %v2694_v12 }
 0xc03   :  { %1862 = vmatpush.msrb.mxu3 %v2608_v50 }
 0xc05   :  { %1863 = vmatpush.msrb.mxu3 %v2614_v51 }
 0xc73   :  { %v1347_v15 = vpop.f32.mrf.mxu2 }
 0xc74   :  { %v1350_v57 = vadd.f32 %v1347_v15, %v1324_v56 }
 0xc76   :  { %2153 = vtanh.f32 %v1350_v57  ;;  %v2040_v40 = vmul.f32 -1.442695, %v1350_v57 }
 0xc7c   :  { %v2154_v35 = vpop.eup %2153 }
 0xc7d   :  { %1377 = vrot.lane.b32.xlu0 %v2154_v35, %s2215_s1 }
 0xc85   :  { %1476 = vrot.lane.b32.xlu0 %v1430_v36, %s2214_s22  ;;  %v1451_v39 = vpop.f32.mrf.mxu3 }
 0xc86   :  { %v1454_v50 = vadd.f32 %v1451_v39, %v1428_v38  ;;  %v2722_v38 = vld [vmem:[%s2988_s3 + $0x10] sm:$0xff] }
 0xc87   :  { %vm1496_vm2 = vcmp.gt.f32.partialorder %v2722_v38, 0.0 }
 0xc88   :  { %2155 = vtanh.f32 %v1454_v50  ;;  %v2044_v43 = vmul.f32 -1.442695, %v1454_v50  ;;  %v1497_v39 = vsel %vm1496_vm2, 1, %v2216_v4 }
 0xc89   :  { %2157 = vpow2.f32 %v2040_v40 }
 0xc8e   :  { %v2156_v51 = vpop.eup %2155 }
 0xc8f   :  { %1481 = vrot.lane.b32.xlu1 %v2156_v51, %s2215_s1  ;;  %v2158_v41 = vpop.eup %2157 }
 0xc90   :  { %v1354_v42 = vadd.f32 1.0, %v2158_v41 }
 0xc92   :  { %2159 = vrcp.f32 %v1354_v42  ;;  %v1366_v53 = vand.u32 2147483648, %v1354_v42  ;;  %vm1360_vm7 = vweird.f32 %v1354_v42  ;;  %v1364_v54 = vand.u32 2147483647, %v1354_v42 }
 0xc93   :  { %2161 = vpow2.f32 %v2044_v43 }
 0xc94   :  { %v1367_v61 = vor.u32 1.1754944e-38, %v1366_v53  ;;  %vm1365_vm9 = vcmp.eq.f32.partialorder %v1364_v54, 8.507059e+37 }
 0xc98   :  { %v2160_v7 = vpop.eup %2159 }
 0xc99   :  { %v1356_v44 = vmul.f32 %v2160_v7, %v1354_v42  ;;  %v2162_v46 = vpop.eup %2161  ;;  %vm1361_vm6 = vweird.f32 %v2160_v7 }
 0xc9a   :  { %v1458_v37 = vadd.f32 1.0, %v2162_v46  ;;  %vm1362_vm8 = vmor %vm1360_vm7, %vm1361_vm6 }
 0xc9b   :  { %v1357_v47 = vsub.f32 1.0, %v1356_v44 }
 0xc9c   :  { %2163 = vrcp.f32 %v1458_v37  ;;  %v1470_v10 = vand.u32 2147483648, %v1458_v37  ;;  %vm1464_vm11 = vweird.f32 %v1458_v37  ;;  %v1468_v11 = vand.u32 2147483647, %v1458_v37 }
 0xc9d   :  { %v1358_v22 = vmul.f32 %v2160_v7, %v1357_v47 }
 0xc9e   :  { %v1471_v18 = vor.u32 1.1754944e-38, %v1470_v10  ;;  %vm1469_vm13 = vcmp.eq.f32.partialorder %v1468_v11, 8.507059e+37 }
 0xc9f   :  { %v1359_v48 = vadd.f32 %v2160_v7, %v1358_v22  ;;  %v110_v22 = vld [vmem:[%s2981_s0 + $0x30] sm:$0xff] }
 0xca0   :  { %1990 = vmatmul.msk.f32.gmra.mxu0 %vm99_vm0, %v110_v22 }
 0xca1   :  { %v1363_v60 = vsel %vm1362_vm8, %v2160_v7, %v1359_v48 }
 0xca2   :  { %v2164_v58 = vpop.eup %2163  ;;  %v1368_v63 = vsel %vm1365_vm9, %v1367_v61, %v1363_v60 }
 0xca3   :  { %v1460_v62 = vmul.f32 %v2164_v58, %v1458_v37  ;;  %vm1465_vm10 = vweird.f32 %v2164_v58  ;;  %v1375_v33 = vmul.f32 %v1373_v25, %v1368_v63 }
 0xca4   :  { %vm1466_vm12 = vmor %vm1464_vm11, %vm1465_vm10 }
 0xca5   :  { %v1461_v3 = vsub.f32 1.0, %v1460_v62 }
 0xca7   :  { %v1462_v5 = vmul.f32 %v2164_v58, %v1461_v3  ;;  %v1636_v3 = vld [vmem:[#allocation3 + $0x8] sm:$0xff] }
 0xca9   :  { %v1463_v6 = vadd.f32 %v2164_v58, %v1462_v5 }
 0xcab   :  { %v1467_v16 = vsel %vm1466_vm12, %v2164_v58, %v1463_v6 }
 0xcac   :  { %v1472_v19 = vsel %vm1469_vm13, %v1471_v18, %v1467_v16 }
 0xcef   :  { %v1378_v49 = vpop.permute.xlu0 %1377 }
 0xcf0   :  { %v1380_v55 = vmul.f32 %v1378_v49, %v1368_v63 }
 0xcf2   :  { %1382 = vrot.lane.b32.xlu1 %v1380_v55, %s2214_s22 }
 0xcf7   :  { %v1477_v26 = vpop.permute.xlu0 %1476 }
 0xcf8   :  { %v1479_v27 = vmul.f32 %v1477_v26, %v1472_v19 }
 0xd01   :  { %v1482_v20 = vpop.permute.xlu1 %1481 }
 0xd02   :  { %v1484_v21 = vmul.f32 %v1482_v20, %v1472_v19 }
 0xd04   :  { %1486 = vrot.lane.b32.xlu2 %v1484_v21, %s2214_s22 }
 0xd0c   :  { %1395 = vperm.xlu2 %2068, %v1393_v24  }
 0xd14   :  { %1503 = vrot.lane.b32.xlu2 %v2694_v12, %s2217_s15 }
 0xd1d   :  { %v178_v61 = vpop.f32.mrf.mxu0 }
 0xd1e   :  { %v179_v62 = vadd.f32 %v2638_v59, %v178_v61  ;;  %v2206_v61 = vld [vmem:[%s2987_s2] sm:$0xff] }
 0xd20   :  { %191 = vst.msk [vmem:[#allocation2 + $0x30] sm:$0xff] %vm184_vm1, %v179_v62 }
 0xd5e   :  { %v1487_v30 = vpop.permute.xlu2 %1486 }
 0xd5f   :  { %v1489_v32 = vadd.f32 %v1487_v30, %v1479_v27 }
 0xd61   :  { %2165 = vtanh.f32 %v1489_v32 }
 0xd64   :  { %v1383_v56 = vpop.permute.xlu1 %1382 }
 0xd65   :  { %v1385_v15 = vadd.f32 %v1383_v56, %v1375_v33 }
 0xd66   :  { %v1396_v57 = vpop.permute.xlu2 %1395 }
 0xd67   :  { %v2166_v35 = vpop.eup %2165  ;;  %2167 = vtanh.f32 %v1385_v15  ;;  %vm1397_vm15 = vcmp.eq.s32.totalorder %v1396_v57, 1 }
 0xd68   :  { %1492 = vrot.lane.b32.xlu1 %v2166_v35, %s2218_s18  ;;  %v1398_v36 = vsel %vm1397_vm15, %v1385_v15, %v1373_v25 }
 0xd69   :  { %1409 = vrot.lane.b32.xlu2 %v1398_v36, %s2219_s19 }
 0xd6d   :  { %v2168_v12 = vpop.eup %2167 }
 0xd6e   :  { %1388 = vrot.lane.b32.xlu0 %v2168_v12, %s2218_s18  ;;  %v1504_v50 = vpop.permute.xlu2 %1503 }
 0xd70   :  { %1399 = vrot.lane.b32.xlu1 %v2686_v28, %s2217_s15 }
 0xd76   :  { %1499 = vperm.xlu0 %2069, %v1497_v39  }
 0xdc3   :  { %v1410_v51 = vpop.permute.xlu2 %1409 }
 0xdc4   :  { %1412 = vst.msk [vmem:[#allocation5] sm:$0xff] %vm99_vm0, %v1410_v51 }
 0xdcb   :  { %v1534_v37 = vld [vmem:[#allocation5] sm:$0xff] }
 0xdda   :  { %v1493_v40 = vpop.permute.xlu1 %1492 }
 0xddb   :  { %v1495_v28 = vmul.f32 %v1493_v40, %v1472_v19  ;;  %v2764_v40 = vld [vmem:[%s2987_s2 + $0x30] sm:$0xff] }
 0xddc   :  { %vm1600_vm8 = vcmp.gt.f32.partialorder %v2764_v40, 0.0 }
 0xde0   :  { %v1389_v41 = vpop.permute.xlu0 %1388 }
 0xde1   :  { %v1391_v42 = vmul.f32 %v1389_v41, %v1368_v63  ;;  %v1532_v63 = vld [vmem:[#allocation2 + $0x30] sm:$0xff] }
 0xde2   :  { %v1400_v43 = vpop.permute.xlu1 %1399 }
 0xde3   :  { %v2731_v7 = vsel %vm1397_vm15, %v1391_v42, %v1400_v43  ;;  %v1601_v43 = vsel %vm1600_vm8, 1, %v2216_v4 }
 0xde4   :  { %1404 = vrot.lane.b32.xlu0 %v2731_v7, %s2220_s20 }
 0xde8   :  { %v1500_v44 = vpop.permute.xlu0 %1499 }
 0xde9   :  { %vm1501_vm3 = vcmp.eq.s32.totalorder %v1500_v44, 1 }
 0xdea   :  { %v2735_v46 = vsel %vm1501_vm3, %v1495_v28, %v1504_v50  ;;  %v1502_v47 = vsel %vm1501_vm3, %v1489_v32, %v1477_v26 }
 0xdeb   :  { %1508 = vrot.lane.b32.xlu1 %v2735_v46, %s2220_s20 }
 0xdec   :  { %1513 = vrot.lane.b32.xlu0 %v1502_v47, %s2219_s19 }
 0xdf4   :  { %1580 = vrot.lane.b32.xlu0 %v1534_v37, %s2214_s22 }
 0xe56   :  { %v1405_v48 = vpop.permute.xlu0 %1404 }
 0xe57   :  { %1407 = vst.msk [vmem:[#allocation4] sm:$0xff] %vm99_vm0, %v1405_v48 }
 0xe5d   :  { %v1509_v53 = vpop.permute.xlu1 %1508 }
 0xe5e   :  { %1511 = vst.msk [vmem:[#allocation6] sm:$0xff] %vm99_vm0, %v1509_v53  ;;  %v1514_v54 = vpop.permute.xlu0 %1513  ;;  %v2747_v58 = vld [vmem:[#allocation4] sm:$0xff] }
 0xe5f   :  { %1516 = vst.msk [vmem:[#allocation7] sm:$0xff] %vm99_vm0, %v1514_v54  ;;  %2047 = vmatmul.msk.f32.vlgmr.msra.gmra.mxu2 %vm99_vm0, %v2747_v58 }
 0xe65   :  { %v2752_v60 = vld [vmem:[#allocation6] sm:$0xff] }
 0xe66   :  { %2051 = vmatmul.msk.f32.vlgmr.msra.gmra.mxu3 %vm99_vm0, %v2752_v60  ;;  %v1638_v16 = vld [vmem:[#allocation7] sm:$0xff]  ;;  %v1581_v62 = vpop.permute.xlu0 %1580 }
 0xee2   :  { %v1555_v49 = vpop.f32.mrf.mxu2 }
 0xee3   :  { %v1558_v55 = vadd.f32 %v1555_v49, %v1532_v63 }
 0xee5   :  { %2169 = vtanh.f32 %v1558_v55  ;;  %v2048_v21 = vmul.f32 -1.442695, %v1558_v55 }
 0xee9   :  { %v1659_v5 = vpop.f32.mrf.mxu3 }
 0xeea   :  { %v1662_v6 = vadd.f32 %v1659_v5, %v1636_v3 }
 0xeeb   :  { %v2170_v10 = vpop.eup %2169 }
 0xeec   :  { %2171 = vtanh.f32 %v1662_v6  ;;  %1585 = vrot.lane.b32.xlu1 %v2170_v10, %s2215_s1  ;;  %v2052_v18 = vmul.f32 -1.442695, %v1662_v6 }
 0xeee   :  { %2173 = vpow2.f32 %v2052_v18 }
 0xef2   :  { %v2172_v11 = vpop.eup %2171 }
 0xef3   :  { %1689 = vrot.lane.b32.xlu2 %v2172_v11, %s2215_s1 }
 0xef4   :  { %1684 = vrot.lane.b32.xlu1 %v1638_v16, %s2214_s22  ;;  %v2174_v19 = vpop.eup %2173 }
 0xef5   :  { %v1666_v20 = vadd.f32 1.0, %v2174_v19 }
 0xef7   :  { %2175 = vrcp.f32 %v1666_v20  ;;  %v1678_v56 = vand.u32 2147483648, %v1666_v20  ;;  %vm1672_vm5 = vweird.f32 %v1666_v20  ;;  %v1676_v57 = vand.u32 2147483647, %v1666_v20 }
 0xef8   :  { %2177 = vpow2.f32 %v2048_v21 }
 0xef9   :  { %v1679_v36 = vor.u32 1.1754944e-38, %v1678_v56  ;;  %vm1677_vm7 = vcmp.eq.f32.partialorder %v1676_v57, 8.507059e+37  ;;  %v2208_v57 = vld [vmem:[%s2987_s2 + $0x8] sm:$0xff] }
 0xefd   :  { %v2176_v24 = vpop.eup %2175 }
 0xefe   :  { %v1668_v25 = vmul.f32 %v2176_v24, %v1666_v20  ;;  %v2178_v26 = vpop.eup %2177  ;;  %vm1673_vm4 = vweird.f32 %v2176_v24 }
 0xeff   :  { %v1562_v27 = vadd.f32 1.0, %v2178_v26  ;;  %vm1674_vm6 = vmor %vm1672_vm5, %vm1673_vm4 }
 0xf00   :  { %v1669_v30 = vsub.f32 1.0, %v1668_v25 }
 0xf01   :  { %2179 = vrcp.f32 %v1562_v27  ;;  %v1574_v44 = vand.u32 2147483648, %v1562_v27  ;;  %vm1568_vm10 = vweird.f32 %v1562_v27  ;;  %v1572_v47 = vand.u32 2147483647, %v1562_v27 }
 0xf02   :  { %v1670_v32 = vmul.f32 %v2176_v24, %v1669_v30 }
 0xf03   :  { %v1575_v22 = vor.u32 1.1754944e-38, %v1574_v44  ;;  %vm1573_vm12 = vcmp.eq.f32.partialorder %v1572_v47, 8.507059e+37  ;;  %v2209_v47 = vld [vmem:[%s2988_s3 + $0x30] sm:$0xff] }
 0xf04   :  { %v1671_v33 = vadd.f32 %v2176_v24, %v1670_v32 }
 0xf06   :  { %v1675_v35 = vsel %vm1674_vm6, %v2176_v24, %v1671_v33 }
 0xf07   :  { %v2180_v15 = vpop.eup %2179  ;;  %v1680_v50 = vsel %vm1677_vm7, %v1679_v36, %v1675_v35  ;;  %v111_v35 = vld [vmem:[%s2981_s0 + $0x38] sm:$0xff] }
 0xf08   :  { %v1564_v12 = vmul.f32 %v2180_v15, %v1562_v27  ;;  %vm1569_vm9 = vweird.f32 %v2180_v15  ;;  %1991 = vmatmul.msk.f32.gmra.mxu0 %vm99_vm0, %v111_v35 }
 0xf09   :  { %vm1570_vm11 = vmor %vm1568_vm10, %vm1569_vm9 }
 0xf0a   :  { %v1565_v41 = vsub.f32 1.0, %v1564_v12 }
 0xf0c   :  { %v1566_v42 = vmul.f32 %v2180_v15, %v1565_v41 }
 0xf0e   :  { %v1567_v28 = vadd.f32 %v2180_v15, %v1566_v42 }
 0xf10   :  { %v1571_v37 = vsel %vm1570_vm11, %v2180_v15, %v1567_v28  ;;  %v2207_v15 = vld [vmem:[%s2988_s3 + $0x38] sm:$0xff] }
 0xf11   :  { %v1576_v53 = vsel %vm1573_vm12, %v1575_v22, %v1571_v37 }
 0xf12   :  { %v1583_v63 = vmul.f32 %v1581_v62, %v1576_v53 }
 0xf4d   :  { %v1690_v39 = vpop.permute.xlu2 %1689 }
 0xf4e   :  { %v1692_v51 = vmul.f32 %v1690_v39, %v1680_v50 }
 0xf50   :  { %1694 = vrot.lane.b32.xlu0 %v1692_v51, %s2214_s22 }
 0xf58   :  { %1603 = vperm.xlu0 %2069, %v1601_v43  }
 0xf5e   :  { %v1586_v48 = vpop.permute.xlu1 %1585 }
 0xf5f   :  { %v1588_v54 = vmul.f32 %v1586_v48, %v1576_v53 }
 0xf60   :  { %1711 = vrot.lane.b32.xlu0 %v2752_v60, %s2217_s15  ;;  %v2778_v60 = vld [vmem:[%s2988_s3 + $0x8] sm:$0xff] }
 0xf61   :  { %1590 = vrot.lane.b32.xlu2 %v1588_v54, %s2214_s22  ;;  %vm1704_vm13 = vcmp.gt.f32.partialorder %v2778_v60, 0.0 }
 0xf62   :  { %v1705_v16 = vsel %vm1704_vm13, 1, %v2216_v4 }
 0xf66   :  { %v1685_v3 = vpop.permute.xlu1 %1684 }
 0xf67   :  { %v1687_v5 = vmul.f32 %v1685_v3, %v1680_v50 }
 0xf68   :  { %376 = vperm.xlu0 %2069, %v2206_v61  }
 0xf85   :  { %v181_v37 = vpop.f32.mrf.mxu0 }
 0xf86   :  { %v182_v22 = vadd.f32 %v2638_v59, %v181_v37 }
 0xf88   :  { %192 = vst.msk [vmem:[#allocation2 + $0x38] sm:$0xff] %vm184_vm1, %v182_v22 }
 0xf8f   :  { %v1740_v59 = vld [vmem:[#allocation2 + $0x38] sm:$0xff] }
 0xfbb   :  { %v1591_v49 = vpop.permute.xlu2 %1590 }
 0xfbc   :  { %v1593_v55 = vadd.f32 %v1591_v49, %v1583_v63 }
 0xfbe   :  { %2181 = vtanh.f32 %v1593_v55 }
 0xfc2   :  { %v1695_v6 = vpop.permute.xlu0 %1694 }
 0xfc3   :  { %v1697_v10 = vadd.f32 %v1695_v6, %v1687_v5 }
 0xfc4   :  { %v2182_v11 = vpop.eup %2181 }
 0xfc5   :  { %2183 = vtanh.f32 %v1697_v10  ;;  %1596 = vrot.lane.b32.xlu1 %v2182_v11, %s2218_s18  ;;  %v2211_v11 = vld [vmem:[%s2988_s3 + $0x28] sm:$0xff] }
 0xfca   :  { %v1604_v19 = vpop.permute.xlu0 %1603 }
 0xfcb   :  { %v2184_v18 = vpop.eup %2183  ;;  %vm1605_vm14 = vcmp.eq.s32.totalorder %v1604_v19, 1 }
 0xfcc   :  { %1700 = vrot.lane.b32.xlu2 %v2184_v18, %s2218_s18 }
 0xfcd   :  { %1707 = vperm.xlu1 %2070, %v1705_v16  }
 0xfd2   :  { %v1712_v21 = vpop.permute.xlu0 %1711 }
 0xfd4   :  { %1607 = vrot.lane.b32.xlu2 %v2747_v58, %s2217_s15 }
 0xfda   :  { %v377_v30 = vpop.permute.xlu0 %376 }
 0xfdb   :  { %v379_v56 = vmul.f32 %v377_v30, %v2427_v9  ;;  %v1606_v9 = vsel %vm1605_vm14, %v1593_v55, %v1581_v62 }
0x1026   :  { %v1701_v20 = vpop.permute.xlu2 %1700 }
0x1027   :  { %v1703_v32 = vmul.f32 %v1701_v20, %v1680_v50 }
0x102e   :  { %v1608_v26 = vpop.permute.xlu2 %1607 }
0x1037   :  { %v1597_v24 = vpop.permute.xlu1 %1596 }
0x1038   :  { %v1599_v25 = vmul.f32 %v1597_v24, %v1576_v53 }
0x103a   :  { %v2787_v27 = vsel %vm1605_vm14, %v1599_v25, %v1608_v26 }
0x103b   :  { %1612 = vrot.lane.b32.xlu1 %v2787_v27, %s2220_s20 }
0x103f   :  { %v1708_v33 = vpop.permute.xlu1 %1707 }
0x1040   :  { %vm1709_vm15 = vcmp.eq.s32.totalorder %v1708_v33, 1 }
0x1041   :  { %v2793_v58 = vsel %vm1709_vm15, %v1703_v32, %v1712_v21  ;;  %v1710_v42 = vsel %vm1709_vm15, %v1697_v10, %v1685_v3  ;;  %v2210_v3 = vld [vmem:[%s2987_s2 + $0x10] sm:$0xff] }
0x1042   :  { %1716 = vrot.lane.b32.xlu2 %v2793_v58, %s2220_s20 }
0x1043   :  { %381 = vrot.lane.b32.xlu1 %v379_v56, %s2220_s20 }
0x104a   :  { %479 = vperm.xlu2 %2068, %v2207_v15  }
0x104b   :  { %583 = vperm.xlu1 %2070, %v2208_v57  }
0x1052   :  { %1617 = vrot.lane.b32.xlu2 %v1606_v9, %s2219_s19 }
0x109c   :  { %v1717_v36 = vpop.permute.xlu2 %1716 }
0x109d   :  { %1719 = vst.msk [vmem:[#allocation6] sm:$0xff] %vm99_vm0, %v1717_v36 }
0x10a4   :  { %v480_v12 = vpop.permute.xlu2 %479  ;;  %v2811_v39 = vld [vmem:[#allocation6] sm:$0xff] }
0x10a5   :  { %v482_v50 = vmul.f32 %v480_v12, %v2421_v45  ;;  %2058 = vmatmul.msk.f32.vlgmr.msrb.gmra.mxu3 %vm99_vm0, %v2811_v39 }
0x10a7   :  { %484 = vrot.lane.b32.xlu0 %v482_v50, %s2220_s20 }
0x10ac   :  { %v1618_v51 = vpop.permute.xlu2 %1617 }
0x10ad   :  { %1620 = vst.msk [vmem:[#allocation5] sm:$0xff] %vm99_vm0, %v1618_v51  ;;  %v1613_v41 = vpop.permute.xlu1 %1612 }
0x10ae   :  { %1615 = vst.msk [vmem:[#allocation4] sm:$0xff] %vm99_vm0, %v1613_v41 }
0x10af   :  { %1721 = vrot.lane.b32.xlu0 %v1710_v42, %s2219_s19 }
0x10b4   :  { %v1742_v16 = vld [vmem:[#allocation5] sm:$0xff] }
0x10b5   :  { %v382_v43 = vpop.permute.xlu1 %381  ;;  %v2821_v28 = vld [vmem:[#allocation4] sm:$0xff] }
0x10b6   :  { %384 = vst.msk [vmem:[%s2989_s10] sm:$0xff] %vm99_vm0, %v382_v43  ;;  %2055 = vmatmul.msk.f32.vlgmr.msrb.gmra.mxu2 %vm99_vm0, %v2821_v28 }
0x10bd   :  { %v584_v45 = vpop.permute.xlu1 %583 }
0x10be   :  { %v586_v44 = vmul.f32 %v584_v45, %v2481_v2  ;;  %v1842_v2 = vld [vmem:[#allocation3] sm:$0xff] }
0x10c0   :  { %588 = vrot.lane.b32.xlu1 %v586_v44, %s2220_s20 }
0x10c8   :  { %687 = vperm.xlu1 %2070, %v2209_v47  }
0x1119   :  { %v485_v48 = vpop.permute.xlu0 %484 }
0x111a   :  { %2005 = vst.msk [vmem:[%s2990_s11 + $0x38] sm:$0xff] %vm99_vm0, %v485_v48 }
0x1121   :  { %v1722_v53 = vpop.permute.xlu0 %1721 }
0x1122   :  { %1724 = vst.msk [vmem:[#allocation7] sm:$0xff] %vm99_vm0, %v1722_v53 }
0x1128   :  { %v1865_v54 = vpop.f32.mrf.mxu3 }
0x1129   :  { %v1868_v61 = vadd.f32 %v1865_v54, %v1842_v2  ;;  %v2212_v54 = vld [vmem:[%s2987_s2 + $0x18] sm:$0xff] }
0x112b   :  { %2185 = vtanh.f32 %v1868_v61  ;;  %v2059_v18 = vmul.f32 -1.442695, %v1868_v61  ;;  %v1844_v61 = vld [vmem:[#allocation7] sm:$0xff] }
0x1131   :  { %v2186_v62 = vpop.eup %2185 }
0x1132   :  { %1895 = vrot.lane.b32.xlu0 %v2186_v62, %s2215_s1  ;;  %v589_v63 = vpop.permute.xlu1 %588 }
0x1133   :  { %2009 = vst.msk [vmem:[%s2989_s10 + $0x8] sm:$0xff] %vm99_vm0, %v589_v63 }
0x1139   :  { %v1763_v49 = vpop.f32.mrf.mxu2 }
0x113a   :  { %v1766_v55 = vadd.f32 %v1763_v49, %v1740_v59  ;;  %791 = vperm.xlu0 %2069, %v2210_v3   ;;  %v688_v6 = vpop.permute.xlu1 %687 }
0x113b   :  { %v690_v10 = vmul.f32 %v688_v6, %v2476_v0 }
0x113c   :  { %2187 = vtanh.f32 %v1766_v55  ;;  %v2056_v24 = vmul.f32 -1.442695, %v1766_v55 }
0x113d   :  { %2189 = vpow2.f32 %v2059_v18 }
0x1142   :  { %v2188_v5 = vpop.eup %2187 }
0x1143   :  { %1793 = vrot.lane.b32.xlu2 %v2188_v5, %s2215_s1  ;;  %v2190_v19 = vpop.eup %2189 }
0x1144   :  { %v1872_v20 = vadd.f32 1.0, %v2190_v19 }
0x1146   :  { %2191 = vrcp.f32 %v1872_v20  ;;  %v1884_v15 = vand.u32 2147483648, %v1872_v20  ;;  %vm1878_vm2 = vweird.f32 %v1872_v20  ;;  %v1882_v57 = vand.u32 2147483647, %v1872_v20 }
0x1147   :  { %2193 = vpow2.f32 %v2056_v24 }
0x1148   :  { %v1885_v35 = vor.u32 1.1754944e-38, %v1884_v15  ;;  %vm1883_vm4 = vcmp.eq.f32.partialorder %v1882_v57, 8.507059e+37 }
0x114b   :  { %692 = vrot.lane.b32.xlu2 %v690_v10, %s2220_s20 }
0x114c   :  { %v2192_v21 = vpop.eup %2191 }
0x114d   :  { %v1874_v25 = vmul.f32 %v2192_v21, %v1872_v20  ;;  %v2194_v26 = vpop.eup %2193  ;;  %vm1879_vm1 = vweird.f32 %v2192_v21 }
0x114e   :  { %v1770_v32 = vadd.f32 1.0, %v2194_v26  ;;  %vm1880_vm3 = vmor %vm1878_vm2, %vm1879_vm1  ;;  %v2054_v26 = vld [vmem:[%s2987_s2 + $0x38] sm:$0xff] }
0x114f   :  { %v1875_v0 = vsub.f32 1.0, %v1874_v25  ;;  %vm1808_vm10 = vcmp.gt.f32.partialorder %v2054_v26, 0.0 }
0x1150   :  { %2195 = vrcp.f32 %v1770_v32  ;;  %v1782_v53 = vand.u32 2147483648, %v1770_v32  ;;  %vm1776_vm6 = vweird.f32 %v1770_v32  ;;  %v1780_v2 = vand.u32 2147483647, %v1770_v32 }
0x1151   :  { %v1876_v30 = vmul.f32 %v2192_v21, %v1875_v0 }
0x1152   :  { %vm1781_vm8 = vcmp.eq.f32.partialorder %v1780_v2, 8.507059e+37 }
0x1153   :  { %895 = vperm.xlu2 %2068, %v2211_v11   ;;  %v1877_v56 = vadd.f32 %v2192_v21, %v1876_v30 }
0x1155   :  { %v1881_v9 = vsel %vm1880_vm3, %v2192_v21, %v1877_v56 }
0x1156   :  { %v2856_v36 = vsel %vm1883_vm4, %v1885_v35, %v1881_v9  ;;  %v2196_v41 = vpop.eup %2195 }
0x1157   :  { %v1772_v42 = vmul.f32 %v2196_v41, %v1770_v32  ;;  %vm1777_vm5 = vweird.f32 %v2196_v41 }
0x1158   :  { %vm1778_vm7 = vmor %vm1776_vm6, %vm1777_vm5 }
0x1159   :  { %v1773_v45 = vsub.f32 1.0, %v1772_v42 }
0x115b   :  { %1788 = vrot.lane.b32.xlu2 %v1742_v16, %s2214_s22  ;;  %v1774_v22 = vmul.f32 %v2196_v41, %v1773_v45 }
0x115d   :  { %v1775_v48 = vadd.f32 %v2196_v41, %v1774_v22 }
0x119d   :  { %v1794_v33 = vpop.permute.xlu2 %1793 }
0x11a4   :  { %v1896_v12 = vpop.permute.xlu0 %1895 }
0x11a5   :  { %v1898_v50 = vmul.f32 %v1896_v12, %v2856_v36  ;;  %v693_v51 = vpop.permute.xlu2 %692 }
0x11a6   :  { %2013 = vst.msk [vmem:[%s2990_s11 + $0x30] sm:$0xff] %vm99_vm0, %v693_v51 }
0x11a7   :  { %1900 = vrot.lane.b32.xlu2 %v1898_v50, %s2214_s22 }
0x11ac   :  { %v792_v43 = vpop.permute.xlu0 %791 }
0x11ad   :  { %v794_v44 = vmul.f32 %v792_v43, %v2531_v29  ;;  %v896_v47 = vpop.permute.xlu2 %895  ;;  %v1779_v29 = vsel %vm1778_vm7, %v2196_v41, %v1775_v48 }
0x11ae   :  { %v898_v37 = vmul.f32 %v896_v47, %v2535_v31  ;;  %v1783_v31 = vor.u32 1.1754944e-38, %v1782_v53 }
0x11af   :  { %796 = vrot.lane.b32.xlu1 %v794_v44, %s2220_s20 }
0x11b0   :  { %900 = vrot.lane.b32.xlu0 %v898_v37, %s2220_s20  ;;  %v2872_v62 = vsel %vm1781_vm8, %v1783_v31, %v1779_v29 }
0x11b1   :  { %v1796_v63 = vmul.f32 %v1794_v33, %v2872_v62  ;;  %v1809_v33 = vsel %vm1808_vm10, 1, %v2216_v4 }
0x11b5   :  { %v1789_v10 = vpop.permute.xlu2 %1788 }
0x11b7   :  { %999 = vperm.xlu1 %2070, %v2212_v54  }
0x11b8   :  { %1890 = vrot.lane.b32.xlu0 %v1844_v61, %s2214_s22 }
0x11bf   :  { %1798 = vrot.lane.b32.xlu1 %v1796_v63, %s2214_s22 }
0x11c7   :  { %1103 = vperm.xlu1 %2070, %v2576_v34  }
0x1201   :  { %v1901_v11 = vpop.permute.xlu2 %1900 }
0x1221   :  { %v797_v59 = vpop.permute.xlu1 %796 }
0x1222   :  { %2017 = vst.msk [vmem:[%s2989_s10 + $0x10] sm:$0xff] %vm99_vm0, %v797_v59  ;;  %v901_v49 = vpop.permute.xlu0 %900 }
0x1223   :  { %2021 = vst.msk [vmem:[%s2990_s11 + $0x28] sm:$0xff] %vm99_vm0, %v901_v49 }
0x1229   :  { %v1000_v55 = vpop.permute.xlu1 %999 }
0x122a   :  { %v1002_v3 = vmul.f32 %v1000_v55, %v2585_v8  ;;  %v2891_v16 = vpop.permute.xlu0 %1890 }
0x122c   :  { %1004 = vrot.lane.b32.xlu0 %v1002_v3, %s2220_s20 }
0x1231   :  { %v1799_v5 = vpop.permute.xlu1 %1798 }
0x1234   :  { %1207 = vperm.xlu0 %2069, %v2649_v14  }
0x1239   :  { %v1104_v34 = vpop.permute.xlu1 %1103 }
0x123a   :  { %v1106_v6 = vmul.f32 %v1104_v34, %v2590_v13  ;;  %v1841_v13 = vld [vmem:[%s2988_s3] sm:$0xff] }
0x123b   :  { %vm1910_vm9 = vcmp.gt.f32.partialorder %v1841_v13, 0.0 }
0x123c   :  { %1108 = vrot.lane.b32.xlu2 %v1106_v6, %s2220_s20  ;;  %v1911_v20 = vsel %vm1910_vm9, 1, %v2216_v4 }
0x1244   :  { %1311 = vperm.xlu2 %2068, %v2659_v1  }
0x1296   :  { %v1109_v18 = vpop.permute.xlu2 %1108 }
0x1297   :  { %2029 = vst.msk [vmem:[%s2990_s11 + $0x20] sm:$0xff] %vm99_vm0, %v1109_v18 }
0x129e   :  { %v1312_v8 = vpop.permute.xlu2 %1311  ;;  %v1005_v19 = vpop.permute.xlu0 %1004 }
0x129f   :  { %v1314_v14 = vmul.f32 %v1312_v8, %v2670_v17  ;;  %2025 = vst.msk [vmem:[%s2989_s10 + $0x18] sm:$0xff] %vm99_vm0, %v1005_v19  ;;  %v1791_v17 = vmul.f32 %v1789_v10, %v2872_v62 }
0x12a1   :  { %1316 = vrot.lane.b32.xlu0 %v1314_v14, %s2220_s20  ;;  %v1801_v24 = vadd.f32 %v1799_v5, %v1791_v17 }
0x12a3   :  { %2197 = vtanh.f32 %v1801_v24 }
0x12a6   :  { %v1208_v1 = vpop.permute.xlu0 %1207 }
0x12a7   :  { %v1210_v21 = vmul.f32 %v1208_v1, %v2675_v23  ;;  %v1893_v23 = vmul.f32 %v2891_v16, %v2856_v36 }
0x12a9   :  { %1913 = vperm.xlu0 %2069, %v1911_v20   ;;  %1212 = vrot.lane.b32.xlu1 %v1210_v21, %s2220_s20  ;;  %v2198_v25 = vpop.eup %2197  ;;  %v1903_v0 = vadd.f32 %v1901_v11, %v1893_v23 }
0x12ab   :  { %2199 = vtanh.f32 %v1903_v0 }
0x12b1   :  { %1519 = vperm.xlu0 %2069, %v2722_v38   ;;  %1415 = vperm.xlu1 %2070, %v2709_v52   ;;  %v2200_v52 = vpop.eup %2199 }
0x12b9   :  { %1804 = vrot.lane.b32.xlu0 %v2198_v25, %s2218_s18  ;;  %1815 = vrot.lane.b32.xlu1 %v2821_v28, %s2217_s15 }
0x12c1   :  { %1831 = vperm.xlu0 %2069, %v2054_v26   ;;  %1623 = vperm.xlu1 %2070, %v2764_v40  }
0x12c9   :  { %1906 = vrot.lane.b32.xlu1 %v2200_v52, %s2218_s18 }
0x12d1   :  { %1933 = vperm.xlu1 %2070, %v1841_v13  }
0x1313   :  { %v1317_v38 = vpop.permute.xlu0 %1316 }
0x1314   :  { %2037 = vst.msk [vmem:[%s2990_s11 + $0x18] sm:$0xff] %vm99_vm0, %v1317_v38 }
0x131b   :  { %v1213_v28 = vpop.permute.xlu1 %1212  ;;  %v1914_v57 = vpop.permute.xlu0 %1913 }
0x131c   :  { %2033 = vst.msk [vmem:[%s2989_s10 + $0x20] sm:$0xff] %vm99_vm0, %v1213_v28  ;;  %vm1915_vm12 = vcmp.eq.s32.totalorder %v1914_v57, 1 }
0x131d   :  { %v1916_v42 = vsel %vm1915_vm12, %v1903_v0, %v2891_v16 }
0x1323   :  { %v1416_v30 = vpop.permute.xlu1 %1415  ;;  %v1520_v9 = vpop.permute.xlu0 %1519 }
0x1324   :  { %v1418_v40 = vmul.f32 %v1416_v30, %v2731_v7  ;;  %v1522_v7 = vmul.f32 %v1520_v9, %v2735_v46 }
0x1326   :  { %1420 = vrot.lane.b32.xlu2 %v1418_v40, %s2220_s20 }
0x132b   :  { %v1816_v32 = vpop.permute.xlu1 %1815  ;;  %v1805_v4 = vpop.permute.xlu0 %1804 }
0x132e   :  { %1811 = vperm.xlu2 %2068, %v1809_v33  }
0x1333   :  { %v1624_v56 = vpop.permute.xlu1 %1623  ;;  %v1832_v44 = vpop.permute.xlu0 %1831 }
0x1334   :  { %v1626_v15 = vmul.f32 %v1624_v56, %v2787_v27  ;;  %v1807_v27 = vmul.f32 %v1805_v4, %v2872_v62 }
0x1336   :  { %1917 = vrot.lane.b32.xlu2 %v2811_v39, %s2217_s15  ;;  %1628 = vrot.lane.b32.xlu0 %v1626_v15, %s2220_s20 }
0x133b   :  { %v1907_v46 = vpop.permute.xlu1 %1906 }
0x133e   :  { %1727 = vperm.xlu2 %2068, %v2778_v60   ;;  %v1909_v60 = vmul.f32 %v1907_v46, %v2856_v36 }
0x1343   :  { %v1934_v36 = vpop.permute.xlu1 %1933 }
0x1346   :  { %1524 = vrot.lane.b32.xlu2 %v1522_v7, %s2220_s20 }
0x1380   :  { %v1421_v35 = vpop.permute.xlu2 %1420 }
0x1381   :  { %2041 = vst.msk [vmem:[%s2989_s10 + $0x28] sm:$0xff] %vm99_vm0, %v1421_v35 }
0x1388   :  { %v1812_v39 = vpop.permute.xlu2 %1811 }
0x1389   :  { %vm1813_vm11 = vcmp.eq.s32.totalorder %v1812_v39, 1 }
0x138a   :  { %v1814_v12 = vsel %vm1813_vm11, %v1801_v24, %v1789_v10  ;;  %v1818_v50 = vsel %vm1813_vm11, %v1807_v27, %v1816_v32 }
0x138b   :  { %1825 = vrot.lane.b32.xlu0 %v1814_v12, %s2219_s19  ;;  %1820 = vrot.lane.b32.xlu2 %v1818_v50, %s2220_s20  ;;  %v1834_v37 = vmul.f32 %v1832_v44, %v1818_v50 }
0x1390   :  { %v1918_v51 = vpop.permute.xlu2 %1917 }
0x1391   :  { %v1920_v41 = vsel %vm1915_vm12, %v1909_v60, %v1918_v51 }
0x1392   :  { %v1936_v48 = vmul.f32 %v1934_v36, %v1920_v41 }
0x1393   :  { %1927 = vrot.lane.b32.xlu0 %v1916_v42, %s2219_s19  ;;  %1922 = vrot.lane.b32.xlu2 %v1920_v41, %s2220_s20 }
0x1398   :  { %v1728_v43 = vpop.permute.xlu2 %1727 }
0x1399   :  { %v1730_v45 = vmul.f32 %v1728_v43, %v2793_v58 }
0x139b   :  { %1732 = vrot.lane.b32.xlu1 %v1730_v45, %s2220_s20 }
0x13a0   :  { %v1525_v47 = vpop.permute.xlu2 %1524 }
0x13a1   :  { %2045 = vst.msk [vmem:[%s2990_s11 + $0x10] sm:$0xff] %vm99_vm0, %v1525_v47 }
0x13a3   :  { %1836 = vrot.lane.b32.xlu1 %v1834_v37, %s2220_s20 }
0x13a8   :  { %v1629_v22 = vpop.permute.xlu0 %1628 }
0x13a9   :  { %2049 = vst.msk [vmem:[%s2989_s10 + $0x30] sm:$0xff] %vm99_vm0, %v1629_v22 }
0x13ab   :  { %1938 = vrot.lane.b32.xlu1 %v1936_v48, %s2220_s20 }
0x13e5   :  { %v1821_v58 = vpop.permute.xlu2 %1820 }
0x13e6   :  { %1823 = vst.msk [vmem:[#allocation4] sm:$0xff] %vm99_vm0, %v1821_v58 }
0x13ed   :  { %v1923_v53 = vpop.permute.xlu2 %1922 }
0x13ee   :  { %1925 = vst.msk [vmem:[#allocation6] sm:$0xff] %vm99_vm0, %v1923_v53 }
0x13fd   :  { %v1826_v2 = vpop.permute.xlu0 %1825 }
0x13fe   :  { %1828 = vst.msk [vmem:[#allocation5] sm:$0xff] %vm99_vm0, %v1826_v2 }
0x1405   :  { %v1928_v54 = vpop.permute.xlu0 %1927 }
0x1406   :  { %1930 = vst.msk [vmem:[#allocation7] sm:$0xff] %vm99_vm0, %v1928_v54 }
0x140d   :  { %v1733_v61 = vpop.permute.xlu1 %1732 }
0x140e   :  { %2053 = vst.msk [vmem:[%s2990_s11 + $0x8] sm:$0xff] %vm99_vm0, %v1733_v61 }
0x1415   :  { %v1837_v29 = vpop.permute.xlu1 %1836 }
0x1416   :  { %2057 = vst.msk [vmem:[%s2989_s10 + $0x38] sm:$0xff] %vm99_vm0, %v1837_v29 }
0x141d   :  { %v1939_v31 = vpop.permute.xlu1 %1938 }
0x141e   :  { %1941 = vst.msk [vmem:[%s2990_s11] sm:$0xff] %vm99_vm0, %v1939_v31 }

</bundles_post_ra>
